<compile_context>
chip_gen: v7x
topology: tpu7x:2x2x1
jax: 0.10.0
libtpu: 0.0.40
codegen_flags: <defaults>
</compile_context>

<pallas_src>
import jax
import jax.numpy as jnp
from jax.experimental import pallas as pl
from jax.experimental.pallas import tpu as pltpu

# ---------------------------------------------------------------------------
# Small-but-faithful ViT config (B/16 structure, scaled down for the test)
# ---------------------------------------------------------------------------
IMG = 32          # image size
CHANS = 3
PATCH = 16        # ViT-B/16 patch size
DIM = 128         # hidden dim
HEADS = 4
HEAD_DIM = DIM // HEADS
FF = 4 * DIM      # MLP hidden (4x, like ViT-B)
LAYERS = 2
CLASSES = 2
LN_EPS = 1e-6     # ViT uses LayerNorm(eps=1e-6)

GH = IMG // PATCH
GW = IMG // PATCH
NUM_PATCHES = GH * GW           # 4
SEQ = NUM_PATCHES + 1           # 5 = cls + patches
S_PAD = 8                       # sequence padded to a sublane multiple
PK = CHANS * PATCH * PATCH      # 768 = flattened patch length
HEAD_N = 128                    # classifier output padded to lane width
SCALE = 1.0 / float(HEAD_DIM) ** 0.5

BLOCK_KEYS = ('ln1_g', 'ln1_b', 'wqkv', 'bqkv', 'wproj', 'bproj',
              'ln2_g', 'ln2_b', 'w1', 'b1', 'w2', 'b2')
N_BLK_PARAMS = len(BLOCK_KEYS)


# ---------------------------------------------------------------------------
# Kernel helpers
# ---------------------------------------------------------------------------
def _layernorm(x, gamma, beta, eps=LN_EPS):
    mean = jnp.mean(x, axis=-1, keepdims=True)
    xc = x - mean
    var = jnp.mean(xc * xc, axis=-1, keepdims=True)
    return xc * jax.lax.rsqrt(var + eps) * gamma + beta


def _mm(a, b_bf16):
    """MXU matmul: operands bf16, accumulate f32."""
    return jnp.dot(a.astype(jnp.bfloat16), b_bf16,
                   preferred_element_type=jnp.float32)


# ---------------------------------------------------------------------------
# The one fused kernel: whole ViT forward for a single image per grid step
# ---------------------------------------------------------------------------
def _vit_kernel(*refs):
    patches_ref, patch_w, patch_b, pos_cls = refs[:4]
    blocks = [refs[4 + l * N_BLK_PARAMS: 4 + (l + 1) * N_BLK_PARAMS]
              for l in range(LAYERS)]
    ln_g, ln_b, head_w, head_b, o_ref = refs[4 + LAYERS * N_BLK_PARAMS:]

    # ---- patch embedding (Conv2d k=P s=P == per-patch matmul) + cls + pos ----
    tok = _mm(patches_ref[0], patch_w[...]) + patch_b[...]            # (S_PAD, DIM)
    rows = jax.lax.broadcasted_iota(jnp.int32, (S_PAD, 1), 0)
    is_patch_row = jnp.logical_and(rows >= 1, rows <= NUM_PATCHES)
    # pos_cls row 0 already holds cls_token + pos[0]; padded rows are exactly 0.
    x = jnp.where(is_patch_row, tok, 0.0) + pos_cls[...]              # (S_PAD, DIM)

    # ---- pre-norm transformer blocks, fully resident (no HBM round-trips) ----
    key_mask_col = jax.lax.broadcasted_iota(jnp.int32, (S_PAD, S_PAD), 1)
    for (ln1_g, ln1_b, wqkv, bqkv, wproj, bproj,
         ln2_g, ln2_b, w1, b1, w2, b2) in blocks:
        # -- attention sub-block: LN1 -> QKV -> per-head softmax(QK^T)V -> proj + res
        h = _layernorm(x, ln1_g[...], ln1_b[...])
        qkv = _mm(h, wqkv[...]) + bqkv[...]                           # (S_PAD, 3*DIM)
        head_outs = []
        for hh in range(HEADS):
            q = qkv[:, hh * HEAD_DIM:(hh + 1) * HEAD_DIM]
            k = qkv[:, DIM + hh * HEAD_DIM: DIM + (hh + 1) * HEAD_DIM]
            v = qkv[:, 2 * DIM + hh * HEAD_DIM: 2 * DIM + (hh + 1) * HEAD_DIM]
            s = jax.lax.dot_general(
                q.astype(jnp.bfloat16), k.astype(jnp.bfloat16),
                dimension_numbers=(((1,), (1,)), ((), ())),
                preferred_element_type=jnp.float32) * SCALE           # (S_PAD, S_PAD)
            s = jnp.where(key_mask_col < SEQ, s, -1e30)               # mask padded keys
            m = jnp.max(s, axis=-1, keepdims=True)
            p = jnp.exp(s - m)
            p = p / jnp.sum(p, axis=-1, keepdims=True)                # exact divide
            head_outs.append(_mm(p, v.astype(jnp.bfloat16)))          # (S_PAD, HEAD_DIM)
        attn = jnp.concatenate(head_outs, axis=1)                     # (S_PAD, DIM) lane-dense
        x = x + _mm(attn, wproj[...]) + bproj[...]

        # -- MLP sub-block: LN2 -> fc1 -> GELU -> fc2 + residual
        h2 = _layernorm(x, ln2_g[...], ln2_b[...])
        f = _mm(h2, w1[...]) + b1[...]
        # TODO(synk): PyTorch F.gelu is exact erf-GELU; tanh approximation used here.
        f = jax.nn.gelu(f, approximate=True)
        x = x + _mm(f, w2[...]) + b2[...]

    # ---- final LayerNorm + classifier head; lane-dense output, row 0 = cls logits ----
    xn = _layernorm(x, ln_g[...], ln_b[...])
    o_ref[0] = _mm(xn, head_w[...]) + head_b[...]                     # (S_PAD, HEAD_N)


# ---------------------------------------------------------------------------
# Wrapper: one pallas_call for the whole forward, grid over batch ("parallel")
# ---------------------------------------------------------------------------
def _const_spec(shape):
    zeros = (0,) * len(shape)
    return pl.BlockSpec(shape, lambda b, _z=zeros: _z)


def _flatten_params(params):
    flat = [params['patch_w'], params['patch_b'], params['pos_cls']]
    for blk in params['blocks']:
        flat.extend(blk[k] for k in BLOCK_KEYS)
    flat.extend([params['ln_g'], params['ln_b'], params['head_w'], params['head_b']])
    return flat


def _cost_estimate(batch):
    mm_flops = 2 * S_PAD * PK * DIM                                    # patch embed
    per_blk = (2 * S_PAD * DIM * 3 * DIM                               # qkv
               + HEADS * 2 * (2 * S_PAD * S_PAD * HEAD_DIM)            # scores + PV
               + 2 * S_PAD * DIM * DIM                                 # proj
               + 2 * (2 * S_PAD * DIM * FF))                           # mlp
    mm_flops += LAYERS * per_blk + 2 * S_PAD * DIM * HEAD_N            # head
    trans = LAYERS * (HEADS * S_PAD * S_PAD + S_PAD * FF)              # exp + gelu
    w_bytes = 2 * (PK * DIM + LAYERS * (DIM * 3 * DIM + DIM * DIM + 2 * DIM * FF)
                   + DIM * HEAD_N)
    io_bytes = 4 * (S_PAD * PK + S_PAD * HEAD_N)
    return pl.CostEstimate(flops=batch * mm_flops,
                           transcendentals=batch * trans,
                           bytes_accessed=batch * (w_bytes + io_bytes))


def vit_forward(x_nchw, params):
    B = x_nchw.shape[0]
    x = x_nchw.astype(jnp.float32)
    # Patch extraction (channel-major within a patch, matching the OIHW conv-weight
    # flattening): (B, C, H, W) -> (B, num_patches, C*P*P); pad once so row 0 is
    # reserved for the cls token and rows SEQ..S_PAD-1 are zero padding.
    xp = x.reshape(B, CHANS, GH, PATCH, GW, PATCH)
    xp = jnp.transpose(xp, (0, 2, 4, 1, 3, 5)).reshape(B, NUM_PATCHES, PK)
    patches = jnp.pad(xp, ((0, 0), (1, S_PAD - 1 - NUM_PATCHES), (0, 0)))

    flat = _flatten_params(params)
    in_specs = [pl.BlockSpec((1, S_PAD, PK), lambda b: (b, 0, 0))]
    in_specs += [_const_spec(p.shape) for p in flat]

    out = pl.pallas_call(
        _vit_kernel,
        out_shape=jax.ShapeDtypeStruct((B, S_PAD, HEAD_N), jnp.float32),
        grid_spec=pltpu.PrefetchScalarGridSpec(
            num_scalar_prefetch=0,
            grid=(B,),                                   # one image per grid step
            in_specs=in_specs,
            out_specs=pl.BlockSpec((1, S_PAD, HEAD_N), lambda b: (b, 0, 0)),
        ),
        compiler_params=pltpu.CompilerParams(
            dimension_semantics=("parallel",)),          # v7x: shard batch over TCs
        cost_estimate=_cost_estimate(B),
    )(patches, *flat)

    # row 0 of each image's slab holds the (lane-padded) logits.
    return out[:, 0, :CLASSES]                           # (B, 2)


# ---------------------------------------------------------------------------
# Deterministic parameters (pre-transposed, pre-padded, bf16 MXU operands)
# ---------------------------------------------------------------------------
def make_params(key):
    kit = iter(jax.random.split(key, 64))

    def nrm(shape, scale=0.02):
        return scale * jax.random.normal(next(kit), shape, jnp.float32)

    p = {}
    w = nrm((DIM, CHANS, PATCH, PATCH))                                # torch OIHW conv weight
    p['patch_w'] = jnp.transpose(w, (1, 2, 3, 0)).reshape(PK, DIM).astype(jnp.bfloat16)
    p['patch_b'] = nrm((1, DIM))

    cls_token = nrm((1, DIM))
    pos = nrm((SEQ, DIM))
    pos_cls = jnp.zeros((S_PAD, DIM), jnp.float32).at[:SEQ].set(pos)
    pos_cls = pos_cls.at[0].add(cls_token[0])                          # fold cls into row 0
    p['pos_cls'] = pos_cls

    blocks = []
    for _ in range(LAYERS):
        blk = {}
        blk['ln1_g'] = jnp.ones((1, DIM), jnp.float32)
        blk['ln1_b'] = jnp.zeros((1, DIM), jnp.float32)
        wq, wk, wv = nrm((DIM, DIM)), nrm((DIM, DIM)), nrm((DIM, DIM))  # torch (out, in)
        blk['wqkv'] = jnp.concatenate([wq.T, wk.T, wv.T], axis=1).astype(jnp.bfloat16)  # (D, 3D)
        blk['bqkv'] = nrm((1, 3 * DIM))
        blk['wproj'] = nrm((DIM, DIM)).T.astype(jnp.bfloat16)
        blk['bproj'] = nrm((1, DIM))
        blk['ln2_g'] = jnp.ones((1, DIM), jnp.float32)
        blk['ln2_b'] = jnp.zeros((1, DIM), jnp.float32)
        blk['w1'] = nrm((FF, DIM)).T.astype(jnp.bfloat16)               # (D, FF)
        blk['b1'] = nrm((1, FF))
        blk['w2'] = nrm((DIM, FF)).T.astype(jnp.bfloat16)               # (FF, D)
        blk['b2'] = nrm((1, DIM))
        blocks.append(blk)
    p['blocks'] = blocks

    p['ln_g'] = jnp.ones((1, DIM), jnp.float32)
    p['ln_b'] = jnp.zeros((1, DIM), jnp.float32)
    hw = nrm((CLASSES, DIM))                                            # torch (out, in)
    p['head_w'] = (jnp.zeros((DIM, HEAD_N), jnp.float32)
                   .at[:, :CLASSES].set(hw.T).astype(jnp.bfloat16))
    p['head_b'] = jnp.zeros((1, HEAD_N), jnp.float32)
    return p


# TODO(synk): pretrained 'B_16_imagenet1k' weights cannot be loaded in-script;
# deterministic random weights at a scaled-down ViT config are used instead.
# NOTE: the "all weights resident in one kernel" strategy is sized for this toy
# config; at real ViT-B scale (DIM=768, FF=3072, 12 layers) weights must be
# streamed per layer, especially on v7x's 64 MiB VMEM.

if __name__ == "__main__":
    key = jax.random.PRNGKey(0)
    kx, kp = jax.random.split(key)
    x = jax.random.normal(kx, (2, CHANS, IMG, IMG), jnp.float32)        # NCHW like PyTorch
    params = make_params(kp)

    fwd = jax.jit(vit_forward)
    out = jax.block_until_ready(fwd(x, params))

    assert out.shape == (2, CLASSES)
    assert bool(jnp.all(jnp.isfinite(out)))
    print("KERNEL_OK")
</pallas_src>

<mosaic_0001>
module attributes {stable_mosaic.version = 11 : i64} {
  func.func @_vit_kernel(%arg0: i32, %arg1: memref<1x8x768xf32, #tpu.memory_space<vmem>>, %arg2: memref<768x128xbf16, #tpu.memory_space<vmem>>, %arg3: memref<1x128xf32, #tpu.memory_space<vmem>>, %arg4: memref<8x128xf32, #tpu.memory_space<vmem>>, %arg5: memref<1x128xf32, #tpu.memory_space<vmem>>, %arg6: memref<1x128xf32, #tpu.memory_space<vmem>>, %arg7: memref<128x384xbf16, #tpu.memory_space<vmem>>, %arg8: memref<1x384xf32, #tpu.memory_space<vmem>>, %arg9: memref<128x128xbf16, #tpu.memory_space<vmem>>, %arg10: memref<1x128xf32, #tpu.memory_space<vmem>>, %arg11: memref<1x128xf32, #tpu.memory_space<vmem>>, %arg12: memref<1x128xf32, #tpu.memory_space<vmem>>, %arg13: memref<128x512xbf16, #tpu.memory_space<vmem>>, %arg14: memref<1x512xf32, #tpu.memory_space<vmem>>, %arg15: memref<512x128xbf16, #tpu.memory_space<vmem>>, %arg16: memref<1x128xf32, #tpu.memory_space<vmem>>, %arg17: memref<1x128xf32, #tpu.memory_space<vmem>>, %arg18: memref<1x128xf32, #tpu.memory_space<vmem>>, %arg19: memref<128x384xbf16, #tpu.memory_space<vmem>>, %arg20: memref<1x384xf32, #tpu.memory_space<vmem>>, %arg21: memref<128x128xbf16, #tpu.memory_space<vmem>>, %arg22: memref<1x128xf32, #tpu.memory_space<vmem>>, %arg23: memref<1x128xf32, #tpu.memory_space<vmem>>, %arg24: memref<1x128xf32, #tpu.memory_space<vmem>>, %arg25: memref<128x512xbf16, #tpu.memory_space<vmem>>, %arg26: memref<1x512xf32, #tpu.memory_space<vmem>>, %arg27: memref<512x128xbf16, #tpu.memory_space<vmem>>, %arg28: memref<1x128xf32, #tpu.memory_space<vmem>>, %arg29: memref<1x128xf32, #tpu.memory_space<vmem>>, %arg30: memref<1x128xf32, #tpu.memory_space<vmem>>, %arg31: memref<128x128xbf16, #tpu.memory_space<vmem>>, %arg32: memref<1x128xf32, #tpu.memory_space<vmem>>, %arg33: memref<1x8x128xf32, #tpu.memory_space<vmem>>) attributes {dimension_semantics = [#tpu.dimension_semantics<parallel>], iteration_bounds = array<i64: 2>, scalar_prefetch = 0 : i64, scratch_operands = 0 : i64, tpu.core_type = #tpu.core_type<tc>, window_params = [{transform_indices = @transform_0, window_bounds = array<i64: 1, 8, 768>}, {pipeline_mode = #tpu.pipeline_mode<synchronous>, transform_indices = @transform_1, window_bounds = array<i64: 768, 128>}, {pipeline_mode = #tpu.pipeline_mode<synchronous>, transform_indices = @transform_2, window_bounds = array<i64: 1, 128>}, {pipeline_mode = #tpu.pipeline_mode<synchronous>, transform_indices = @transform_3, window_bounds = array<i64: 8, 128>}, {pipeline_mode = #tpu.pipeline_mode<synchronous>, transform_indices = @transform_4, window_bounds = array<i64: 1, 128>}, {pipeline_mode = #tpu.pipeline_mode<synchronous>, transform_indices = @transform_5, window_bounds = array<i64: 1, 128>}, {pipeline_mode = #tpu.pipeline_mode<synchronous>, transform_indices = @transform_6, window_bounds = array<i64: 128, 384>}, {pipeline_mode = #tpu.pipeline_mode<synchronous>, transform_indices = @transform_7, window_bounds = array<i64: 1, 384>}, {pipeline_mode = #tpu.pipeline_mode<synchronous>, transform_indices = @transform_8, window_bounds = array<i64: 128, 128>}, {pipeline_mode = #tpu.pipeline_mode<synchronous>, transform_indices = @transform_9, window_bounds = array<i64: 1, 128>}, {pipeline_mode = #tpu.pipeline_mode<synchronous>, transform_indices = @transform_10, window_bounds = array<i64: 1, 128>}, {pipeline_mode = #tpu.pipeline_mode<synchronous>, transform_indices = @transform_11, window_bounds = array<i64: 1, 128>}, {pipeline_mode = #tpu.pipeline_mode<synchronous>, transform_indices = @transform_12, window_bounds = array<i64: 128, 512>}, {pipeline_mode = #tpu.pipeline_mode<synchronous>, transform_indices = @transform_13, window_bounds = array<i64: 1, 512>}, {pipeline_mode = #tpu.pipeline_mode<synchronous>, transform_indices = @transform_14, window_bounds = array<i64: 512, 128>}, {pipeline_mode = #tpu.pipeline_mode<synchronous>, transform_indices = @transform_15, window_bounds = array<i64: 1, 128>}, {pipeline_mode = #tpu.pipeline_mode<synchronous>, transform_indices = @transform_16, window_bounds = array<i64: 1, 128>}, {pipeline_mode = #tpu.pipeline_mode<synchronous>, transform_indices = @transform_17, window_bounds = array<i64: 1, 128>}, {pipeline_mode = #tpu.pipeline_mode<synchronous>, transform_indices = @transform_18, window_bounds = array<i64: 128, 384>}, {pipeline_mode = #tpu.pipeline_mode<synchronous>, transform_indices = @transform_19, window_bounds = array<i64: 1, 384>}, {pipeline_mode = #tpu.pipeline_mode<synchronous>, transform_indices = @transform_20, window_bounds = array<i64: 128, 128>}, {pipeline_mode = #tpu.pipeline_mode<synchronous>, transform_indices = @transform_21, window_bounds = array<i64: 1, 128>}, {pipeline_mode = #tpu.pipeline_mode<synchronous>, transform_indices = @transform_22, window_bounds = array<i64: 1, 128>}, {pipeline_mode = #tpu.pipeline_mode<synchronous>, transform_indices = @transform_23, window_bounds = array<i64: 1, 128>}, {pipeline_mode = #tpu.pipeline_mode<synchronous>, transform_indices = @transform_24, window_bounds = array<i64: 128, 512>}, {pipeline_mode = #tpu.pipeline_mode<synchronous>, transform_indices = @transform_25, window_bounds = array<i64: 1, 512>}, {pipeline_mode = #tpu.pipeline_mode<synchronous>, transform_indices = @transform_26, window_bounds = array<i64: 512, 128>}, {pipeline_mode = #tpu.pipeline_mode<synchronous>, transform_indices = @transform_27, window_bounds = array<i64: 1, 128>}, {pipeline_mode = #tpu.pipeline_mode<synchronous>, transform_indices = @transform_28, window_bounds = array<i64: 1, 128>}, {pipeline_mode = #tpu.pipeline_mode<synchronous>, transform_indices = @transform_29, window_bounds = array<i64: 1, 128>}, {pipeline_mode = #tpu.pipeline_mode<synchronous>, transform_indices = @transform_30, window_bounds = array<i64: 128, 128>}, {pipeline_mode = #tpu.pipeline_mode<synchronous>, transform_indices = @transform_31, window_bounds = array<i64: 1, 128>}, {transform_indices = @transform_32, window_bounds = array<i64: 1, 8, 128>}]} {
    %c0 = arith.constant 0 : index
    %c0_0 = arith.constant 0 : index
    %c0_1 = arith.constant 0 : index
    %0 = vector.load %arg1[%c0, %c0_0, %c0_1] : memref<1x8x768xf32, #tpu.memory_space<vmem>>, vector<1x8x768xf32>
    %1 = vector.shape_cast %0 : vector<1x8x768xf32> to vector<8x768xf32>
    %c0_2 = arith.constant 0 : index
    %c0_3 = arith.constant 0 : index
    %2 = vector.load %arg2[%c0_2, %c0_3] : memref<768x128xbf16, #tpu.memory_space<vmem>>, vector<768x128xbf16>
    %3 = arith.truncf %1 : vector<8x768xf32> to vector<8x768xbf16>
    %cst = arith.constant dense<0.000000e+00> : vector<8x128xf32>
    %4 = tpu.matmul %3, %2, %cst {dimension_numbers = #tpu.dot_dimension_numbers<[1], [0], [0], [1], [0, 0, 1, 1], [], []>} : vector<8x768xbf16>, vector<768x128xbf16>, vector<8x128xf32> -> vector<8x128xf32>
    %c0_4 = arith.constant 0 : index
    %c0_5 = arith.constant 0 : index
    %5 = vector.load %arg3[%c0_4, %c0_5] : memref<1x128xf32, #tpu.memory_space<vmem>>, vector<1x128xf32>
    %6 = vector.broadcast %5 : vector<1x128xf32> to vector<8x128xf32>
    %7 = arith.addf %4, %6 : vector<8x128xf32>
    %8 = tpu.iota {dimensions = array<i32: 0>} : vector<8x1xi32>
    %c1_i32 = arith.constant 1 : i32
    %9 = vector.broadcast %c1_i32 : i32 to vector<8x1xi32>
    %10 = arith.cmpi sge, %8, %9 : vector<8x1xi32>
    %c4_i32 = arith.constant 4 : i32
    %11 = vector.broadcast %c4_i32 : i32 to vector<8x1xi32>
    %12 = arith.cmpi sle, %8, %11 : vector<8x1xi32>
    %13 = arith.andi %10, %12 : vector<8x1xi1>
    %cst_6 = arith.constant 0.000000e+00 : f32
    %14 = vector.shape_cast %13 : vector<8x1xi1> to vector<8x1xi1>
    %15 = vector.broadcast %14 : vector<8x1xi1> to vector<8x128xi1>
    %16 = vector.broadcast %cst_6 : f32 to vector<8x128xf32>
    %17 = arith.select %15, %7, %16 : vector<8x128xi1>, vector<8x128xf32>
    %c0_7 = arith.constant 0 : index
    %c0_8 = arith.constant 0 : index
    %18 = vector.load %arg4[%c0_7, %c0_8] : memref<8x128xf32, #tpu.memory_space<vmem>>, vector<8x128xf32>
    %19 = arith.addf %17, %18 : vector<8x128xf32>
    %20 = tpu.iota {dimensions = array<i32: 1>} : vector<8x8xi32>
    %c0_9 = arith.constant 0 : index
    %c0_10 = arith.constant 0 : index
    %21 = vector.load %arg5[%c0_9, %c0_10] : memref<1x128xf32, #tpu.memory_space<vmem>>, vector<1x128xf32>
    %c0_11 = arith.constant 0 : index
    %c0_12 = arith.constant 0 : index
    %22 = vector.load %arg6[%c0_11, %c0_12] : memref<1x128xf32, #tpu.memory_space<vmem>>, vector<1x128xf32>
    %cst_13 = arith.constant dense<0.000000e+00> : vector<8xf32>
    %23 = vector.multi_reduction <add>, %19, %cst_13 [1] : vector<8x128xf32> to vector<8xf32>
    %24 = vector.shape_cast %23 : vector<8xf32> to vector<8x1xf32>
    %cst_14 = arith.constant 1.280000e+02 : f32
    %25 = vector.broadcast %cst_14 : f32 to vector<8x1xf32>
    %26 = arith.divf %24, %25 : vector<8x1xf32>
    %27 = vector.broadcast %26 : vector<8x1xf32> to vector<8x128xf32>
    %28 = arith.subf %19, %27 : vector<8x128xf32>
    %29 = arith.mulf %28, %28 : vector<8x128xf32>
    %cst_15 = arith.constant dense<0.000000e+00> : vector<8xf32>
    %30 = vector.multi_reduction <add>, %29, %cst_15 [1] : vector<8x128xf32> to vector<8xf32>
    %31 = vector.shape_cast %30 : vector<8xf32> to vector<8x1xf32>
    %cst_16 = arith.constant 1.280000e+02 : f32
    %32 = vector.broadcast %cst_16 : f32 to vector<8x1xf32>
    %33 = arith.divf %31, %32 : vector<8x1xf32>
    %cst_17 = arith.constant 9.99999997E-7 : f32
    %34 = vector.broadcast %cst_17 : f32 to vector<8x1xf32>
    %35 = arith.addf %33, %34 : vector<8x1xf32>
    %36 = math.rsqrt %35 : vector<8x1xf32>
    %37 = vector.broadcast %36 : vector<8x1xf32> to vector<8x128xf32>
    %38 = arith.mulf %28, %37 : vector<8x128xf32>
    %39 = vector.broadcast %21 : vector<1x128xf32> to vector<8x128xf32>
    %40 = arith.mulf %38, %39 : vector<8x128xf32>
    %41 = vector.broadcast %22 : vector<1x128xf32> to vector<8x128xf32>
    %42 = arith.addf %40, %41 : vector<8x128xf32>
    %c0_18 = arith.constant 0 : index
    %c0_19 = arith.constant 0 : index
    %43 = vector.load %arg7[%c0_18, %c0_19] : memref<128x384xbf16, #tpu.memory_space<vmem>>, vector<128x384xbf16>
    %44 = arith.truncf %42 : vector<8x128xf32> to vector<8x128xbf16>
    %cst_20 = arith.constant dense<0.000000e+00> : vector<8x384xf32>
    %45 = tpu.matmul %44, %43, %cst_20 {dimension_numbers = #tpu.dot_dimension_numbers<[1], [0], [0], [1], [0, 0, 1, 1], [], []>} : vector<8x128xbf16>, vector<128x384xbf16>, vector<8x384xf32> -> vector<8x384xf32>
    %c0_21 = arith.constant 0 : index
    %c0_22 = arith.constant 0 : index
    %46 = vector.load %arg8[%c0_21, %c0_22] : memref<1x384xf32, #tpu.memory_space<vmem>>, vector<1x384xf32>
    %47 = vector.broadcast %46 : vector<1x384xf32> to vector<8x384xf32>
    %48 = arith.addf %45, %47 : vector<8x384xf32>
    %49 = vector.extract_strided_slice %48 {offsets = [0, 0], sizes = [8, 32], strides = [1, 1]} : vector<8x384xf32> to vector<8x32xf32>
    %50 = vector.extract_strided_slice %48 {offsets = [0, 128], sizes = [8, 32], strides = [1, 1]} : vector<8x384xf32> to vector<8x32xf32>
    %51 = vector.extract_strided_slice %48 {offsets = [0, 256], sizes = [8, 32], strides = [1, 1]} : vector<8x384xf32> to vector<8x32xf32>
    %52 = arith.truncf %49 : vector<8x32xf32> to vector<8x32xbf16>
    %53 = arith.truncf %50 : vector<8x32xf32> to vector<8x32xbf16>
    %cst_23 = arith.constant dense<0.000000e+00> : vector<8x8xf32>
    %54 = tpu.matmul %52, %53, %cst_23 {dimension_numbers = #tpu.dot_dimension_numbers<[1], [1], [0], [0], [0, 0, 1, 0], [], []>} : vector<8x32xbf16>, vector<8x32xbf16>, vector<8x8xf32> -> vector<8x8xf32>
    %cst_24 = arith.constant 0.176776692 : f32
    %55 = vector.broadcast %cst_24 : f32 to vector<8x8xf32>
    %56 = arith.mulf %54, %55 : vector<8x8xf32>
    %c5_i32 = arith.constant 5 : i32
    %57 = vector.broadcast %c5_i32 : i32 to vector<8x8xi32>
    %58 = arith.cmpi slt, %20, %57 : vector<8x8xi32>
    %cst_25 = arith.constant -1.000000e+30 : f32
    %59 = vector.broadcast %cst_25 : f32 to vector<8x8xf32>
    %60 = arith.select %58, %56, %59 : vector<8x8xi1>, vector<8x8xf32>
    %cst_26 = arith.constant dense<0xFF800000> : vector<8xf32>
    %61 = vector.multi_reduction <maximumf>, %60, %cst_26 [1] : vector<8x8xf32> to vector<8xf32>
    %62 = vector.shape_cast %61 : vector<8xf32> to vector<8x1xf32>
    %63 = vector.broadcast %62 : vector<8x1xf32> to vector<8x8xf32>
    %64 = arith.subf %60, %63 : vector<8x8xf32>
    %65 = math.exp %64 : vector<8x8xf32>
    %cst_27 = arith.constant dense<0.000000e+00> : vector<8xf32>
    %66 = vector.multi_reduction <add>, %65, %cst_27 [1] : vector<8x8xf32> to vector<8xf32>
    %67 = vector.shape_cast %66 : vector<8xf32> to vector<8x1xf32>
    %68 = vector.broadcast %67 : vector<8x1xf32> to vector<8x8xf32>
    %69 = arith.divf %65, %68 : vector<8x8xf32>
    %70 = arith.truncf %51 : vector<8x32xf32> to vector<8x32xbf16>
    %71 = arith.truncf %69 : vector<8x8xf32> to vector<8x8xbf16>
    %cst_28 = arith.constant dense<0.000000e+00> : vector<8x32xf32>
    %72 = tpu.matmul %71, %70, %cst_28 {dimension_numbers = #tpu.dot_dimension_numbers<[1], [0], [0], [1], [0, 0, 1, 1], [], []>} : vector<8x8xbf16>, vector<8x32xbf16>, vector<8x32xf32> -> vector<8x32xf32>
    %73 = vector.extract_strided_slice %48 {offsets = [0, 32], sizes = [8, 32], strides = [1, 1]} : vector<8x384xf32> to vector<8x32xf32>
    %74 = vector.extract_strided_slice %48 {offsets = [0, 160], sizes = [8, 32], strides = [1, 1]} : vector<8x384xf32> to vector<8x32xf32>
    %75 = vector.extract_strided_slice %48 {offsets = [0, 288], sizes = [8, 32], strides = [1, 1]} : vector<8x384xf32> to vector<8x32xf32>
    %76 = arith.truncf %73 : vector<8x32xf32> to vector<8x32xbf16>
    %77 = arith.truncf %74 : vector<8x32xf32> to vector<8x32xbf16>
    %cst_29 = arith.constant dense<0.000000e+00> : vector<8x8xf32>
    %78 = tpu.matmul %76, %77, %cst_29 {dimension_numbers = #tpu.dot_dimension_numbers<[1], [1], [0], [0], [0, 0, 1, 0], [], []>} : vector<8x32xbf16>, vector<8x32xbf16>, vector<8x8xf32> -> vector<8x8xf32>
    %cst_30 = arith.constant 0.176776692 : f32
    %79 = vector.broadcast %cst_30 : f32 to vector<8x8xf32>
    %80 = arith.mulf %78, %79 : vector<8x8xf32>
    %c5_i32_31 = arith.constant 5 : i32
    %81 = vector.broadcast %c5_i32_31 : i32 to vector<8x8xi32>
    %82 = arith.cmpi slt, %20, %81 : vector<8x8xi32>
    %cst_32 = arith.constant -1.000000e+30 : f32
    %83 = vector.broadcast %cst_32 : f32 to vector<8x8xf32>
    %84 = arith.select %82, %80, %83 : vector<8x8xi1>, vector<8x8xf32>
    %cst_33 = arith.constant dense<0xFF800000> : vector<8xf32>
    %85 = vector.multi_reduction <maximumf>, %84, %cst_33 [1] : vector<8x8xf32> to vector<8xf32>
    %86 = vector.shape_cast %85 : vector<8xf32> to vector<8x1xf32>
    %87 = vector.broadcast %86 : vector<8x1xf32> to vector<8x8xf32>
    %88 = arith.subf %84, %87 : vector<8x8xf32>
    %89 = math.exp %88 : vector<8x8xf32>
    %cst_34 = arith.constant dense<0.000000e+00> : vector<8xf32>
    %90 = vector.multi_reduction <add>, %89, %cst_34 [1] : vector<8x8xf32> to vector<8xf32>
    %91 = vector.shape_cast %90 : vector<8xf32> to vector<8x1xf32>
    %92 = vector.broadcast %91 : vector<8x1xf32> to vector<8x8xf32>
    %93 = arith.divf %89, %92 : vector<8x8xf32>
    %94 = arith.truncf %75 : vector<8x32xf32> to vector<8x32xbf16>
    %95 = arith.truncf %93 : vector<8x8xf32> to vector<8x8xbf16>
    %cst_35 = arith.constant dense<0.000000e+00> : vector<8x32xf32>
    %96 = tpu.matmul %95, %94, %cst_35 {dimension_numbers = #tpu.dot_dimension_numbers<[1], [0], [0], [1], [0, 0, 1, 1], [], []>} : vector<8x8xbf16>, vector<8x32xbf16>, vector<8x32xf32> -> vector<8x32xf32>
    %97 = vector.extract_strided_slice %48 {offsets = [0, 64], sizes = [8, 32], strides = [1, 1]} : vector<8x384xf32> to vector<8x32xf32>
    %98 = vector.extract_strided_slice %48 {offsets = [0, 192], sizes = [8, 32], strides = [1, 1]} : vector<8x384xf32> to vector<8x32xf32>
    %99 = vector.extract_strided_slice %48 {offsets = [0, 320], sizes = [8, 32], strides = [1, 1]} : vector<8x384xf32> to vector<8x32xf32>
    %100 = arith.truncf %97 : vector<8x32xf32> to vector<8x32xbf16>
    %101 = arith.truncf %98 : vector<8x32xf32> to vector<8x32xbf16>
    %cst_36 = arith.constant dense<0.000000e+00> : vector<8x8xf32>
    %102 = tpu.matmul %100, %101, %cst_36 {dimension_numbers = #tpu.dot_dimension_numbers<[1], [1], [0], [0], [0, 0, 1, 0], [], []>} : vector<8x32xbf16>, vector<8x32xbf16>, vector<8x8xf32> -> vector<8x8xf32>
    %cst_37 = arith.constant 0.176776692 : f32
    %103 = vector.broadcast %cst_37 : f32 to vector<8x8xf32>
    %104 = arith.mulf %102, %103 : vector<8x8xf32>
    %c5_i32_38 = arith.constant 5 : i32
    %105 = vector.broadcast %c5_i32_38 : i32 to vector<8x8xi32>
    %106 = arith.cmpi slt, %20, %105 : vector<8x8xi32>
    %cst_39 = arith.constant -1.000000e+30 : f32
    %107 = vector.broadcast %cst_39 : f32 to vector<8x8xf32>
    %108 = arith.select %106, %104, %107 : vector<8x8xi1>, vector<8x8xf32>
    %cst_40 = arith.constant dense<0xFF800000> : vector<8xf32>
    %109 = vector.multi_reduction <maximumf>, %108, %cst_40 [1] : vector<8x8xf32> to vector<8xf32>
    %110 = vector.shape_cast %109 : vector<8xf32> to vector<8x1xf32>
    %111 = vector.broadcast %110 : vector<8x1xf32> to vector<8x8xf32>
    %112 = arith.subf %108, %111 : vector<8x8xf32>
    %113 = math.exp %112 : vector<8x8xf32>
    %cst_41 = arith.constant dense<0.000000e+00> : vector<8xf32>
    %114 = vector.multi_reduction <add>, %113, %cst_41 [1] : vector<8x8xf32> to vector<8xf32>
    %115 = vector.shape_cast %114 : vector<8xf32> to vector<8x1xf32>
    %116 = vector.broadcast %115 : vector<8x1xf32> to vector<8x8xf32>
    %117 = arith.divf %113, %116 : vector<8x8xf32>
    %118 = arith.truncf %99 : vector<8x32xf32> to vector<8x32xbf16>
    %119 = arith.truncf %117 : vector<8x8xf32> to vector<8x8xbf16>
    %cst_42 = arith.constant dense<0.000000e+00> : vector<8x32xf32>
    %120 = tpu.matmul %119, %118, %cst_42 {dimension_numbers = #tpu.dot_dimension_numbers<[1], [0], [0], [1], [0, 0, 1, 1], [], []>} : vector<8x8xbf16>, vector<8x32xbf16>, vector<8x32xf32> -> vector<8x32xf32>
    %121 = vector.extract_strided_slice %48 {offsets = [0, 96], sizes = [8, 32], strides = [1, 1]} : vector<8x384xf32> to vector<8x32xf32>
    %122 = vector.extract_strided_slice %48 {offsets = [0, 224], sizes = [8, 32], strides = [1, 1]} : vector<8x384xf32> to vector<8x32xf32>
    %123 = vector.extract_strided_slice %48 {offsets = [0, 352], sizes = [8, 32], strides = [1, 1]} : vector<8x384xf32> to vector<8x32xf32>
    %124 = arith.truncf %121 : vector<8x32xf32> to vector<8x32xbf16>
    %125 = arith.truncf %122 : vector<8x32xf32> to vector<8x32xbf16>
    %cst_43 = arith.constant dense<0.000000e+00> : vector<8x8xf32>
    %126 = tpu.matmul %124, %125, %cst_43 {dimension_numbers = #tpu.dot_dimension_numbers<[1], [1], [0], [0], [0, 0, 1, 0], [], []>} : vector<8x32xbf16>, vector<8x32xbf16>, vector<8x8xf32> -> vector<8x8xf32>
    %cst_44 = arith.constant 0.176776692 : f32
    %127 = vector.broadcast %cst_44 : f32 to vector<8x8xf32>
    %128 = arith.mulf %126, %127 : vector<8x8xf32>
    %c5_i32_45 = arith.constant 5 : i32
    %129 = vector.broadcast %c5_i32_45 : i32 to vector<8x8xi32>
    %130 = arith.cmpi slt, %20, %129 : vector<8x8xi32>
    %cst_46 = arith.constant -1.000000e+30 : f32
    %131 = vector.broadcast %cst_46 : f32 to vector<8x8xf32>
    %132 = arith.select %130, %128, %131 : vector<8x8xi1>, vector<8x8xf32>
    %cst_47 = arith.constant dense<0xFF800000> : vector<8xf32>
    %133 = vector.multi_reduction <maximumf>, %132, %cst_47 [1] : vector<8x8xf32> to vector<8xf32>
    %134 = vector.shape_cast %133 : vector<8xf32> to vector<8x1xf32>
    %135 = vector.broadcast %134 : vector<8x1xf32> to vector<8x8xf32>
    %136 = arith.subf %132, %135 : vector<8x8xf32>
    %137 = math.exp %136 : vector<8x8xf32>
    %cst_48 = arith.constant dense<0.000000e+00> : vector<8xf32>
    %138 = vector.multi_reduction <add>, %137, %cst_48 [1] : vector<8x8xf32> to vector<8xf32>
    %139 = vector.shape_cast %138 : vector<8xf32> to vector<8x1xf32>
    %140 = vector.broadcast %139 : vector<8x1xf32> to vector<8x8xf32>
    %141 = arith.divf %137, %140 : vector<8x8xf32>
    %142 = arith.truncf %123 : vector<8x32xf32> to vector<8x32xbf16>
    %143 = arith.truncf %141 : vector<8x8xf32> to vector<8x8xbf16>
    %cst_49 = arith.constant dense<0.000000e+00> : vector<8x32xf32>
    %144 = tpu.matmul %143, %142, %cst_49 {dimension_numbers = #tpu.dot_dimension_numbers<[1], [0], [0], [1], [0, 0, 1, 1], [], []>} : vector<8x8xbf16>, vector<8x32xbf16>, vector<8x32xf32> -> vector<8x32xf32>
    %145 = tpu.concatenate %72, %96, %120, %144 in 1 : vector<8x32xf32>, vector<8x32xf32>, vector<8x32xf32>, vector<8x32xf32> -> vector<8x128xf32>
    %c0_50 = arith.constant 0 : index
    %c0_51 = arith.constant 0 : index
    %146 = vector.load %arg9[%c0_50, %c0_51] : memref<128x128xbf16, #tpu.memory_space<vmem>>, vector<128x128xbf16>
    %147 = arith.truncf %145 : vector<8x128xf32> to vector<8x128xbf16>
    %cst_52 = arith.constant dense<0.000000e+00> : vector<8x128xf32>
    %148 = tpu.matmul %147, %146, %cst_52 {dimension_numbers = #tpu.dot_dimension_numbers<[1], [0], [0], [1], [0, 0, 1, 1], [], []>} : vector<8x128xbf16>, vector<128x128xbf16>, vector<8x128xf32> -> vector<8x128xf32>
    %149 = arith.addf %19, %148 : vector<8x128xf32>
    %c0_53 = arith.constant 0 : index
    %c0_54 = arith.constant 0 : index
    %150 = vector.load %arg10[%c0_53, %c0_54] : memref<1x128xf32, #tpu.memory_space<vmem>>, vector<1x128xf32>
    %151 = vector.broadcast %150 : vector<1x128xf32> to vector<8x128xf32>
    %152 = arith.addf %149, %151 : vector<8x128xf32>
    %c0_55 = arith.constant 0 : index
    %c0_56 = arith.constant 0 : index
    %153 = vector.load %arg11[%c0_55, %c0_56] : memref<1x128xf32, #tpu.memory_space<vmem>>, vector<1x128xf32>
    %c0_57 = arith.constant 0 : index
    %c0_58 = arith.constant 0 : index
    %154 = vector.load %arg12[%c0_57, %c0_58] : memref<1x128xf32, #tpu.memory_space<vmem>>, vector<1x128xf32>
    %cst_59 = arith.constant dense<0.000000e+00> : vector<8xf32>
    %155 = vector.multi_reduction <add>, %152, %cst_59 [1] : vector<8x128xf32> to vector<8xf32>
    %156 = vector.shape_cast %155 : vector<8xf32> to vector<8x1xf32>
    %cst_60 = arith.constant 1.280000e+02 : f32
    %157 = vector.broadcast %cst_60 : f32 to vector<8x1xf32>
    %158 = arith.divf %156, %157 : vector<8x1xf32>
    %159 = vector.broadcast %158 : vector<8x1xf32> to vector<8x128xf32>
    %160 = arith.subf %152, %159 : vector<8x128xf32>
    %161 = arith.mulf %160, %160 : vector<8x128xf32>
    %cst_61 = arith.constant dense<0.000000e+00> : vector<8xf32>
    %162 = vector.multi_reduction <add>, %161, %cst_61 [1] : vector<8x128xf32> to vector<8xf32>
    %163 = vector.shape_cast %162 : vector<8xf32> to vector<8x1xf32>
    %cst_62 = arith.constant 1.280000e+02 : f32
    %164 = vector.broadcast %cst_62 : f32 to vector<8x1xf32>
    %165 = arith.divf %163, %164 : vector<8x1xf32>
    %cst_63 = arith.constant 9.99999997E-7 : f32
    %166 = vector.broadcast %cst_63 : f32 to vector<8x1xf32>
    %167 = arith.addf %165, %166 : vector<8x1xf32>
    %168 = math.rsqrt %167 : vector<8x1xf32>
    %169 = vector.broadcast %168 : vector<8x1xf32> to vector<8x128xf32>
    %170 = arith.mulf %160, %169 : vector<8x128xf32>
    %171 = vector.broadcast %153 : vector<1x128xf32> to vector<8x128xf32>
    %172 = arith.mulf %170, %171 : vector<8x128xf32>
    %173 = vector.broadcast %154 : vector<1x128xf32> to vector<8x128xf32>
    %174 = arith.addf %172, %173 : vector<8x128xf32>
    %c0_64 = arith.constant 0 : index
    %c0_65 = arith.constant 0 : index
    %175 = vector.load %arg13[%c0_64, %c0_65] : memref<128x512xbf16, #tpu.memory_space<vmem>>, vector<128x512xbf16>
    %176 = arith.truncf %174 : vector<8x128xf32> to vector<8x128xbf16>
    %cst_66 = arith.constant dense<0.000000e+00> : vector<8x512xf32>
    %177 = tpu.matmul %176, %175, %cst_66 {dimension_numbers = #tpu.dot_dimension_numbers<[1], [0], [0], [1], [0, 0, 1, 1], [], []>} : vector<8x128xbf16>, vector<128x512xbf16>, vector<8x512xf32> -> vector<8x512xf32>
    %c0_67 = arith.constant 0 : index
    %c0_68 = arith.constant 0 : index
    %178 = vector.load %arg14[%c0_67, %c0_68] : memref<1x512xf32, #tpu.memory_space<vmem>>, vector<1x512xf32>
    %179 = vector.broadcast %178 : vector<1x512xf32> to vector<8x512xf32>
    %180 = arith.addf %177, %179 : vector<8x512xf32>
    %181 = arith.mulf %180, %180 : vector<8x512xf32>
    %182 = arith.mulf %180, %181 : vector<8x512xf32>
    %cst_69 = arith.constant 4.471500e-02 : f32
    %183 = vector.broadcast %cst_69 : f32 to vector<8x512xf32>
    %184 = arith.mulf %183, %182 : vector<8x512xf32>
    %185 = arith.addf %180, %184 : vector<8x512xf32>
    %cst_70 = arith.constant 0.797884583 : f32
    %186 = vector.broadcast %cst_70 : f32 to vector<8x512xf32>
    %187 = arith.mulf %186, %185 : vector<8x512xf32>
    %188 = math.tanh %187 : vector<8x512xf32>
    %cst_71 = arith.constant 1.000000e+00 : f32
    %189 = vector.broadcast %cst_71 : f32 to vector<8x512xf32>
    %190 = arith.addf %189, %188 : vector<8x512xf32>
    %cst_72 = arith.constant 5.000000e-01 : f32
    %191 = vector.broadcast %cst_72 : f32 to vector<8x512xf32>
    %192 = arith.mulf %191, %190 : vector<8x512xf32>
    %193 = arith.mulf %180, %192 : vector<8x512xf32>
    %c0_73 = arith.constant 0 : index
    %c0_74 = arith.constant 0 : index
    %194 = vector.load %arg15[%c0_73, %c0_74] : memref<512x128xbf16, #tpu.memory_space<vmem>>, vector<512x128xbf16>
    %195 = arith.truncf %193 : vector<8x512xf32> to vector<8x512xbf16>
    %cst_75 = arith.constant dense<0.000000e+00> : vector<8x128xf32>
    %196 = tpu.matmul %195, %194, %cst_75 {dimension_numbers = #tpu.dot_dimension_numbers<[1], [0], [0], [1], [0, 0, 1, 1], [], []>} : vector<8x512xbf16>, vector<512x128xbf16>, vector<8x128xf32> -> vector<8x128xf32>
    %197 = arith.addf %152, %196 : vector<8x128xf32>
    %c0_76 = arith.constant 0 : index
    %c0_77 = arith.constant 0 : index
    %198 = vector.load %arg16[%c0_76, %c0_77] : memref<1x128xf32, #tpu.memory_space<vmem>>, vector<1x128xf32>
    %199 = vector.broadcast %198 : vector<1x128xf32> to vector<8x128xf32>
    %200 = arith.addf %197, %199 : vector<8x128xf32>
    %c0_78 = arith.constant 0 : index
    %c0_79 = arith.constant 0 : index
    %201 = vector.load %arg17[%c0_78, %c0_79] : memref<1x128xf32, #tpu.memory_space<vmem>>, vector<1x128xf32>
    %c0_80 = arith.constant 0 : index
    %c0_81 = arith.constant 0 : index
    %202 = vector.load %arg18[%c0_80, %c0_81] : memref<1x128xf32, #tpu.memory_space<vmem>>, vector<1x128xf32>
    %cst_82 = arith.constant dense<0.000000e+00> : vector<8xf32>
    %203 = vector.multi_reduction <add>, %200, %cst_82 [1] : vector<8x128xf32> to vector<8xf32>
    %204 = vector.shape_cast %203 : vector<8xf32> to vector<8x1xf32>
    %cst_83 = arith.constant 1.280000e+02 : f32
    %205 = vector.broadcast %cst_83 : f32 to vector<8x1xf32>
    %206 = arith.divf %204, %205 : vector<8x1xf32>
    %207 = vector.broadcast %206 : vector<8x1xf32> to vector<8x128xf32>
    %208 = arith.subf %200, %207 : vector<8x128xf32>
    %209 = arith.mulf %208, %208 : vector<8x128xf32>
    %cst_84 = arith.constant dense<0.000000e+00> : vector<8xf32>
    %210 = vector.multi_reduction <add>, %209, %cst_84 [1] : vector<8x128xf32> to vector<8xf32>
    %211 = vector.shape_cast %210 : vector<8xf32> to vector<8x1xf32>
    %cst_85 = arith.constant 1.280000e+02 : f32
    %212 = vector.broadcast %cst_85 : f32 to vector<8x1xf32>
    %213 = arith.divf %211, %212 : vector<8x1xf32>
    %cst_86 = arith.constant 9.99999997E-7 : f32
    %214 = vector.broadcast %cst_86 : f32 to vector<8x1xf32>
    %215 = arith.addf %213, %214 : vector<8x1xf32>
    %216 = math.rsqrt %215 : vector<8x1xf32>
    %217 = vector.broadcast %216 : vector<8x1xf32> to vector<8x128xf32>
    %218 = arith.mulf %208, %217 : vector<8x128xf32>
    %219 = vector.broadcast %201 : vector<1x128xf32> to vector<8x128xf32>
    %220 = arith.mulf %218, %219 : vector<8x128xf32>
    %221 = vector.broadcast %202 : vector<1x128xf32> to vector<8x128xf32>
    %222 = arith.addf %220, %221 : vector<8x128xf32>
    %c0_87 = arith.constant 0 : index
    %c0_88 = arith.constant 0 : index
    %223 = vector.load %arg19[%c0_87, %c0_88] : memref<128x384xbf16, #tpu.memory_space<vmem>>, vector<128x384xbf16>
    %224 = arith.truncf %222 : vector<8x128xf32> to vector<8x128xbf16>
    %cst_89 = arith.constant dense<0.000000e+00> : vector<8x384xf32>
    %225 = tpu.matmul %224, %223, %cst_89 {dimension_numbers = #tpu.dot_dimension_numbers<[1], [0], [0], [1], [0, 0, 1, 1], [], []>} : vector<8x128xbf16>, vector<128x384xbf16>, vector<8x384xf32> -> vector<8x384xf32>
    %c0_90 = arith.constant 0 : index
    %c0_91 = arith.constant 0 : index
    %226 = vector.load %arg20[%c0_90, %c0_91] : memref<1x384xf32, #tpu.memory_space<vmem>>, vector<1x384xf32>
    %227 = vector.broadcast %226 : vector<1x384xf32> to vector<8x384xf32>
    %228 = arith.addf %225, %227 : vector<8x384xf32>
    %229 = vector.extract_strided_slice %228 {offsets = [0, 0], sizes = [8, 32], strides = [1, 1]} : vector<8x384xf32> to vector<8x32xf32>
    %230 = vector.extract_strided_slice %228 {offsets = [0, 128], sizes = [8, 32], strides = [1, 1]} : vector<8x384xf32> to vector<8x32xf32>
    %231 = vector.extract_strided_slice %228 {offsets = [0, 256], sizes = [8, 32], strides = [1, 1]} : vector<8x384xf32> to vector<8x32xf32>
    %232 = arith.truncf %229 : vector<8x32xf32> to vector<8x32xbf16>
    %233 = arith.truncf %230 : vector<8x32xf32> to vector<8x32xbf16>
    %cst_92 = arith.constant dense<0.000000e+00> : vector<8x8xf32>
    %234 = tpu.matmul %232, %233, %cst_92 {dimension_numbers = #tpu.dot_dimension_numbers<[1], [1], [0], [0], [0, 0, 1, 0], [], []>} : vector<8x32xbf16>, vector<8x32xbf16>, vector<8x8xf32> -> vector<8x8xf32>
    %cst_93 = arith.constant 0.176776692 : f32
    %235 = vector.broadcast %cst_93 : f32 to vector<8x8xf32>
    %236 = arith.mulf %234, %235 : vector<8x8xf32>
    %c5_i32_94 = arith.constant 5 : i32
    %237 = vector.broadcast %c5_i32_94 : i32 to vector<8x8xi32>
    %238 = arith.cmpi slt, %20, %237 : vector<8x8xi32>
    %cst_95 = arith.constant -1.000000e+30 : f32
    %239 = vector.broadcast %cst_95 : f32 to vector<8x8xf32>
    %240 = arith.select %238, %236, %239 : vector<8x8xi1>, vector<8x8xf32>
    %cst_96 = arith.constant dense<0xFF800000> : vector<8xf32>
    %241 = vector.multi_reduction <maximumf>, %240, %cst_96 [1] : vector<8x8xf32> to vector<8xf32>
    %242 = vector.shape_cast %241 : vector<8xf32> to vector<8x1xf32>
    %243 = vector.broadcast %242 : vector<8x1xf32> to vector<8x8xf32>
    %244 = arith.subf %240, %243 : vector<8x8xf32>
    %245 = math.exp %244 : vector<8x8xf32>
    %cst_97 = arith.constant dense<0.000000e+00> : vector<8xf32>
    %246 = vector.multi_reduction <add>, %245, %cst_97 [1] : vector<8x8xf32> to vector<8xf32>
    %247 = vector.shape_cast %246 : vector<8xf32> to vector<8x1xf32>
    %248 = vector.broadcast %247 : vector<8x1xf32> to vector<8x8xf32>
    %249 = arith.divf %245, %248 : vector<8x8xf32>
    %250 = arith.truncf %231 : vector<8x32xf32> to vector<8x32xbf16>
    %251 = arith.truncf %249 : vector<8x8xf32> to vector<8x8xbf16>
    %cst_98 = arith.constant dense<0.000000e+00> : vector<8x32xf32>
    %252 = tpu.matmul %251, %250, %cst_98 {dimension_numbers = #tpu.dot_dimension_numbers<[1], [0], [0], [1], [0, 0, 1, 1], [], []>} : vector<8x8xbf16>, vector<8x32xbf16>, vector<8x32xf32> -> vector<8x32xf32>
    %253 = vector.extract_strided_slice %228 {offsets = [0, 32], sizes = [8, 32], strides = [1, 1]} : vector<8x384xf32> to vector<8x32xf32>
    %254 = vector.extract_strided_slice %228 {offsets = [0, 160], sizes = [8, 32], strides = [1, 1]} : vector<8x384xf32> to vector<8x32xf32>
    %255 = vector.extract_strided_slice %228 {offsets = [0, 288], sizes = [8, 32], strides = [1, 1]} : vector<8x384xf32> to vector<8x32xf32>
    %256 = arith.truncf %253 : vector<8x32xf32> to vector<8x32xbf16>
    %257 = arith.truncf %254 : vector<8x32xf32> to vector<8x32xbf16>
    %cst_99 = arith.constant dense<0.000000e+00> : vector<8x8xf32>
    %258 = tpu.matmul %256, %257, %cst_99 {dimension_numbers = #tpu.dot_dimension_numbers<[1], [1], [0], [0], [0, 0, 1, 0], [], []>} : vector<8x32xbf16>, vector<8x32xbf16>, vector<8x8xf32> -> vector<8x8xf32>
    %cst_100 = arith.constant 0.176776692 : f32
    %259 = vector.broadcast %cst_100 : f32 to vector<8x8xf32>
    %260 = arith.mulf %258, %259 : vector<8x8xf32>
    %c5_i32_101 = arith.constant 5 : i32
    %261 = vector.broadcast %c5_i32_101 : i32 to vector<8x8xi32>
    %262 = arith.cmpi slt, %20, %261 : vector<8x8xi32>
    %cst_102 = arith.constant -1.000000e+30 : f32
    %263 = vector.broadcast %cst_102 : f32 to vector<8x8xf32>
    %264 = arith.select %262, %260, %263 : vector<8x8xi1>, vector<8x8xf32>
    %cst_103 = arith.constant dense<0xFF800000> : vector<8xf32>
    %265 = vector.multi_reduction <maximumf>, %264, %cst_103 [1] : vector<8x8xf32> to vector<8xf32>
    %266 = vector.shape_cast %265 : vector<8xf32> to vector<8x1xf32>
    %267 = vector.broadcast %266 : vector<8x1xf32> to vector<8x8xf32>
    %268 = arith.subf %264, %267 : vector<8x8xf32>
    %269 = math.exp %268 : vector<8x8xf32>
    %cst_104 = arith.constant dense<0.000000e+00> : vector<8xf32>
    %270 = vector.multi_reduction <add>, %269, %cst_104 [1] : vector<8x8xf32> to vector<8xf32>
    %271 = vector.shape_cast %270 : vector<8xf32> to vector<8x1xf32>
    %272 = vector.broadcast %271 : vector<8x1xf32> to vector<8x8xf32>
    %273 = arith.divf %269, %272 : vector<8x8xf32>
    %274 = arith.truncf %255 : vector<8x32xf32> to vector<8x32xbf16>
    %275 = arith.truncf %273 : vector<8x8xf32> to vector<8x8xbf16>
    %cst_105 = arith.constant dense<0.000000e+00> : vector<8x32xf32>
    %276 = tpu.matmul %275, %274, %cst_105 {dimension_numbers = #tpu.dot_dimension_numbers<[1], [0], [0], [1], [0, 0, 1, 1], [], []>} : vector<8x8xbf16>, vector<8x32xbf16>, vector<8x32xf32> -> vector<8x32xf32>
    %277 = vector.extract_strided_slice %228 {offsets = [0, 64], sizes = [8, 32], strides = [1, 1]} : vector<8x384xf32> to vector<8x32xf32>
    %278 = vector.extract_strided_slice %228 {offsets = [0, 192], sizes = [8, 32], strides = [1, 1]} : vector<8x384xf32> to vector<8x32xf32>
    %279 = vector.extract_strided_slice %228 {offsets = [0, 320], sizes = [8, 32], strides = [1, 1]} : vector<8x384xf32> to vector<8x32xf32>
    %280 = arith.truncf %277 : vector<8x32xf32> to vector<8x32xbf16>
    %281 = arith.truncf %278 : vector<8x32xf32> to vector<8x32xbf16>
    %cst_106 = arith.constant dense<0.000000e+00> : vector<8x8xf32>
    %282 = tpu.matmul %280, %281, %cst_106 {dimension_numbers = #tpu.dot_dimension_numbers<[1], [1], [0], [0], [0, 0, 1, 0], [], []>} : vector<8x32xbf16>, vector<8x32xbf16>, vector<8x8xf32> -> vector<8x8xf32>
    %cst_107 = arith.constant 0.176776692 : f32
    %283 = vector.broadcast %cst_107 : f32 to vector<8x8xf32>
    %284 = arith.mulf %282, %283 : vector<8x8xf32>
    %c5_i32_108 = arith.constant 5 : i32
    %285 = vector.broadcast %c5_i32_108 : i32 to vector<8x8xi32>
    %286 = arith.cmpi slt, %20, %285 : vector<8x8xi32>
    %cst_109 = arith.constant -1.000000e+30 : f32
    %287 = vector.broadcast %cst_109 : f32 to vector<8x8xf32>
    %288 = arith.select %286, %284, %287 : vector<8x8xi1>, vector<8x8xf32>
    %cst_110 = arith.constant dense<0xFF800000> : vector<8xf32>
    %289 = vector.multi_reduction <maximumf>, %288, %cst_110 [1] : vector<8x8xf32> to vector<8xf32>
    %290 = vector.shape_cast %289 : vector<8xf32> to vector<8x1xf32>
    %291 = vector.broadcast %290 : vector<8x1xf32> to vector<8x8xf32>
    %292 = arith.subf %288, %291 : vector<8x8xf32>
    %293 = math.exp %292 : vector<8x8xf32>
    %cst_111 = arith.constant dense<0.000000e+00> : vector<8xf32>
    %294 = vector.multi_reduction <add>, %293, %cst_111 [1] : vector<8x8xf32> to vector<8xf32>
    %295 = vector.shape_cast %294 : vector<8xf32> to vector<8x1xf32>
    %296 = vector.broadcast %295 : vector<8x1xf32> to vector<8x8xf32>
    %297 = arith.divf %293, %296 : vector<8x8xf32>
    %298 = arith.truncf %279 : vector<8x32xf32> to vector<8x32xbf16>
    %299 = arith.truncf %297 : vector<8x8xf32> to vector<8x8xbf16>
    %cst_112 = arith.constant dense<0.000000e+00> : vector<8x32xf32>
    %300 = tpu.matmul %299, %298, %cst_112 {dimension_numbers = #tpu.dot_dimension_numbers<[1], [0], [0], [1], [0, 0, 1, 1], [], []>} : vector<8x8xbf16>, vector<8x32xbf16>, vector<8x32xf32> -> vector<8x32xf32>
    %301 = vector.extract_strided_slice %228 {offsets = [0, 96], sizes = [8, 32], strides = [1, 1]} : vector<8x384xf32> to vector<8x32xf32>
    %302 = vector.extract_strided_slice %228 {offsets = [0, 224], sizes = [8, 32], strides = [1, 1]} : vector<8x384xf32> to vector<8x32xf32>
    %303 = vector.extract_strided_slice %228 {offsets = [0, 352], sizes = [8, 32], strides = [1, 1]} : vector<8x384xf32> to vector<8x32xf32>
    %304 = arith.truncf %301 : vector<8x32xf32> to vector<8x32xbf16>
    %305 = arith.truncf %302 : vector<8x32xf32> to vector<8x32xbf16>
    %cst_113 = arith.constant dense<0.000000e+00> : vector<8x8xf32>
    %306 = tpu.matmul %304, %305, %cst_113 {dimension_numbers = #tpu.dot_dimension_numbers<[1], [1], [0], [0], [0, 0, 1, 0], [], []>} : vector<8x32xbf16>, vector<8x32xbf16>, vector<8x8xf32> -> vector<8x8xf32>
    %cst_114 = arith.constant 0.176776692 : f32
    %307 = vector.broadcast %cst_114 : f32 to vector<8x8xf32>
    %308 = arith.mulf %306, %307 : vector<8x8xf32>
    %c5_i32_115 = arith.constant 5 : i32
    %309 = vector.broadcast %c5_i32_115 : i32 to vector<8x8xi32>
    %310 = arith.cmpi slt, %20, %309 : vector<8x8xi32>
    %cst_116 = arith.constant -1.000000e+30 : f32
    %311 = vector.broadcast %cst_116 : f32 to vector<8x8xf32>
    %312 = arith.select %310, %308, %311 : vector<8x8xi1>, vector<8x8xf32>
    %cst_117 = arith.constant dense<0xFF800000> : vector<8xf32>
    %313 = vector.multi_reduction <maximumf>, %312, %cst_117 [1] : vector<8x8xf32> to vector<8xf32>
    %314 = vector.shape_cast %313 : vector<8xf32> to vector<8x1xf32>
    %315 = vector.broadcast %314 : vector<8x1xf32> to vector<8x8xf32>
    %316 = arith.subf %312, %315 : vector<8x8xf32>
    %317 = math.exp %316 : vector<8x8xf32>
    %cst_118 = arith.constant dense<0.000000e+00> : vector<8xf32>
    %318 = vector.multi_reduction <add>, %317, %cst_118 [1] : vector<8x8xf32> to vector<8xf32>
    %319 = vector.shape_cast %318 : vector<8xf32> to vector<8x1xf32>
    %320 = vector.broadcast %319 : vector<8x1xf32> to vector<8x8xf32>
    %321 = arith.divf %317, %320 : vector<8x8xf32>
    %322 = arith.truncf %303 : vector<8x32xf32> to vector<8x32xbf16>
    %323 = arith.truncf %321 : vector<8x8xf32> to vector<8x8xbf16>
    %cst_119 = arith.constant dense<0.000000e+00> : vector<8x32xf32>
    %324 = tpu.matmul %323, %322, %cst_119 {dimension_numbers = #tpu.dot_dimension_numbers<[1], [0], [0], [1], [0, 0, 1, 1], [], []>} : vector<8x8xbf16>, vector<8x32xbf16>, vector<8x32xf32> -> vector<8x32xf32>
    %325 = tpu.concatenate %252, %276, %300, %324 in 1 : vector<8x32xf32>, vector<8x32xf32>, vector<8x32xf32>, vector<8x32xf32> -> vector<8x128xf32>
    %c0_120 = arith.constant 0 : index
    %c0_121 = arith.constant 0 : index
    %326 = vector.load %arg21[%c0_120, %c0_121] : memref<128x128xbf16, #tpu.memory_space<vmem>>, vector<128x128xbf16>
    %327 = arith.truncf %325 : vector<8x128xf32> to vector<8x128xbf16>
    %cst_122 = arith.constant dense<0.000000e+00> : vector<8x128xf32>
    %328 = tpu.matmul %327, %326, %cst_122 {dimension_numbers = #tpu.dot_dimension_numbers<[1], [0], [0], [1], [0, 0, 1, 1], [], []>} : vector<8x128xbf16>, vector<128x128xbf16>, vector<8x128xf32> -> vector<8x128xf32>
    %329 = arith.addf %200, %328 : vector<8x128xf32>
    %c0_123 = arith.constant 0 : index
    %c0_124 = arith.constant 0 : index
    %330 = vector.load %arg22[%c0_123, %c0_124] : memref<1x128xf32, #tpu.memory_space<vmem>>, vector<1x128xf32>
    %331 = vector.broadcast %330 : vector<1x128xf32> to vector<8x128xf32>
    %332 = arith.addf %329, %331 : vector<8x128xf32>
    %c0_125 = arith.constant 0 : index
    %c0_126 = arith.constant 0 : index
    %333 = vector.load %arg23[%c0_125, %c0_126] : memref<1x128xf32, #tpu.memory_space<vmem>>, vector<1x128xf32>
    %c0_127 = arith.constant 0 : index
    %c0_128 = arith.constant 0 : index
    %334 = vector.load %arg24[%c0_127, %c0_128] : memref<1x128xf32, #tpu.memory_space<vmem>>, vector<1x128xf32>
    %cst_129 = arith.constant dense<0.000000e+00> : vector<8xf32>
    %335 = vector.multi_reduction <add>, %332, %cst_129 [1] : vector<8x128xf32> to vector<8xf32>
    %336 = vector.shape_cast %335 : vector<8xf32> to vector<8x1xf32>
    %cst_130 = arith.constant 1.280000e+02 : f32
    %337 = vector.broadcast %cst_130 : f32 to vector<8x1xf32>
    %338 = arith.divf %336, %337 : vector<8x1xf32>
    %339 = vector.broadcast %338 : vector<8x1xf32> to vector<8x128xf32>
    %340 = arith.subf %332, %339 : vector<8x128xf32>
    %341 = arith.mulf %340, %340 : vector<8x128xf32>
    %cst_131 = arith.constant dense<0.000000e+00> : vector<8xf32>
    %342 = vector.multi_reduction <add>, %341, %cst_131 [1] : vector<8x128xf32> to vector<8xf32>
    %343 = vector.shape_cast %342 : vector<8xf32> to vector<8x1xf32>
    %cst_132 = arith.constant 1.280000e+02 : f32
    %344 = vector.broadcast %cst_132 : f32 to vector<8x1xf32>
    %345 = arith.divf %343, %344 : vector<8x1xf32>
    %cst_133 = arith.constant 9.99999997E-7 : f32
    %346 = vector.broadcast %cst_133 : f32 to vector<8x1xf32>
    %347 = arith.addf %345, %346 : vector<8x1xf32>
    %348 = math.rsqrt %347 : vector<8x1xf32>
    %349 = vector.broadcast %348 : vector<8x1xf32> to vector<8x128xf32>
    %350 = arith.mulf %340, %349 : vector<8x128xf32>
    %351 = vector.broadcast %333 : vector<1x128xf32> to vector<8x128xf32>
    %352 = arith.mulf %350, %351 : vector<8x128xf32>
    %353 = vector.broadcast %334 : vector<1x128xf32> to vector<8x128xf32>
    %354 = arith.addf %352, %353 : vector<8x128xf32>
    %c0_134 = arith.constant 0 : index
    %c0_135 = arith.constant 0 : index
    %355 = vector.load %arg25[%c0_134, %c0_135] : memref<128x512xbf16, #tpu.memory_space<vmem>>, vector<128x512xbf16>
    %356 = arith.truncf %354 : vector<8x128xf32> to vector<8x128xbf16>
    %cst_136 = arith.constant dense<0.000000e+00> : vector<8x512xf32>
    %357 = tpu.matmul %356, %355, %cst_136 {dimension_numbers = #tpu.dot_dimension_numbers<[1], [0], [0], [1], [0, 0, 1, 1], [], []>} : vector<8x128xbf16>, vector<128x512xbf16>, vector<8x512xf32> -> vector<8x512xf32>
    %c0_137 = arith.constant 0 : index
    %c0_138 = arith.constant 0 : index
    %358 = vector.load %arg26[%c0_137, %c0_138] : memref<1x512xf32, #tpu.memory_space<vmem>>, vector<1x512xf32>
    %359 = vector.broadcast %358 : vector<1x512xf32> to vector<8x512xf32>
    %360 = arith.addf %357, %359 : vector<8x512xf32>
    %361 = arith.mulf %360, %360 : vector<8x512xf32>
    %362 = arith.mulf %360, %361 : vector<8x512xf32>
    %cst_139 = arith.constant 4.471500e-02 : f32
    %363 = vector.broadcast %cst_139 : f32 to vector<8x512xf32>
    %364 = arith.mulf %363, %362 : vector<8x512xf32>
    %365 = arith.addf %360, %364 : vector<8x512xf32>
    %cst_140 = arith.constant 0.797884583 : f32
    %366 = vector.broadcast %cst_140 : f32 to vector<8x512xf32>
    %367 = arith.mulf %366, %365 : vector<8x512xf32>
    %368 = math.tanh %367 : vector<8x512xf32>
    %cst_141 = arith.constant 1.000000e+00 : f32
    %369 = vector.broadcast %cst_141 : f32 to vector<8x512xf32>
    %370 = arith.addf %369, %368 : vector<8x512xf32>
    %cst_142 = arith.constant 5.000000e-01 : f32
    %371 = vector.broadcast %cst_142 : f32 to vector<8x512xf32>
    %372 = arith.mulf %371, %370 : vector<8x512xf32>
    %373 = arith.mulf %360, %372 : vector<8x512xf32>
    %c0_143 = arith.constant 0 : index
    %c0_144 = arith.constant 0 : index
    %374 = vector.load %arg27[%c0_143, %c0_144] : memref<512x128xbf16, #tpu.memory_space<vmem>>, vector<512x128xbf16>
    %375 = arith.truncf %373 : vector<8x512xf32> to vector<8x512xbf16>
    %cst_145 = arith.constant dense<0.000000e+00> : vector<8x128xf32>
    %376 = tpu.matmul %375, %374, %cst_145 {dimension_numbers = #tpu.dot_dimension_numbers<[1], [0], [0], [1], [0, 0, 1, 1], [], []>} : vector<8x512xbf16>, vector<512x128xbf16>, vector<8x128xf32> -> vector<8x128xf32>
    %377 = arith.addf %332, %376 : vector<8x128xf32>
    %c0_146 = arith.constant 0 : index
    %c0_147 = arith.constant 0 : index
    %378 = vector.load %arg28[%c0_146, %c0_147] : memref<1x128xf32, #tpu.memory_space<vmem>>, vector<1x128xf32>
    %379 = vector.broadcast %378 : vector<1x128xf32> to vector<8x128xf32>
    %380 = arith.addf %377, %379 : vector<8x128xf32>
    %c0_148 = arith.constant 0 : index
    %c0_149 = arith.constant 0 : index
    %381 = vector.load %arg29[%c0_148, %c0_149] : memref<1x128xf32, #tpu.memory_space<vmem>>, vector<1x128xf32>
    %c0_150 = arith.constant 0 : index
    %c0_151 = arith.constant 0 : index
    %382 = vector.load %arg30[%c0_150, %c0_151] : memref<1x128xf32, #tpu.memory_space<vmem>>, vector<1x128xf32>
    %cst_152 = arith.constant dense<0.000000e+00> : vector<8xf32>
    %383 = vector.multi_reduction <add>, %380, %cst_152 [1] : vector<8x128xf32> to vector<8xf32>
    %384 = vector.shape_cast %383 : vector<8xf32> to vector<8x1xf32>
    %cst_153 = arith.constant 1.280000e+02 : f32
    %385 = vector.broadcast %cst_153 : f32 to vector<8x1xf32>
    %386 = arith.divf %384, %385 : vector<8x1xf32>
    %387 = vector.broadcast %386 : vector<8x1xf32> to vector<8x128xf32>
    %388 = arith.subf %380, %387 : vector<8x128xf32>
    %389 = arith.mulf %388, %388 : vector<8x128xf32>
    %cst_154 = arith.constant dense<0.000000e+00> : vector<8xf32>
    %390 = vector.multi_reduction <add>, %389, %cst_154 [1] : vector<8x128xf32> to vector<8xf32>
    %391 = vector.shape_cast %390 : vector<8xf32> to vector<8x1xf32>
    %cst_155 = arith.constant 1.280000e+02 : f32
    %392 = vector.broadcast %cst_155 : f32 to vector<8x1xf32>
    %393 = arith.divf %391, %392 : vector<8x1xf32>
    %cst_156 = arith.constant 9.99999997E-7 : f32
    %394 = vector.broadcast %cst_156 : f32 to vector<8x1xf32>
    %395 = arith.addf %393, %394 : vector<8x1xf32>
    %396 = math.rsqrt %395 : vector<8x1xf32>
    %397 = vector.broadcast %396 : vector<8x1xf32> to vector<8x128xf32>
    %398 = arith.mulf %388, %397 : vector<8x128xf32>
    %399 = vector.broadcast %381 : vector<1x128xf32> to vector<8x128xf32>
    %400 = arith.mulf %398, %399 : vector<8x128xf32>
    %401 = vector.broadcast %382 : vector<1x128xf32> to vector<8x128xf32>
    %402 = arith.addf %400, %401 : vector<8x128xf32>
    %c0_157 = arith.constant 0 : index
    %c0_158 = arith.constant 0 : index
    %403 = vector.load %arg31[%c0_157, %c0_158] : memref<128x128xbf16, #tpu.memory_space<vmem>>, vector<128x128xbf16>
    %404 = arith.truncf %402 : vector<8x128xf32> to vector<8x128xbf16>
    %cst_159 = arith.constant dense<0.000000e+00> : vector<8x128xf32>
    %405 = tpu.matmul %404, %403, %cst_159 {dimension_numbers = #tpu.dot_dimension_numbers<[1], [0], [0], [1], [0, 0, 1, 1], [], []>} : vector<8x128xbf16>, vector<128x128xbf16>, vector<8x128xf32> -> vector<8x128xf32>
    %c0_160 = arith.constant 0 : index
    %c0_161 = arith.constant 0 : index
    %406 = vector.load %arg32[%c0_160, %c0_161] : memref<1x128xf32, #tpu.memory_space<vmem>>, vector<1x128xf32>
    %407 = vector.broadcast %406 : vector<1x128xf32> to vector<8x128xf32>
    %408 = arith.addf %405, %407 : vector<8x128xf32>
    %c0_162 = arith.constant 0 : index
    %c0_163 = arith.constant 0 : index
    %c0_164 = arith.constant 0 : index
    %409 = vector.load %arg33[%c0_162, %c0_163, %c0_164] : memref<1x8x128xf32, #tpu.memory_space<vmem>>, vector<1x8x128xf32>
    %410 = vector.shape_cast %409 : vector<1x8x128xf32> to vector<8x128xf32>
    %411 = vector.shape_cast %408 : vector<8x128xf32> to vector<1x8x128xf32>
    tpu.vector_store %arg33[%c0_162, %c0_163, %c0_164], %411 {strides = array<i32>} : memref<1x8x128xf32, #tpu.memory_space<vmem>>, vector<1x8x128xf32>,
    return
  }
  func.func @transform_0(%arg0: i32) -> (i32, i32, i32) {
    %c0_i32 = arith.constant 0 : i32
    %c0_i32_0 = arith.constant 0 : i32
    %c0_i32_1 = arith.constant 0 : i32
    return %arg0, %c0_i32, %c0_i32_0 : i32, i32, i32
  }
  func.func @transform_1(%arg0: i32) -> (i32, i32) {
    %c0_i32 = arith.constant 0 : i32
    %c0_i32_0 = arith.constant 0 : i32
    %c0_i32_1 = arith.constant 0 : i32
    return %c0_i32, %c0_i32_0 : i32, i32
  }
  func.func @transform_2(%arg0: i32) -> (i32, i32) {
    %c0_i32 = arith.constant 0 : i32
    %c0_i32_0 = arith.constant 0 : i32
    %c0_i32_1 = arith.constant 0 : i32
    return %c0_i32, %c0_i32_0 : i32, i32
  }
  func.func @transform_3(%arg0: i32) -> (i32, i32) {
    %c0_i32 = arith.constant 0 : i32
    %c0_i32_0 = arith.constant 0 : i32
    %c0_i32_1 = arith.constant 0 : i32
    return %c0_i32, %c0_i32_0 : i32, i32
  }
  func.func @transform_4(%arg0: i32) -> (i32, i32) {
    %c0_i32 = arith.constant 0 : i32
    %c0_i32_0 = arith.constant 0 : i32
    %c0_i32_1 = arith.constant 0 : i32
    return %c0_i32, %c0_i32_0 : i32, i32
  }
  func.func @transform_5(%arg0: i32) -> (i32, i32) {
    %c0_i32 = arith.constant 0 : i32
    %c0_i32_0 = arith.constant 0 : i32
    %c0_i32_1 = arith.constant 0 : i32
    return %c0_i32, %c0_i32_0 : i32, i32
  }
  func.func @transform_6(%arg0: i32) -> (i32, i32) {
    %c0_i32 = arith.constant 0 : i32
    %c0_i32_0 = arith.constant 0 : i32
    %c0_i32_1 = arith.constant 0 : i32
    return %c0_i32, %c0_i32_0 : i32, i32
  }
  func.func @transform_7(%arg0: i32) -> (i32, i32) {
    %c0_i32 = arith.constant 0 : i32
    %c0_i32_0 = arith.constant 0 : i32
    %c0_i32_1 = arith.constant 0 : i32
    return %c0_i32, %c0_i32_0 : i32, i32
  }
  func.func @transform_8(%arg0: i32) -> (i32, i32) {
    %c0_i32 = arith.constant 0 : i32
    %c0_i32_0 = arith.constant 0 : i32
    %c0_i32_1 = arith.constant 0 : i32
    return %c0_i32, %c0_i32_0 : i32, i32
  }
  func.func @transform_9(%arg0: i32) -> (i32, i32) {
    %c0_i32 = arith.constant 0 : i32
    %c0_i32_0 = arith.constant 0 : i32
    %c0_i32_1 = arith.constant 0 : i32
    return %c0_i32, %c0_i32_0 : i32, i32
  }
  func.func @transform_10(%arg0: i32) -> (i32, i32) {
    %c0_i32 = arith.constant 0 : i32
    %c0_i32_0 = arith.constant 0 : i32
    %c0_i32_1 = arith.constant 0 : i32
    return %c0_i32, %c0_i32_0 : i32, i32
  }
  func.func @transform_11(%arg0: i32) -> (i32, i32) {
    %c0_i32 = arith.constant 0 : i32
    %c0_i32_0 = arith.constant 0 : i32
    %c0_i32_1 = arith.constant 0 : i32
    return %c0_i32, %c0_i32_0 : i32, i32
  }
  func.func @transform_12(%arg0: i32) -> (i32, i32) {
    %c0_i32 = arith.constant 0 : i32
    %c0_i32_0 = arith.constant 0 : i32
    %c0_i32_1 = arith.constant 0 : i32
    return %c0_i32, %c0_i32_0 : i32, i32
  }
  func.func @transform_13(%arg0: i32) -> (i32, i32) {
    %c0_i32 = arith.constant 0 : i32
    %c0_i32_0 = arith.constant 0 : i32
    %c0_i32_1 = arith.constant 0 : i32
    return %c0_i32, %c0_i32_0 : i32, i32
  }
  func.func @transform_14(%arg0: i32) -> (i32, i32) {
    %c0_i32 = arith.constant 0 : i32
    %c0_i32_0 = arith.constant 0 : i32
    %c0_i32_1 = arith.constant 0 : i32
    return %c0_i32, %c0_i32_0 : i32, i32
  }
  func.func @transform_15(%arg0: i32) -> (i32, i32) {
    %c0_i32 = arith.constant 0 : i32
    %c0_i32_0 = arith.constant 0 : i32
    %c0_i32_1 = arith.constant 0 : i32
    return %c0_i32, %c0_i32_0 : i32, i32
  }
  func.func @transform_16(%arg0: i32) -> (i32, i32) {
    %c0_i32 = arith.constant 0 : i32
    %c0_i32_0 = arith.constant 0 : i32
    %c0_i32_1 = arith.constant 0 : i32
    return %c0_i32, %c0_i32_0 : i32, i32
  }
  func.func @transform_17(%arg0: i32) -> (i32, i32) {
    %c0_i32 = arith.constant 0 : i32
    %c0_i32_0 = arith.constant 0 : i32
    %c0_i32_1 = arith.constant 0 : i32
    return %c0_i32, %c0_i32_0 : i32, i32
  }
  func.func @transform_18(%arg0: i32) -> (i32, i32) {
    %c0_i32 = arith.constant 0 : i32
    %c0_i32_0 = arith.constant 0 : i32
    %c0_i32_1 = arith.constant 0 : i32
    return %c0_i32, %c0_i32_0 : i32, i32
  }
  func.func @transform_19(%arg0: i32) -> (i32, i32) {
    %c0_i32 = arith.constant 0 : i32
    %c0_i32_0 = arith.constant 0 : i32
    %c0_i32_1 = arith.constant 0 : i32
    return %c0_i32, %c0_i32_0 : i32, i32
  }
  func.func @transform_20(%arg0: i32) -> (i32, i32) {
    %c0_i32 = arith.constant 0 : i32
    %c0_i32_0 = arith.constant 0 : i32
    %c0_i32_1 = arith.constant 0 : i32
    return %c0_i32, %c0_i32_0 : i32, i32
  }
  func.func @transform_21(%arg0: i32) -> (i32, i32) {
    %c0_i32 = arith.constant 0 : i32
    %c0_i32_0 = arith.constant 0 : i32
    %c0_i32_1 = arith.constant 0 : i32
    return %c0_i32, %c0_i32_0 : i32, i32
  }
  func.func @transform_22(%arg0: i32) -> (i32, i32) {
    %c0_i32 = arith.constant 0 : i32
    %c0_i32_0 = arith.constant 0 : i32
    %c0_i32_1 = arith.constant 0 : i32
    return %c0_i32, %c0_i32_0 : i32, i32
  }
  func.func @transform_23(%arg0: i32) -> (i32, i32) {
    %c0_i32 = arith.constant 0 : i32
    %c0_i32_0 = arith.constant 0 : i32
    %c0_i32_1 = arith.constant 0 : i32
    return %c0_i32, %c0_i32_0 : i32, i32
  }
  func.func @transform_24(%arg0: i32) -> (i32, i32) {
    %c0_i32 = arith.constant 0 : i32
    %c0_i32_0 = arith.constant 0 : i32
    %c0_i32_1 = arith.constant 0 : i32
    return %c0_i32, %c0_i32_0 : i32, i32
  }
  func.func @transform_25(%arg0: i32) -> (i32, i32) {
    %c0_i32 = arith.constant 0 : i32
    %c0_i32_0 = arith.constant 0 : i32
    %c0_i32_1 = arith.constant 0 : i32
    return %c0_i32, %c0_i32_0 : i32, i32
  }
  func.func @transform_26(%arg0: i32) -> (i32, i32) {
    %c0_i32 = arith.constant 0 : i32
    %c0_i32_0 = arith.constant 0 : i32
    %c0_i32_1 = arith.constant 0 : i32
    return %c0_i32, %c0_i32_0 : i32, i32
  }
  func.func @transform_27(%arg0: i32) -> (i32, i32) {
    %c0_i32 = arith.constant 0 : i32
    %c0_i32_0 = arith.constant 0 : i32
    %c0_i32_1 = arith.constant 0 : i32
    return %c0_i32, %c0_i32_0 : i32, i32
  }
  func.func @transform_28(%arg0: i32) -> (i32, i32) {
    %c0_i32 = arith.constant 0 : i32
    %c0_i32_0 = arith.constant 0 : i32
    %c0_i32_1 = arith.constant 0 : i32
    return %c0_i32, %c0_i32_0 : i32, i32
  }
  func.func @transform_29(%arg0: i32) -> (i32, i32) {
    %c0_i32 = arith.constant 0 : i32
    %c0_i32_0 = arith.constant 0 : i32
    %c0_i32_1 = arith.constant 0 : i32
    return %c0_i32, %c0_i32_0 : i32, i32
  }
  func.func @transform_30(%arg0: i32) -> (i32, i32) {
    %c0_i32 = arith.constant 0 : i32
    %c0_i32_0 = arith.constant 0 : i32
    %c0_i32_1 = arith.constant 0 : i32
    return %c0_i32, %c0_i32_0 : i32, i32
  }
  func.func @transform_31(%arg0: i32) -> (i32, i32) {
    %c0_i32 = arith.constant 0 : i32
    %c0_i32_0 = arith.constant 0 : i32
    %c0_i32_1 = arith.constant 0 : i32
    return %c0_i32, %c0_i32_0 : i32, i32
  }
  func.func @transform_32(%arg0: i32) -> (i32, i32, i32) {
    %c0_i32 = arith.constant 0 : i32
    %c0_i32_0 = arith.constant 0 : i32
    %c0_i32_1 = arith.constant 0 : i32
    return %arg0, %c0_i32, %c0_i32_0 : i32, i32, i32
  }
}

</mosaic_0001>

<bundles_post_ra>
// kernel: vit_forward.1
= control target key start
LH: loop header
LB: loop body
LE: loop exit
PB: predicated region body
PF: predicated region fallthrough
CT: control target
= control target key end

     0   :  { %s6988_s6 = smov 1   ;;  %s6989_s10 = smov 2   ;;  %s8000_s0 = inlined_call_operand.smem [shape: u32[33], index: -1, kind: input, shape index: {}] }
   0x1   :  { %s7049_s5 = sld [smem:[%s8000_s0]]   ;;  %s6990_s14 = smov 3  }
   0x2   :  { %s7054_s9 = sld [smem:[%s8000_s0 + %s6988_s6]]   ;;  %s6991_s18 = smov 4  }
   0x3   :  { %s7059_s13 = sld [smem:[%s8000_s0 + %s6989_s10]]   ;;  %s6992_s22 = smov 5  }
   0x4   :  { %s7064_s17 = sld [smem:[%s8000_s0 + %s6990_s14]]   ;;  %s6993_s26 = smov 6  }
   0x5   :  { %s7069_s21 = sld [smem:[%s8000_s0 + %s6991_s18]]   ;;  %s6994_s30 = smov 7  }
   0x6   :  { %s7074_s25 = sld [smem:[%s8000_s0 + %s6992_s22]]   ;;  %s6995_s4 = smov 8  }
   0x7   :  { %8015 = sst [smem:[#allocation33_spill]] %s7049_s5  ;;  %s6996_s10 = smov 9  }
   0x8   :  { %8016 = sst [smem:[#allocation34_spill]] %s7054_s9  ;;  %s6997_s15 = smov 10  }
   0x9   :  { %8017 = sst [smem:[#allocation35_spill]] %s7059_s13  ;;  %s6998_s20 = smov 11  }
   0xa   :  { %8018 = sst [smem:[#allocation36_spill]] %s7064_s17  ;;  %s7000_s1 = smov 13  }
   0xb   :  { %s7079_s29 = sld [smem:[%s8000_s0 + %s6993_s26]]   ;;  %s6999_s26 = smov 12  }
   0xc   :  { %s7084_s3 = sld [smem:[%s8000_s0 + %s6994_s30]]   ;;  %s7001_s7 = smov 14  }
   0xd   :  { %s7089_s8 = sld [smem:[%s8000_s0 + %s6995_s4]]   ;;  %s7003_s22 = smov 16  }
   0xe   :  { %s7094_s14 = sld [smem:[%s8000_s0 + %s6996_s10]]   ;;  %s7004_s28 = smov 17  }
   0xf   :  { %s7099_s19 = sld [smem:[%s8000_s0 + %s6997_s15]]   ;;  %s7002_s15 = smov 15  }
  0x10   :  { %s7104_s24 = sld [smem:[%s8000_s0 + %s6998_s20]]  }
  0x11   :  { %8019 = sst [smem:[#allocation37_spill]] %s7079_s29 }
  0x12   :  { %s7109_s30 = sld [smem:[%s8000_s0 + %s6999_s26]]  }
  0x13   :  { %8020 = sst [smem:[#allocation38_spill]] %s7089_s8 }
  0x14   :  { %s7114_s6 = sld [smem:[%s8000_s0 + %s7000_s1]]  }
  0x15   :  { %s7119_s12 = sld [smem:[%s8000_s0 + %s7001_s7]]   ;;  %s7005_s7 = smov 18  }
  0x16   :  { %s7124_s20 = sld [smem:[%s8000_s0 + %s7002_s15]]   ;;  %s7006_s15 = smov 19  }
  0x17   :  { %s7129_s27 = sld [smem:[%s8000_s0 + %s7003_s22]]   ;;  %s7007_s22 = smov 20  }
  0x18   :  { %8021 = sst [smem:[#allocation39_spill]] %s7109_s30 }
  0x19   :  { %s7134_s4 = sld [smem:[%s8000_s0 + %s7004_s28]]   ;;  %s7008_s28 = smov 21  }
  0x1a   :  { %s7144_s30 = sld [smem:[%s8000_s0 + %s7006_s15]]   ;;  %s7010_s15 = smov 23  }
  0x1b   :  { %8022 = sst [smem:[#allocation40_spill]] %s7119_s12 }
  0x1c   :  { %s7139_s12 = sld [smem:[%s8000_s0 + %s7005_s7]]   ;;  %s7009_s7 = smov 22  }
  0x1d   :  { %s7149_s8 = sld [smem:[%s8000_s0 + %s7007_s22]]   ;;  %s7011_s22 = smov 24  }
  0x1e   :  { %s7154_s29 = sld [smem:[%s8000_s0 + %s7008_s28]]   ;;  %s7012_s28 = smov 25  }
  0x1f   :  { %s7164_s17 = sld [smem:[%s8000_s0 + %s7010_s15]]   ;;  %s7014_s15 = smov 27  }
  0x20   :  { %s7174_s13 = sld [smem:[%s8000_s0 + %s7012_s28]]   ;;  %s7016_s28 = smov 29  }
  0x21   :  { %s7184_s9 = sld [smem:[%s8000_s0 + %s7014_s15]]   ;;  %s7018_s15 = smov 31  }
  0x22   :  { %8023 = sst [smem:[#allocation41_spill]] %s7139_s12 }
  0x23   :  { %8024 = sst [smem:[#allocation42_spill]] %s7149_s8 }
  0x24   :  { %s7159_s12 = sld [smem:[%s8000_s0 + %s7009_s7]]   ;;  %s7013_s7 = smov 26  }
  0x25   :  { %s7169_s8 = sld [smem:[%s8000_s0 + %s7011_s22]]   ;;  %s7015_s22 = smov 28  }
  0x26   :  { %8026 = sst [smem:[#allocation44_spill]] %s7174_s13 }
  0x27   :  { %s7179_s5 = sld [smem:[%s8000_s0 + %s7013_s7]]   ;;  %s7017_s7 = smov 30  }
  0x28   :  { %8028 = sst [smem:[#allocation46_spill]] %s7184_s9 }
  0x29   :  { %s7194_s13 = sld [smem:[%s8000_s0 + %s7016_s28]]  }
  0x2a   :  { %s7204_s9 = sld [smem:[%s8000_s0 + %s7018_s15]]  }
  0x2b   :  { %8025 = sst [smem:[#allocation43_spill]] %s7169_s8 }
  0x2c   :  { %s7189_s8 = sld [smem:[%s8000_s0 + %s7015_s22]]   ;;  %s7019_s22 = smov 32  }
  0x2d   :  { %8027 = sst [smem:[#allocation45_spill]] %s7179_s5 }
  0x2e   :  { %s7199_s5 = sld [smem:[%s8000_s0 + %s7017_s7]]  }
  0x32   :  { %8029 = sst [smem:[#allocation47_spill]] %s7189_s8 }
  0x33   :  { %s7209_s8 = sld [smem:[%s8000_s0 + %s7019_s22]]  }
  0x34   :  { %70 = vsyncpa [#allocation3], 0 }
  0x35   :  { %71 = vsyncpa [#allocation5], 0 }
  0x36   :  { %72 = vsyncpa [#allocation8], 0 }
  0x37   :  { %73 = vsyncpa [#allocation11], 0 }
  0x38   :  { %74 = vsyncpa [#allocation14], 0 }
  0x39   :  { %75 = vsyncpa [#allocation17], 0 }
  0x3a   :  { %76 = vsyncpa [#allocation20], 0 }
  0x3b   :  { %77 = vsyncpa [#allocation23], 0  ;;  %s7211_s28 = smov 0  }
  0x3c LB: > { %s7020_s0 = smov [#allocation4]   ;;  %s7217_s2 = sadd.s32 4294967295, %s6986_s28   ;;  %s6986_s28 = sphi %s7211_s28, %s83_s28  }
  0x3d   : > { %s824_s1 = sshll.u32 %s7020_s0, 4  ;;  %p5232_p0 = scmp.ge.s32.totalorder %s6986_s28, 1  ;;  %s7222_s1 = int_to_ptr.vmem [resolvable:$true] %s824_s1 }
  0x3e   : > { %p791_p1 = scmp.lt.s32.totalorder %s6986_s28, 3  ;;  %p8011_p2 = scmp.eq.s32.totalorder %s7217_s2, 0 }
  0x3f   : > { %s7021_s10 = smov [#allocation7]   ;;  %s7022_s15 = smov [#allocation10]  }
  0x40   : > { %p7224_p3 = pnand %p5232_p0, %p791_p1  ;;  %s852_s11 = sshll.u32 %s7021_s10, 4  ;;  %s7230_s11 = int_to_ptr.vmem [resolvable:$true] %s852_s11 }
  0x41   : > { %s874_s16 = sshll.u32 %s7022_s15, 4  ;;  %s7023_s22 = smov [#allocation13]   ;;  %s7238_s16 = int_to_ptr.vmem [resolvable:$true] %s874_s16 }
  0x42   : > { %s8030_s7 = scalar_select %p7224_p3, 1, 0 }
  0x43   : > { %p6037_p4 = pneg %p7224_p3  ;;  %s902_s23 = sshll.u32 %s7023_s22, 4  ;;  %s7240_s23 = int_to_ptr.vmem [resolvable:$true] %s902_s23 }
  0x44   : > { %s6528_s26 = scalar_lea.hbm %s7074_s25, 16 }
  0x45   : > { %p7234_p5 = pnand %p8011_p2, %p6037_p4  ;;  %p6529_p6 = scmp.ne.s32.totalorder %s7074_s25, %s6528_s26 }
  0x46   : > { %p6535_p10 = scmp.lt.u32.totalorder %s6528_s26, %s7074_s25 }
  0x47   : > { %p7246_p7 = pneg %p7234_p5 }
  0x49   : > { %p6531_p8 = pnand %p7246_p7, %p6529_p6 }
  0x4b   : > { %p6532_p9 = pneg %p6531_p8 }
  0x4d   : > { %p6537_p11 = pnand %p6535_p10, %p6532_p9 }
  0x4f   : > { %6540 = shalt.err (!%p6537_p11)
}
  0x50   : > { %s6541_s10 = scalar_lea.vmem %s7222_s1, 16  ;;  %s6548_s15 = scalar_lea.vmem %s7222_s1, 32 }
  0x51   : > { %p6542_p12 = scmp.ne.s32.totalorder %s7222_s1, %s6541_s10  ;;  %p6549_p1 = scmp.lt.s32.totalorder %s7222_s1, %s7222_s1 }
  0x52   : > { %p6550_p4 = scmp.lt.s32.totalorder %s6548_s15, %s6541_s10 }
  0x53   : > { %p6544_p13 = pnand %p6542_p12, %p7246_p7 }
  0x54   : > { %p6551_p2 = por %p6550_p4, %p6549_p1 }
  0x55   : > { %p6545_p0 = pneg %p6544_p13 }
  0x57   : > { %p6552_p6 = pnand %p6551_p2, %p6545_p0 }
  0x59   : > { %6555 = shalt.err (!%p6552_p6)
}
  0x5a   : > { %6043 = dma.hbm_to_vmem [thread:$0]  (!%p7234_p5), %s7074_s25, 16, %s7222_s1, [#allocation5]  }
  0x5b   : > { %s6556_s22 = scalar_lea.hbm %s7094_s14, 16 }
  0x5c   : > { %p6557_p8 = scmp.ne.s32.totalorder %s7094_s14, %s6556_s22  ;;  %p6563_p11 = scmp.lt.u32.totalorder %s6556_s22, %s7094_s14 }
  0x5e   : > { %p6559_p9 = pnand %p6557_p8, %p7246_p7 }
  0x60   : > { %p6560_p10 = pneg %p6559_p9 }
  0x62   : > { %p6565_p12 = pnand %p6563_p11, %p6560_p10 }
  0x64   : > { %6568 = shalt.err (!%p6565_p12)
}
  0x65   : > { %s6569_s26 = scalar_lea.vmem %s7230_s11, 16  ;;  %s6576_s10 = scalar_lea.vmem %s7230_s11, 32 }
  0x66   : > { %p6570_p2 = scmp.ne.s32.totalorder %s7230_s11, %s6569_s26  ;;  %p6577_p1 = scmp.lt.s32.totalorder %s7230_s11, %s7230_s11 }
  0x67   : > { %p6578_p4 = scmp.lt.s32.totalorder %s6576_s10, %s6569_s26 }
  0x68   : > { %p6572_p13 = pnand %p6570_p2, %p7246_p7 }
  0x69   : > { %p6579_p6 = por %p6578_p4, %p6577_p1 }
  0x6a   : > { %p6573_p0 = pneg %p6572_p13 }
  0x6c   : > { %p6580_p8 = pnand %p6579_p6, %p6573_p0 }
  0x6e   : > { %6583 = shalt.err (!%p6580_p8)
}
  0x6f   : > { %6049 = dma.hbm_to_vmem [thread:$0]  (!%p7234_p5), %s7094_s14, 16, %s7230_s11, [#allocation8]  }
  0x70   : > { %s6584_s1 = scalar_lea.hbm %s7104_s24, 16 }
  0x71   : > { %p6585_p9 = scmp.ne.s32.totalorder %s7104_s24, %s6584_s1  ;;  %p6591_p12 = scmp.lt.u32.totalorder %s6584_s1, %s7104_s24 }
  0x73   : > { %p6587_p10 = pnand %p6585_p9, %p7246_p7 }
  0x75   : > { %p6588_p11 = pneg %p6587_p10 }
  0x77   : > { %p6593_p2 = pnand %p6591_p12, %p6588_p11 }
  0x79   : > { %6596 = shalt.err (!%p6593_p2)
}
  0x7a   : > { %s6597_s15 = scalar_lea.vmem %s7238_s16, 16  ;;  %s6604_s22 = scalar_lea.vmem %s7238_s16, 32 }
  0x7b   : > { %p6598_p13 = scmp.ne.s32.totalorder %s7238_s16, %s6597_s15  ;;  %p6605_p4 = scmp.lt.s32.totalorder %s7238_s16, %s7238_s16 }
  0x7c   : > { %p6606_p6 = scmp.lt.s32.totalorder %s6604_s22, %s6597_s15 }
  0x7d   : > { %p6600_p0 = pnand %p6598_p13, %p7246_p7 }
  0x7e   : > { %p6607_p8 = por %p6606_p6, %p6605_p4 }
  0x7f   : > { %p6601_p1 = pneg %p6600_p0 }
  0x81   : > { %p6608_p9 = pnand %p6607_p8, %p6601_p1 }
  0x83   : > { %6611 = shalt.err (!%p6608_p9)
}
  0x84   : > { %6055 = dma.hbm_to_vmem [thread:$0]  (!%p7234_p5), %s7104_s24, 16, %s7238_s16, [#allocation11]  }
  0x85   : > { %s6612_s11 = scalar_lea.hbm %s7124_s20, 16 }
  0x86   : > { %p6613_p10 = scmp.ne.s32.totalorder %s7124_s20, %s6612_s11  ;;  %p6619_p2 = scmp.lt.u32.totalorder %s6612_s11, %s7124_s20 }
  0x88   : > { %p6615_p11 = pnand %p6613_p10, %p7246_p7 }
  0x8a   : > { %p6616_p12 = pneg %p6615_p11 }
  0x8c   : > { %p6621_p13 = pnand %p6619_p2, %p6616_p12 }
  0x8e   : > { %6624 = shalt.err (!%p6621_p13)
}
  0x8f   : > { %s6625_s26 = scalar_lea.vmem %s7240_s23, 16  ;;  %s6632_s10 = scalar_lea.vmem %s7240_s23, 32 }
  0x90   : > { %p6626_p0 = scmp.ne.s32.totalorder %s7240_s23, %s6625_s26  ;;  %p6633_p6 = scmp.lt.s32.totalorder %s7240_s23, %s7240_s23 }
  0x91   : > { %p6634_p8 = scmp.lt.s32.totalorder %s6632_s10, %s6625_s26 }
  0x92   : > { %p6628_p1 = pnand %p6626_p0, %p7246_p7 }
  0x93   : > { %p6635_p9 = por %p6634_p8, %p6633_p6 }
  0x94   : > { %p6629_p4 = pneg %p6628_p1 }
  0x96   : > { %p6636_p10 = pnand %p6635_p9, %p6629_p4 }
  0x98   : > { %6639 = shalt.err (!%p6636_p10)
}
  0x99   : > { %6061 = dma.hbm_to_vmem [thread:$0]  (!%p7234_p5), %s7124_s20, 16, %s7240_s23, [#allocation14]  }
  0x9a   : > { %s7024_s16 = smov [#allocation16]   ;;  %s7025_s15 = smov [#allocation19]  }
  0x9b   : > { %s924_s1 = sshll.u32 %s7024_s16, 4  ;;  %s952_s22 = sshll.u32 %s7025_s15, 4  ;;  %s925_s1 = int_to_ptr.vmem [resolvable:$true] %s924_s1  ;;  %s953_s22 = int_to_ptr.vmem [resolvable:$true] %s952_s22 }
  0x9c   : > { %s6640_s11 = scalar_lea.hbm %s7134_s4, 16 }
  0x9d   : > { %p6641_p11 = scmp.ne.s32.totalorder %s7134_s4, %s6640_s11  ;;  %p6647_p13 = scmp.lt.u32.totalorder %s6640_s11, %s7134_s4 }
  0x9f   : > { %p6643_p12 = pnand %p6641_p11, %p7246_p7 }
  0xa1   : > { %p6644_p2 = pneg %p6643_p12 }
  0xa3   : > { %p6649_p0 = pnand %p6647_p13, %p6644_p2 }
  0xa5   : > { %6652 = shalt.err (!%p6649_p0)
}
  0xa6   : > { %s6653_s26 = scalar_lea.vmem %s925_s1, 16  ;;  %s6660_s23 = scalar_lea.vmem %s925_s1, 32 }
  0xa7   : > { %p6654_p1 = scmp.ne.s32.totalorder %s925_s1, %s6653_s26  ;;  %p6661_p8 = scmp.lt.s32.totalorder %s925_s1, %s925_s1 }
  0xa8   : > { %p6662_p9 = scmp.lt.s32.totalorder %s6660_s23, %s6653_s26 }
  0xa9   : > { %p6656_p4 = pnand %p6654_p1, %p7246_p7 }
  0xaa   : > { %p6663_p10 = por %p6662_p9, %p6661_p8 }
  0xab   : > { %p6657_p6 = pneg %p6656_p4 }
  0xad   : > { %p6664_p3 = pnand %p6663_p10, %p6657_p6 }
  0xaf   : > { %6667 = shalt.err (!%p6664_p3)
}
  0xb0   : > { %6067 = dma.hbm_to_vmem [thread:$0]  (!%p7234_p5), %s7134_s4, 16, %s925_s1, [#allocation17]  }
  0xb1   : > { %s6668_s10 = scalar_lea.hbm %s7154_s29, 16 }
  0xb2   : > { %p6669_p11 = scmp.ne.s32.totalorder %s7154_s29, %s6668_s10  ;;  %p6675_p13 = scmp.lt.u32.totalorder %s6668_s10, %s7154_s29 }
  0xb4   : > { %p6671_p12 = pnand %p6669_p11, %p7246_p7 }
  0xb6   : > { %p6672_p2 = pneg %p6671_p12 }
  0xb8   : > { %p6677_p0 = pnand %p6675_p13, %p6672_p2 }
  0xba   : > { %6680 = shalt.err (!%p6677_p0)
}
  0xbb   : > { %s6681_s16 = scalar_lea.vmem %s953_s22, 16  ;;  %s6688_s15 = scalar_lea.vmem %s953_s22, 32 }
  0xbc   : > { %p6682_p3 = scmp.ne.s32.totalorder %s953_s22, %s6681_s16  ;;  %p6689_p6 = scmp.lt.s32.totalorder %s953_s22, %s953_s22 }
  0xbd   : > { %p6690_p8 = scmp.lt.s32.totalorder %s6688_s15, %s6681_s16 }
  0xbe   : > { %p6684_p1 = pnand %p6682_p3, %p7246_p7 }
  0xbf   : > { %p6691_p9 = por %p6690_p8, %p6689_p6 }
  0xc0   : > { %p6685_p4 = pneg %p6684_p1 }
  0xc2   : > { %p6692_p10 = pnand %p6691_p9, %p6685_p4 }
  0xc4   : > { %6695 = shalt.err (!%p6692_p10)
}
  0xc5   : > { %6073 = dma.hbm_to_vmem [thread:$0]  (!%p7234_p5), %s7154_s29, 16, %s953_s22, [#allocation20]  }
  0xc6   : > { %s7026_s1 = smov [#allocation22]   ;;  %s7027_s26 = smov [#allocation2]  }
  0xc7   : > { %s974_s11 = sshll.u32 %s7026_s1, 4  ;;  %s813_s23 = sshll.u32 %s7027_s26, 4  ;;  %s975_s11 = int_to_ptr.vmem [resolvable:$true] %s974_s11  ;;  %s814_s23 = int_to_ptr.vmem [resolvable:$true] %s813_s23 }
  0xc8   : > { %s6696_s10 = scalar_lea.hbm %s7164_s17, 16 }
  0xc9   : > { %p6697_p11 = scmp.ne.s32.totalorder %s7164_s17, %s6696_s10  ;;  %p6703_p13 = scmp.lt.u32.totalorder %s6696_s10, %s7164_s17 }
  0xcb   : > { %p6699_p12 = pnand %p6697_p11, %p7246_p7 }
  0xcd   : > { %p6700_p2 = pneg %p6699_p12 }
  0xcf   : > { %p6705_p0 = pnand %p6703_p13, %p6700_p2 }
  0xd1   : > { %6708 = shalt.err (!%p6705_p0)
}
  0xd2   : > { %s6709_s16 = scalar_lea.vmem %s975_s11, 16  ;;  %s6716_s22 = scalar_lea.vmem %s975_s11, 32 }
  0xd3   : > { %p6710_p3 = scmp.ne.s32.totalorder %s975_s11, %s6709_s16  ;;  %p6717_p6 = scmp.lt.s32.totalorder %s975_s11, %s975_s11 }
  0xd4   : > { %p6718_p8 = scmp.lt.s32.totalorder %s6716_s22, %s6709_s16 }
  0xd5   : > { %p6712_p1 = pnand %p6710_p3, %p7246_p7 }
  0xd6   : > { %p6719_p9 = por %p6718_p8, %p6717_p6 }
  0xd7   : > { %p6713_p4 = pneg %p6712_p1 }
  0xd9   : > { %p6720_p10 = pnand %p6719_p9, %p6713_p4 }
  0xdb   : > { %6723 = shalt.err (!%p6720_p10)
}
  0xdc   : > { %6079 = dma.hbm_to_vmem [thread:$0]  (!%p7234_p5), %s7164_s17, 16, %s975_s11, [#allocation23]  }
  0xdd   : > { %s6724_s15 = scalar_lea.hbm %s7069_s21, 16 }
  0xde   : > { %p6725_p11 = scmp.ne.s32.totalorder %s7069_s21, %s6724_s15  ;;  %p6731_p13 = scmp.lt.u32.totalorder %s6724_s15, %s7069_s21 }
  0xe0   : > { %p6727_p12 = pnand %p6725_p11, %p7246_p7 }
  0xe2   : > { %p6728_p2 = pneg %p6727_p12 }
  0xe4   : > { %p6733_p0 = pnand %p6731_p13, %p6728_p2 }
  0xe6   : > { %6736 = shalt.err (!%p6733_p0)
}
  0xe7   : > { %s6737_s1 = scalar_lea.vmem %s814_s23, 16  ;;  %s6744_s26 = scalar_lea.vmem %s814_s23, 32 }
  0xe8   : > { %p6738_p3 = scmp.ne.s32.totalorder %s814_s23, %s6737_s1  ;;  %p6745_p6 = scmp.lt.s32.totalorder %s814_s23, %s814_s23 }
  0xe9   : > { %p6746_p8 = scmp.lt.s32.totalorder %s6744_s26, %s6737_s1 }
  0xea   : > { %p6740_p1 = pnand %p6738_p3, %p7246_p7 }
  0xeb   : > { %p6747_p9 = por %p6746_p8, %p6745_p6 }
  0xec   : > { %p6741_p4 = pneg %p6740_p1 }
  0xee   : > { %p6748_p10 = pnand %p6747_p9, %p6741_p4 }
  0xf0   : > { %6751 = shalt.err (!%p6748_p10)
}
  0xf1   : > { %6040 = dma.hbm_to_vmem [thread:$0]  (!%p7234_p5), %s7069_s21, 16, %s814_s23, [#allocation3]  }
  0xf2   : > { %s7028_s11 = smov [#allocation6]   ;;  %s7029_s16 = smov [#allocation9]  }
  0xf3   : > { %s838_s10 = sshll.u32 %s7028_s11, 4  ;;  %s863_s22 = sshll.u32 %s7029_s16, 4  ;;  %s839_s10 = int_to_ptr.vmem [resolvable:$true] %s838_s10  ;;  %s864_s22 = int_to_ptr.vmem [resolvable:$true] %s863_s22 }
  0xf4   : > { %s6752_s15 = scalar_lea.hbm %s7084_s3, 48 }
  0xf5   : > { %p6753_p11 = scmp.ne.s32.totalorder %s7084_s3, %s6752_s15  ;;  %p6759_p13 = scmp.lt.u32.totalorder %s6752_s15, %s7084_s3 }
  0xf7   : > { %p6755_p12 = pnand %p6753_p11, %p7246_p7 }
  0xf9   : > { %p6756_p2 = pneg %p6755_p12 }
  0xfb   : > { %p6761_p0 = pnand %p6759_p13, %p6756_p2 }
  0xfd   : > { %6764 = shalt.err (!%p6761_p0)
}
  0xfe   : > { %s6765_s1 = scalar_lea.vmem %s839_s10, 48  ;;  %s6772_s23 = scalar_lea.vmem %s839_s10, 64 }
  0xff   : > { %p6766_p3 = scmp.ne.s32.totalorder %s839_s10, %s6765_s1  ;;  %p6773_p6 = scmp.lt.s32.totalorder %s839_s10, %s839_s10 }
 0x100   : > { %p6774_p8 = scmp.lt.s32.totalorder %s6772_s23, %s6765_s1 }
 0x101   : > { %p6768_p1 = pnand %p6766_p3, %p7246_p7 }
 0x102   : > { %p6775_p9 = por %p6774_p8, %p6773_p6 }
 0x103   : > { %p6769_p4 = pneg %p6768_p1 }
 0x105   : > { %p6776_p10 = pnand %p6775_p9, %p6769_p4 }
 0x107   : > { %6779 = shalt.err (!%p6776_p10)
}
 0x108   : > { %6046 = dma.hbm_to_vmem [thread:$0]  (!%p7234_p5), %s7084_s3, 48, %s839_s10, [#allocation5]  }
 0x109   : > { %s6780_s26 = scalar_lea.hbm %s7099_s19, 16 }
 0x10a   : > { %p6781_p11 = scmp.ne.s32.totalorder %s7099_s19, %s6780_s26  ;;  %p6787_p13 = scmp.lt.u32.totalorder %s6780_s26, %s7099_s19 }
 0x10c   : > { %p6783_p12 = pnand %p6781_p11, %p7246_p7 }
 0x10e   : > { %p6784_p2 = pneg %p6783_p12 }
 0x110   : > { %p6789_p0 = pnand %p6787_p13, %p6784_p2 }
 0x112   : > { %6792 = shalt.err (!%p6789_p0)
}
 0x113   : > { %s6793_s11 = scalar_lea.vmem %s864_s22, 16  ;;  %s6800_s16 = scalar_lea.vmem %s864_s22, 32 }
 0x114   : > { %p6794_p3 = scmp.ne.s32.totalorder %s864_s22, %s6793_s11  ;;  %p6801_p6 = scmp.lt.s32.totalorder %s864_s22, %s864_s22 }
 0x115   : > { %p6802_p8 = scmp.lt.s32.totalorder %s6800_s16, %s6793_s11 }
 0x116   : > { %p6796_p1 = pnand %p6794_p3, %p7246_p7 }
 0x117   : > { %p6803_p9 = por %p6802_p8, %p6801_p6 }
 0x118   : > { %p6797_p4 = pneg %p6796_p1 }
 0x11a   : > { %p6804_p10 = pnand %p6803_p9, %p6797_p4 }
 0x11c   : > { %6807 = shalt.err (!%p6804_p10)
}
 0x11d   : > { %6052 = dma.hbm_to_vmem [thread:$0]  (!%p7234_p5), %s7099_s19, 16, %s864_s22, [#allocation8]  }
 0x11e   : > { %s7030_s10 = smov [#allocation12]   ;;  %s7031_s1 = smov [#allocation15]  }
 0x11f   : > { %s888_s15 = sshll.u32 %s7030_s10, 4  ;;  %s913_s23 = sshll.u32 %s7031_s1, 4  ;;  %s889_s15 = int_to_ptr.vmem [resolvable:$true] %s888_s15  ;;  %s914_s23 = int_to_ptr.vmem [resolvable:$true] %s913_s23 }
 0x120   : > { %s6808_s26 = scalar_lea.hbm %s7114_s6, 64 }
 0x121   : > { %p6809_p11 = scmp.ne.s32.totalorder %s7114_s6, %s6808_s26  ;;  %p6815_p13 = scmp.lt.u32.totalorder %s6808_s26, %s7114_s6 }
 0x123   : > { %p6811_p12 = pnand %p6809_p11, %p7246_p7 }
 0x125   : > { %p6812_p2 = pneg %p6811_p12 }
 0x127   : > { %p6817_p0 = pnand %p6815_p13, %p6812_p2 }
 0x129   : > { %6820 = shalt.err (!%p6817_p0)
}
 0x12a   : > { %s6821_s11 = scalar_lea.vmem %s889_s15, 64  ;;  %p6829_p6 = scmp.lt.s32.totalorder %s889_s15, %s889_s15 }
 0x12b   : > { %p6822_p3 = scmp.ne.s32.totalorder %s889_s15, %s6821_s11  ;;  %p6830_p8 = scmp.lt.s32.totalorder %s6821_s11, %s6821_s11 }
 0x12d   : > { %p6824_p1 = pnand %p6822_p3, %p7246_p7  ;;  %p6831_p9 = por %p6830_p8, %p6829_p6 }
 0x12f   : > { %p6825_p4 = pneg %p6824_p1 }
 0x131   : > { %p6832_p10 = pnand %p6831_p9, %p6825_p4 }
 0x133   : > { %6835 = shalt.err (!%p6832_p10)
}
 0x134   : > { %6058 = dma.hbm_to_vmem [thread:$0]  (!%p7234_p5), %s7114_s6, 64, %s889_s15, [#allocation11]  }
 0x135   : > { %s6836_s22 = scalar_lea.hbm %s7129_s27, 16 }
 0x136   : > { %p6837_p11 = scmp.ne.s32.totalorder %s7129_s27, %s6836_s22  ;;  %p6843_p13 = scmp.lt.u32.totalorder %s6836_s22, %s7129_s27 }
 0x138   : > { %p6839_p12 = pnand %p6837_p11, %p7246_p7 }
 0x13a   : > { %p6840_p2 = pneg %p6839_p12 }
 0x13c   : > { %p6845_p0 = pnand %p6843_p13, %p6840_p2 }
 0x13e   : > { %6848 = shalt.err (!%p6845_p0)
}
 0x13f   : > { %s6849_s16 = scalar_lea.vmem %s914_s23, 16  ;;  %s6856_s10 = scalar_lea.vmem %s914_s23, 32 }
 0x140   : > { %p6850_p3 = scmp.ne.s32.totalorder %s914_s23, %s6849_s16  ;;  %p6857_p6 = scmp.lt.s32.totalorder %s914_s23, %s914_s23 }
 0x141   : > { %p6858_p8 = scmp.lt.s32.totalorder %s6856_s10, %s6849_s16 }
 0x142   : > { %p6852_p1 = pnand %p6850_p3, %p7246_p7 }
 0x143   : > { %p6859_p9 = por %p6858_p8, %p6857_p6 }
 0x144   : > { %p6853_p4 = pneg %p6852_p1 }
 0x146   : > { %p6860_p10 = pnand %p6859_p9, %p6853_p4 }
 0x148   : > { %6863 = shalt.err (!%p6860_p10)
}
 0x149   : > { %6064 = dma.hbm_to_vmem [thread:$0]  (!%p7234_p5), %s7129_s27, 16, %s914_s23, [#allocation14]  }
 0x14a   : > { %s7032_s15 = smov [#allocation18]   ;;  %s7033_s26 = smov [#allocation21]  }
 0x14b   : > { %s938_s1 = sshll.u32 %s7032_s15, 4  ;;  %s963_s11 = sshll.u32 %s7033_s26, 4  ;;  %s939_s1 = int_to_ptr.vmem [resolvable:$true] %s938_s1  ;;  %s964_s11 = int_to_ptr.vmem [resolvable:$true] %s963_s11 }
 0x14c   : > { %s6864_s22 = scalar_lea.hbm %s7144_s30, 48 }
 0x14d   : > { %p6865_p11 = scmp.ne.s32.totalorder %s7144_s30, %s6864_s22  ;;  %p6871_p13 = scmp.lt.u32.totalorder %s6864_s22, %s7144_s30 }
 0x14f   : > { %p6867_p12 = pnand %p6865_p11, %p7246_p7 }
 0x151   : > { %p6868_p2 = pneg %p6867_p12 }
 0x153   : > { %p6873_p0 = pnand %p6871_p13, %p6868_p2 }
 0x155   : > { %6876 = shalt.err (!%p6873_p0)
}
 0x156   : > { %s6877_s16 = scalar_lea.vmem %s939_s1, 48  ;;  %s6884_s23 = scalar_lea.vmem %s939_s1, 64 }
 0x157   : > { %p6878_p3 = scmp.ne.s32.totalorder %s939_s1, %s6877_s16  ;;  %p6885_p6 = scmp.lt.s32.totalorder %s939_s1, %s939_s1 }
 0x158   : > { %p6886_p8 = scmp.lt.s32.totalorder %s6884_s23, %s6877_s16 }
 0x159   : > { %p6880_p1 = pnand %p6878_p3, %p7246_p7 }
 0x15a   : > { %p6887_p9 = por %p6886_p8, %p6885_p6 }
 0x15b   : > { %p6881_p4 = pneg %p6880_p1 }
 0x15d   : > { %p6888_p10 = pnand %p6887_p9, %p6881_p4 }
 0x15f   : > { %6891 = shalt.err (!%p6888_p10)
}
 0x160   : > { %6070 = dma.hbm_to_vmem [thread:$0]  (!%p7234_p5), %s7144_s30, 48, %s939_s1, [#allocation17]  }
 0x161   : > { %s6892_s10 = scalar_lea.hbm %s7159_s12, 16 }
 0x162   : > { %p6893_p11 = scmp.ne.s32.totalorder %s7159_s12, %s6892_s10  ;;  %p6899_p13 = scmp.lt.u32.totalorder %s6892_s10, %s7159_s12 }
 0x164   : > { %p6895_p12 = pnand %p6893_p11, %p7246_p7 }
 0x166   : > { %p6896_p2 = pneg %p6895_p12 }
 0x168   : > { %p6901_p0 = pnand %p6899_p13, %p6896_p2 }
 0x16a   : > { %6904 = shalt.err (!%p6901_p0)
}
 0x16b   : > { %s6905_s15 = scalar_lea.vmem %s964_s11, 16  ;;  %s6912_s26 = scalar_lea.vmem %s964_s11, 32 }
 0x16c   : > { %p6906_p3 = scmp.ne.s32.totalorder %s964_s11, %s6905_s15  ;;  %p6913_p6 = scmp.lt.s32.totalorder %s964_s11, %s964_s11 }
 0x16d   : > { %p6914_p8 = scmp.lt.s32.totalorder %s6912_s26, %s6905_s15 }
 0x16e   : > { %p6908_p1 = pnand %p6906_p3, %p7246_p7 }
 0x16f   : > { %p6915_p9 = por %p6914_p8, %p6913_p6 }
 0x170   : > { %p6909_p4 = pneg %p6908_p1 }
 0x172   : > { %p6916_p10 = pnand %p6915_p9, %p6909_p4 }
 0x174   : > { %6919 = shalt.err (!%p6916_p10)
}
 0x175   : > { %s8033_s1 = sld [smem:[#allocation46_spill]]  ;;  %s7034_s22 = smov [#allocation24]  }
 0x176   : > { %6076 = dma.hbm_to_vmem [thread:$0]  (!%p7234_p5), %s7159_s12, 16, %s964_s11, [#allocation20]  }
 0x177   : > { %s994_s16 = sshll.u32 %s7034_s22, 4  ;;  %s995_s16 = int_to_ptr.vmem [resolvable:$true] %s994_s16 }
 0x17b   : > { %s6920_s23 = scalar_lea.hbm %s8033_s1, 16 }
 0x17c   : > { %p6921_p11 = scmp.ne.s32.totalorder %s8033_s1, %s6920_s23  ;;  %p6927_p13 = scmp.lt.u32.totalorder %s6920_s23, %s8033_s1 }
 0x17e   : > { %p6923_p12 = pnand %p6921_p11, %p7246_p7 }
 0x180   : > { %p6924_p2 = pneg %p6923_p12 }
 0x182   : > { %p6929_p0 = pnand %p6927_p13, %p6924_p2 }
 0x184   : > { %6932 = shalt.err (!%p6929_p0)
}
 0x185   : > { %s6933_s10 = scalar_lea.vmem %s995_s16, 16  ;;  %s6940_s15 = scalar_lea.vmem %s995_s16, 32 }
 0x186   : > { %p6934_p3 = scmp.ne.s32.totalorder %s995_s16, %s6933_s10  ;;  %p6941_p6 = scmp.lt.s32.totalorder %s995_s16, %s995_s16 }
 0x187   : > { %p6942_p8 = scmp.lt.s32.totalorder %s6940_s15, %s6933_s10 }
 0x188   : > { %p6936_p1 = pnand %p6934_p3, %p7246_p7 }
 0x189   : > { %p6943_p9 = por %p6942_p8, %p6941_p6 }
 0x18a   : > { %p6937_p4 = pneg %p6936_p1 }
 0x18c   : > { %p6944_p10 = pnand %p6943_p9, %p6937_p4 }
 0x18e   : > { %6947 = shalt.err (!%p6944_p10)
}
 0x18f   : > { %6082 = dma.hbm_to_vmem [thread:$0]  (!%p7234_p5), %s8033_s1, 16, %s995_s16, [#allocation23]  }
 0x190   : > { %p8034_p11 = scmp.ne.s32.totalorder %s8030_s7, 0 }
 0x191   : > { %p8035_p12 = scmp.eq.s32.totalorder (!%p8034_p11), %s7217_s2, 0 }
 0x192   : > { %1027 = sbr.rel (%p8034_p11) target bundleno = 7153 (0x1bf1), region = 148 }
 0x199   : > { %6953 = dma.done.wait (%p8035_p12), [#allocation3], 16   ;;  %p8036_p2 = pmov %p8035_p12 }
 0x19b   : > { %6955 = vsyncadd (%p8036_p2), [#allocation3], 4294967280  ;;  %p8037_p7 = pmov %p8036_p2 }
 0x19c   : > { %p8038_p13 = pmov %p8036_p2 }
 0x19d   : > { %6957 = dma.done.wait (%p8037_p7), [#allocation5], 64  }
 0x19e   : > { %6959 = vsyncadd (%p8038_p13), [#allocation5], 4294967232  ;;  %p8039_p0 = pmov %p8036_p2 }
 0x1a0   : > { %6961 = dma.done.wait (%p8039_p0), [#allocation8], 32   ;;  %p8040_p5 = pmov %p8039_p0 }
 0x1a1   : > { %p8041_p3 = pmov %p8039_p0 }
 0x1a2   : > { %6963 = vsyncadd (%p8040_p5), [#allocation8], 4294967264 }
 0x1a3   : > { %6965 = dma.done.wait (%p8041_p3), [#allocation11], 80   ;;  %p8042_p1 = pmov %p8039_p0 }
 0x1a4   : > { %p8043_p4 = pmov %p8039_p0 }
 0x1a5   : > { %6967 = vsyncadd (%p8042_p1), [#allocation11], 4294967216 }
 0x1a6   : > { %6969 = dma.done.wait (%p8043_p4), [#allocation14], 32   ;;  %p8044_p6 = pmov %p8039_p0 }
 0x1a7   : > { %p8045_p8 = pmov %p8039_p0 }
 0x1a8   : > { %6971 = vsyncadd (%p8044_p6), [#allocation14], 4294967264 }
 0x1a9   : > { %6973 = dma.done.wait (%p8045_p8), [#allocation17], 64   ;;  %p8046_p9 = pmov %p8039_p0 }
 0x1aa   : > { %p8047_p10 = pmov %p8039_p0 }
 0x1ab   : > { %6975 = vsyncadd (%p8046_p9), [#allocation17], 4294967232 }
 0x1ac   : > { %6977 = dma.done.wait (%p8047_p10), [#allocation20], 32   ;;  %p8048_p11 = pmov %p8039_p0 }
 0x1ad   : > { %p8049_p12 = pmov %p8039_p0 }
 0x1ae   : > { %6979 = vsyncadd (%p8048_p11), [#allocation20], 4294967264 }
 0x1af   : > { %6981 = dma.done.wait (%p8049_p12), [#allocation23], 32   ;;  %p8050_p2 = pmov %p8039_p0 }
 0x1b0   : > { %s8051_s7 = sld [smem:[#allocation34_spill]]  ;;  %p1164_p7 = scmp.lt.s32.totalorder %s7217_s2, 1  ;;  %vm7037_vm3 = vmmov 0   ;;  %vm1998_vm4 = vcmask 261120   ;;  %vm2065_vm5 = vcmask 1043456   ;;  %vm2048_vm7 = vcmask 64512  }
 0x1b1   : > { %6983 = vsyncadd (%p8050_p2), [#allocation23], 4294967264  ;;  %s8052_s18 = sld [smem:[#allocation33_spill]]  ;;  %s8053_s26 = sld [smem:[#allocation35_spill]]  ;;  %vm2461_vm8 = vcmask 523264   ;;  %vm2463_vm9 = vcmask 785408  }
 0x1b2   : > { %s8066_s2 = smov (!%p1164_p7, %s7217_s2), 1  ;;  %s8054_s22 = sld [smem:[#allocation36_spill]] }
 0x1b3   : > { %s5976_s0 = smul.u32 48, %s8066_s2  ;;  %s8055_s16 = sld [smem:[#allocation37_spill]] }
 0x1b4   : > { %s7038_s23 = smov 96   ;;  %s7039_s10 = smov 32  }
 0x1b5   : > { %s7040_s15 = smov 64  }
 0x1b6   : > { %v6174_v0 = vld [vmem:[%s8051_s7 + $0x40] sm:$0xff]   ;;  %v6178_v4 = vld [vmem:[%s8051_s7 + $0x48] sm:$0xff]   ;;  %v6182_v8 = vld [vmem:[%s8051_s7 + $0x50] sm:$0xff]  }
 0x1b7   : > { %v6175_v1 = vld [vmem:[%s8051_s7] sm:$0xff]   ;;  %5549 = vmatprep.subr.bf16.mxu0 %v6174_v0  ;;  %v6179_v5 = vld [vmem:[%s8051_s7 + $0x8] sm:$0xff]   ;;  %v6183_v9 = vld [vmem:[%s8051_s7 + $0x10] sm:$0xff]   ;;  %s7491_s11 = scalar_lea.vmem %s8052_s18, %s5976_s0  ;;  %s8056_s18 = sld [smem:[#allocation38_spill]] }
 0x1b8   : > { %v6176_v2 = vld [vmem:[%s8051_s7 + $0xc0] sm:$0xff]   ;;  %5550 = vmatpush3.bf16.msra.mxu0 %v6175_v1  ;;  %v6180_v6 = vld [vmem:[%s8051_s7 + $0xc8] sm:$0xff]   ;;  %v6184_v10 = vld [vmem:[%s8051_s7 + $0xd0] sm:$0xff]   ;;  %s8057_s0 = sld [smem:[#allocation39_spill]] }
 0x1b9   : > { %v6177_v3 = vld [vmem:[%s8051_s7 + $0x80] sm:$0xff]   ;;  %5571 = vmatprep.subr.bf16.mxu1 %v6176_v2  ;;  %5551 = vmatprep.subr.bf16.mxu0 %v6178_v4  ;;  %v6181_v7 = vld [vmem:[%s8051_s7 + $0x88] sm:$0xff]   ;;  %v6185_v11 = vld [vmem:[%s8051_s7 + $0x90] sm:$0xff]  }
 0x1ba   : > { %5572 = vmatpush3.bf16.msra.mxu1 %v6177_v3  ;;  %v6186_v12 = vld [vmem:[%s8051_s7 + $0x58] sm:$0xff]   ;;  %v6190_v16 = vld [vmem:[%s8051_s7 + $0x60] sm:$0xff]   ;;  %v6194_v20 = vld [vmem:[%s8051_s7 + $0x68] sm:$0xff]  }
 0x1bb   : > { %5573 = vmatprep.subr.bf16.mxu1 %v6180_v6  ;;  %v6187_v13 = vld [vmem:[%s8051_s7 + $0x18] sm:$0xff]   ;;  %v6191_v17 = vld [vmem:[%s8051_s7 + $0x20] sm:$0xff]   ;;  %v6195_v21 = vld [vmem:[%s8051_s7 + $0x28] sm:$0xff]  }
 0x1bc   : > { %5552 = vmatpush3.bf16.msra.mxu0 %v6179_v5  ;;  %v6188_v14 = vld [vmem:[%s8051_s7 + $0xd8] sm:$0xff]   ;;  %v6192_v18 = vld [vmem:[%s8051_s7 + $0xe0] sm:$0xff]   ;;  %v6196_v22 = vld [vmem:[%s8051_s7 + $0xe8] sm:$0xff]  }
 0x1bd   : > { %5553 = vmatprep.subr.bf16.mxu0 %v6182_v8  ;;  %v6189_v15 = vld [vmem:[%s8051_s7 + $0x98] sm:$0xff]   ;;  %v6193_v19 = vld [vmem:[%s8051_s7 + $0xa0] sm:$0xff]   ;;  %v6197_v23 = vld [vmem:[%s8051_s7 + $0xa8] sm:$0xff]  }
 0x1be   : > { %5574 = vmatpush3.bf16.msra.mxu1 %v6181_v7  ;;  %v6198_v24 = vld [vmem:[%s8051_s7 + $0x70] sm:$0xff]   ;;  %v6202_v28 = vld [vmem:[%s8051_s7 + $0x78] sm:$0xff]   ;;  %v1175_v31 = vld [vmem:[%s7491_s11 + $0x8] sm:$0xff] }
 0x1bf   : > { %5575 = vmatprep.subr.bf16.mxu1 %v6184_v10  ;;  %v6199_v25 = vld [vmem:[%s8051_s7 + $0x30] sm:$0xff]   ;;  %v6203_v29 = vld [vmem:[%s8051_s7 + $0x38] sm:$0xff]   ;;  %v1277_v32 = vpack.c.bf16 %v1175_v31, %v1175_v31  ;;  %v1174_v34 = vld [vmem:[%s7491_s11] sm:$0xff] }
 0x1c0   : > { %5554 = vmatpush3.bf16.msra.mxu0 %v6183_v9  ;;  %v6200_v26 = vld [vmem:[%s8051_s7 + $0xf0] sm:$0xff]   ;;  %v6204_v30 = vld [vmem:[%s8051_s7 + $0xf8] sm:$0xff]   ;;  %v1276_v35 = vpack.c.bf16 %v1174_v34, %v1174_v34  ;;  %v6206_v36 = vld [vmem:[%s8051_s7 + $0x140] sm:$0xff]   ;;  %v1697_v9 = vlaneseq }
 0x1c1   : > { %5555 = vmatprep.subr.bf16.mxu0 %v6186_v12  ;;  %v6201_v27 = vld [vmem:[%s8051_s7 + $0xb0] sm:$0xff]   ;;  %v6205_v33 = vld [vmem:[%s8051_s7 + $0xb8] sm:$0xff]   ;;  %1609 = vmatprep.mubr.bf16.mxu0 %v1277_v32  ;;  %v6207_v39 = vld [vmem:[%s8051_s7 + $0x100] sm:$0xff]  }
 0x1c2   : > { %5576 = vmatpush3.bf16.msra.mxu1 %v6185_v11  ;;  %v1177_v37 = vld [vmem:[%s7491_s11 + $0x18] sm:$0xff]  ;;  %v1176_v40 = vld [vmem:[%s7491_s11 + $0x10] sm:$0xff]  ;;  %v6208_v42 = vld [vmem:[%s8051_s7 + $0x148] sm:$0xff]   ;;  %v7520_v10 = vshrl.u32 %v1697_v9, 7 }
 0x1c3   : > { %5577 = vmatprep.subr.bf16.mxu1 %v6188_v14  ;;  %v1279_v38 = vpack.c.bf16 %v1177_v37, %v1177_v37  ;;  %v1278_v41 = vpack.c.bf16 %v1176_v40, %v1176_v40  ;;  %v6209_v43 = vld [vmem:[%s8051_s7 + $0x108] sm:$0xff]   ;;  %v6210_v44 = vld [vmem:[%s8051_s7 + $0x150] sm:$0xff]   ;;  %v6212_v46 = vld [vmem:[%s8051_s7 + $0x158] sm:$0xff]  }
 0x1c4   : > { %5556 = vmatpush3.bf16.msra.mxu0 %v6187_v13  ;;  %v6211_v45 = vld [vmem:[%s8051_s7 + $0x110] sm:$0xff]   ;;  %v6213_v47 = vld [vmem:[%s8051_s7 + $0x118] sm:$0xff]   ;;  %v6214_v48 = vld [vmem:[%s8051_s7 + $0x160] sm:$0xff]   ;;  %vm1699_vm0 = vcmp.ge.s32.totalorder %v7520_v10, 1  ;;  %vm1700_vm1 = vcmp.le.s32.totalorder %v7520_v10, 4 }
 0x1c5   : > { %5557 = vmatprep.subr.bf16.mxu0 %v6190_v16  ;;  %1649 = vmatprep.mubr.bf16.mxu1 %v1279_v38  ;;  %v6215_v49 = vld [vmem:[%s8051_s7 + $0x120] sm:$0xff]   ;;  %v6216_v50 = vld [vmem:[%s8051_s7 + $0x168] sm:$0xff]   ;;  %v6218_v54 = vld [vmem:[%s8051_s7 + $0x170] sm:$0xff]  }
 0x1c6   : > { %5578 = vmatpush3.bf16.msra.mxu1 %v6189_v15  ;;  %v1179_v51 = vld [vmem:[%s7491_s11 + $0x28] sm:$0xff]  ;;  %v6219_v55 = vld [vmem:[%s8051_s7 + $0x130] sm:$0xff]   ;;  %v6220_v56 = vld [vmem:[%s8051_s7 + $0x178] sm:$0xff]  }
 0x1c7   : > { %5579 = vmatprep.subr.bf16.mxu1 %v6192_v18  ;;  %v6217_v52 = vld [vmem:[%s8051_s7 + $0x128] sm:$0xff]   ;;  %v1281_v53 = vpack.c.bf16 %v1179_v51, %v1179_v51  ;;  %v6221_v57 = vld [vmem:[%s8051_s7 + $0x138] sm:$0xff]   ;;  %v1178_v58 = vld [vmem:[%s7491_s11 + $0x20] sm:$0xff]  ;;  %s8058_s11 = sld [smem:[#allocation40_spill]] }
 0x1c8   : > { %5558 = vmatpush3.bf16.msra.mxu0 %v6191_v17  ;;  %v1280_v59 = vpack.c.bf16 %v1178_v58, %v1178_v58  ;;  %v5267_v61 = vld [vmem:[%s8053_s26] ss:$0 sm:$0xff]  ;;  %vm1701_vm2 = vmand %vm1699_vm0, %vm1700_vm1  ;;  %v6236_v34 = vld [vmem:[%s8055_s16 + $0x4c] ss:$12 sps:$4 sm:$0xff]   ;;  %s8059_s26 = sld [smem:[#allocation41_spill]] }
 0x1c9   : > { %5559 = vmatprep.subr.bf16.mxu0 %v6194_v20  ;;  %v1705_v17 = vld [vmem:[%s8054_s22] sm:$0xff]  ;;  %v6244_v40 = vld [vmem:[%s8055_s16 + $0x7c] ss:$12 sps:$4 sm:$0xff]   ;;  %s8060_s22 = sld [smem:[#allocation42_spill]] }
 0x1ca   : > { %5580 = vmatpush3.bf16.msra.mxu1 %v6193_v19  ;;  %v6222_v20 = vld [vmem:[%s8055_s16] ss:$12 sps:$4 sm:$0xff]   ;;  %v6240_v37 = vld [vmem:[%s8055_s16 + $0x64] ss:$12 sps:$4 sm:$0xff]  }
 0x1cb   : > { %5581 = vmatprep.subr.bf16.mxu1 %v6196_v22  ;;  %v7035_v22 = vmov 0.0   ;;  %v6238_v38 = vld [vmem:[%s8055_s16 + $0x60] ss:$12 sps:$4 sm:$0xff]  }
 0x1cc   : > { %5560 = vmatpush3.bf16.msra.mxu0 %v6195_v21  ;;  %v6224_v21 = vld [vmem:[%s8055_s16 + $0x4] ss:$12 sps:$4 sm:$0xff]  }
 0x1cd   : > { %5561 = vmatprep.subr.bf16.mxu0 %v6198_v24  ;;  %v6228_v24 = vld [vmem:[%s8055_s16 + $0x1c] ss:$12 sps:$4 sm:$0xff]  }
 0x1ce   : > { %5582 = vmatpush3.bf16.msra.mxu1 %v6197_v23  ;;  %v6225_v23 = vld [vmem:[%s8055_s16 + $0x8] ss:$12 sps:$4 sm:$0xff]  }
 0x1cf   : > { %5583 = vmatprep.subr.bf16.mxu1 %v6200_v26  ;;  %v6229_v26 = vld [vmem:[%s8055_s16 + $0x20] ss:$12 sps:$4 sm:$0xff]  }
 0x1d0   : > { %5562 = vmatpush3.bf16.msra.mxu0 %v6199_v25  ;;  %v6226_v25 = vld [vmem:[%s8055_s16 + $0x18] ss:$12 sps:$4 sm:$0xff]  }
 0x1d1   : > { %5563 = vmatprep.subr.bf16.mxu0 %v6202_v28  ;;  %v6230_v28 = vld [vmem:[%s8055_s16 + $0x30] ss:$12 sps:$4 sm:$0xff]  }
 0x1d2   : > { %5584 = vmatpush3.bf16.msra.mxu1 %v6201_v27  ;;  %v6232_v27 = vld [vmem:[%s8055_s16 + $0x34] ss:$12 sps:$4 sm:$0xff]  }
 0x1d3   : > { %5585 = vmatprep.subr.bf16.mxu1 %v6204_v30 }
 0x1d4   : > { %5564 = vmatpush3.bf16.msra.mxu0 %v6203_v29 }
 0x1d5   : > { %5593 = vmatprep.subr.bf16.mxu0 %v6206_v36  ;;  %v6237_v36 = vld [vmem:[%s8055_s16 + $0x50] ss:$12 sps:$4 sm:$0xff]  }
 0x1d6   : > { %5586 = vmatpush3.bf16.msra.mxu1 %v6205_v33  ;;  %v6233_v33 = vld [vmem:[%s8055_s16 + $0x38] ss:$12 sps:$4 sm:$0xff]  }
 0x1d7   : > { %1610 = vmatmul.mubr.bf16.vlgmr.msra.gmra.mrb[0].mxu0 %v1276_v35  ;;  %1915 = vmatprep.subr.bf16.mxu1 %v6224_v21  ;;  %v6234_v35 = vld [vmem:[%s8055_s16 + $0x48] ss:$12 sps:$4 sm:$0xff]  }
 0x1d8   : > { %5594 = vmatpush3.bf16.msra.mxu0 %v6207_v39  ;;  %1689 = vmatprep.mubr.bf16.mxu0 %v1281_v53  ;;  %v6241_v39 = vld [vmem:[%s8055_s16 + $0x68] ss:$12 sps:$4 sm:$0xff]  }
 0x1d9   : > { %1650 = vmatmul.mubr.bf16.vlgmr.msra.gmra.mrb[0].mxu1 %v1278_v41  ;;  %5595 = vmatprep.subr.bf16.mxu0 %v6208_v42  ;;  %v6242_v41 = vld [vmem:[%s8055_s16 + $0x78] ss:$12 sps:$4 sm:$0xff]   ;;  %v6245_v42 = vld [vmem:[%s8055_s16 + $0x80] ss:$12 sps:$4 sm:$0xff]  }
 0x1da   : > { %1916 = vmatpush1.bf16.msra.mxu1 %v6222_v20 }
 0x1db   : > { %1917 = vmatprep.subr.bf16.mxu1 %v6228_v24 }
 0x1dc   : > { %5596 = vmatpush3.bf16.msra.mxu0 %v6209_v43  ;;  %v6248_v43 = vld [vmem:[%s8055_s16 + $0x94] ss:$12 sps:$4 sm:$0xff]  }
 0x1dd   : > { %5597 = vmatprep.subr.bf16.mxu0 %v6210_v44  ;;  %v7036_v44 = vmov 0  }
 0x1de   : > { %1918 = vmatpush1.bf16.msra.mxu1 %v6226_v25  ;;  %1947 = vmatprep.mubr.bf16.mxu1 %v7036_v44 }
 0x1df   : > { %1919 = vmatprep.subr.bf16.mxu1 %v6232_v27 }
 0x1e0   : > { %5598 = vmatpush3.bf16.msra.mxu0 %v6211_v45  ;;  %v6246_v45 = vld [vmem:[%s8055_s16 + $0x90] ss:$12 sps:$4 sm:$0xff]  }
 0x1e1   : > { %5599 = vmatprep.subr.bf16.mxu0 %v6212_v46  ;;  %v6249_v46 = vld [vmem:[%s8055_s16 + $0x98] ss:$12 sps:$4 sm:$0xff]  }
 0x1e2   : > { %1920 = vmatpush1.bf16.msra.mxu1 %v6230_v28 }
 0x1e3   : > { %1921 = vmatprep.subr.bf16.mxu1 %v6236_v34 }
 0x1e4   : > { %5600 = vmatpush3.bf16.msra.mxu0 %v6213_v47  ;;  %v6252_v47 = vld [vmem:[%s8055_s16 + $0xac] ss:$12 sps:$4 sm:$0xff]  }
 0x1e5   : > { %5601 = vmatprep.subr.bf16.mxu0 %v6214_v48  ;;  %v6250_v48 = vld [vmem:[%s8055_s16 + $0xa8] ss:$12 sps:$4 sm:$0xff]  }
 0x1e6   : > { %1922 = vmatpush1.bf16.msra.mxu1 %v6234_v35 }
 0x1e7   : > { %1923 = vmatprep.subr.bf16.mxu1 %v6240_v37 }
 0x1e8   : > { %5602 = vmatpush3.bf16.msra.mxu0 %v6215_v49  ;;  %v6253_v49 = vld [vmem:[%s8055_s16 + $0xb0] ss:$12 sps:$4 sm:$0xff]  }
 0x1e9   : > { %5603 = vmatprep.subr.bf16.mxu0 %v6216_v50 }
 0x1ea   : > { %1924 = vmatpush1.bf16.msra.mxu1 %v6238_v38 }
 0x1eb   : > { %1925 = vmatprep.subr.bf16.mxu1 %v6244_v40 }
 0x1ec   : > { %5604 = vmatpush3.bf16.msra.mxu0 %v6217_v52 }
 0x1ed   : > { %5605 = vmatprep.subr.bf16.mxu0 %v6218_v54  ;;  %v5316_v54 = vld [vmem:[#allocation2] ss:$0 sm:$0xff] }
 0x1ee   : > { %1926 = vmatpush1.bf16.msra.mxu1 %v6242_v41 }
 0x1ef   : > { %1927 = vmatprep.subr.bf16.mxu1 %v6248_v43 }
 0x1f0   : > { %5606 = vmatpush3.bf16.msra.mxu0 %v6219_v55 }
 0x1f1   : > { %5607 = vmatprep.subr.bf16.mxu0 %v6220_v56  ;;  %v5317_v56 = vld [vmem:[#allocation4] ss:$0 sm:$0xff] }
 0x1f2   : > { %1928 = vmatpush1.bf16.msra.mxu1 %v6246_v45 }
 0x1f3   : > { %1929 = vmatprep.subr.bf16.mxu1 %v6252_v47 }
 0x1f4   : > { %5608 = vmatpush3.bf16.msra.mxu0 %v6221_v57 }
 0x1f5   : > { %5780 = vmatprep.subr.bf16.mxu0 %v7035_v22 }
 0x1f6   : > { %1930 = vmatpush1.bf16.msra.mxu1 %v6250_v48 }
 0x1f7   : > { %1690 = vmatmul.mubr.bf16.vlgmr.msra.gmra.mrb[4].mxu0 %v1280_v59  ;;  %5800 = vmatprep.subr.bf16.mxu1 %v7035_v22 }
 0x1f8   : > { %5781 = vmatpush3.bf16.msra.mxu0 %v6225_v23  ;;  %5796 = vmatprep.mubr.msk.bf16.mxu0 %vm7037_vm3, %v7035_v22  ;;  %v7595_v23 = vand.u32 127, %v1697_v9 }
 0x1f9   : > { %5782 = vmatprep.subr.bf16.mxu0 %v7035_v22 }
 0x1fa   : > { %vm2046_vm6 = vcmp.lt.s32.totalorder %v7595_v23, 5 }
 0x1fc   : > { %5783 = vmatpush3.bf16.msra.mxu0 %v6229_v26 }
 0x1fd   : > { %5784 = vmatprep.subr.bf16.mxu0 %v7035_v22 }
 0x200   : > { %5785 = vmatpush3.bf16.msra.mxu0 %v6233_v33 }
 0x201   : > { %5786 = vmatprep.subr.bf16.mxu0 %v7035_v22 }
 0x204   : > { %5787 = vmatpush3.bf16.msra.mxu0 %v6237_v36 }
 0x205   : > { %5788 = vmatprep.subr.bf16.mxu0 %v7035_v22 }
 0x208   : > { %5789 = vmatpush3.bf16.msra.mxu0 %v6241_v39 }
 0x209   : > { %5790 = vmatprep.subr.bf16.mxu0 %v7035_v22 }
 0x20c   : > { %5791 = vmatpush3.bf16.msra.mxu0 %v6245_v42 }
 0x20d   : > { %5792 = vmatprep.subr.bf16.mxu0 %v7035_v22 }
 0x210   : > { %5793 = vmatpush3.bf16.msra.mxu0 %v6249_v46 }
 0x211   : > { %5794 = vmatprep.subr.bf16.mxu0 %v7035_v22 }
 0x214   : > { %5795 = vmatpush3.bf16.msra.mxu0 %v6253_v49 }
 0x215   : > { %5824 = vmatprep.subr.bf16.mxu0 %v7035_v22 }
 0x2aa   : > { %v5565_v60 = vpop.f32.mrb[0].mxu0 }
 0x2ab   : > { %v5566_v62 = vpop.f32.mrb[1].mxu0 }
 0x2ac   : > { %v5567_v63 = vadd.f32 %v5566_v62, %v5565_v60  ;;  %v5568_v0 = vpop.f32.mrb[2].mxu0  ;;  %v5587_v1 = vpop.f32.mrb[0].mxu1  ;;  %v7571_v60 = vsub.s32 1, %v7520_v10  ;;  %v7574_v62 = vsub.s32 2, %v7520_v10 }
 0x2ad   : > { %v5569_v2 = vpop.f32.mrb[3].mxu0  ;;  %v5588_v4 = vpop.f32.mrb[1].mxu1  ;;  %v7578_v0 = vsub.s32 0, %v7520_v10 }
 0x2ae   : > { %v1612_v3 = vadd.f32 %v5567_v63, %v5267_v61  ;;  %v5589_v5 = vadd.f32 %v5588_v4, %v5587_v1  ;;  %v5590_v6 = vpop.f32.mrb[2].mxu1  ;;  %v1770_v61 = vld [vmem:[#allocation6] sm:$0x7] }
 0x2af   : > { %v5591_v7 = vpop.f32.mrb[3].mxu1  ;;  %v1779_v63 = vrot.slane %v1770_v61, %v7571_v60 }
 0x2b0   : > { %v1652_v8 = vadd.f32 %v5589_v5, %v1612_v3  ;;  %v1783_v5 = vrot.slane %v1770_v61, %v7574_v62 }
 0x2ca   : > { %v5609_v11 = vpop.f32.mrb[4].mxu0 }
 0x2cb   : > { %v5610_v12 = vpop.f32.mrb[5].mxu0 }
 0x2cc   : > { %v5611_v13 = vadd.f32 %v5610_v12, %v5609_v11  ;;  %v5612_v14 = vpop.f32.mrb[6].mxu0 }
 0x2cd   : > { %v5613_v15 = vpop.f32.mrb[7].mxu0 }
 0x2ce   : > { %v1692_v16 = vadd.f32 %v5611_v13, %v1652_v8  ;;  %v1775_v13 = vrot.slane %v1770_v61, %v7578_v0 }
 0x2d0   : > { %v1704_v18 = vsel %vm1701_vm2, %v1692_v16, 0.0 }
 0x2d1   : > { %v7525_v19 = vadd.f32 %v1705_v17, %v1704_v18 }
 0x2d3   : > { %1711 = vadd.xlane.f32.xlu0 %v7525_v19 }
 0x360   : > { %v1712_v29 = vpop.xlane.xlu0 %1711 }
 0x361   : > { %v1714_v30 = vmul.f32 0.0078125, %v1712_v29 }
 0x363   : > { %v1715_v31 = vsub.f32 %v7525_v19, %v1714_v30 }
 0x365   : > { %v1716_v32 = vmul.f32 %v1715_v31, %v1715_v31 }
 0x367   : > { %1717 = vadd.xlane.f32.xlu0 %v1716_v32 }
 0x3f4   : > { %v1718_v50 = vpop.xlane.xlu0 %1717 }
 0x3f5   : > { %v1719_v51 = vmul.f32 0.0078125, %v1718_v50 }
 0x3f7   : > { %v1720_v52 = vadd.f32 1e-06, %v1719_v51 }
 0x3f9   : > { %6470 = vrsqrt.f32 %v1720_v52 }
 0x403   : > { %v6471_v53 = vpop.eup %6470 }
 0x404   : > { %v1722_v55 = vmul.f32 %v6471_v53, %v1715_v31 }
 0x406   : > { %v1729_v57 = vmul.f32 %v5316_v54, %v1722_v55 }
 0x408   : > { %v1736_v58 = vadd.f32 %v5317_v56, %v1729_v57 }
 0x40a   : > { %v1769_v59 = vpack.c.bf16 %v1736_v58, %v1736_v58 }
 0x40c   : > { %1948 = vmatmul.mubr.bf16.vlgmr.msra.gmra.mrb[4].mxu1 %v1769_v59  ;;  %5797 = vmatmul.mubr.bf16.vlgmr.msra.gmra.mrb[8].mxu0 %v1769_v59 }
 0x40d   : > { %5802 = vmatprep.mubr.msk.bf16.mxu1 %vm7037_vm3, %v7035_v22  ;;  %5826 = vmatprep.mubr.msk.bf16.mxu0 %vm7037_vm3, %v7035_v22 }
 0x4df   : > { %v1949_v1 = vpop.f32.mrb[4].mxu1  ;;  %v1990_v2 = vpop.f32.mrb[8].mxu0 }
 0x4e0   : > { %v1951_v3 = vpop.f32.mrb[5].mxu1  ;;  %v5798_v4 = vpop.f32.mrb[9].mxu0  ;;  %v1991_v15 = vadd.f32 %v1990_v2, %v1783_v5  ;;  %v1950_v17 = vadd.f32 %v1949_v1, %v1775_v13 }
 0x4e1   : > { %v1952_v6 = vadd.f32 %v1951_v3, %v1779_v63  ;;  %v1953_v7 = vpop.f32.mrb[6].mxu1  ;;  %v1993_v8 = vpop.f32.mrb[10].mxu0 }
 0x4e2   : > { %v1954_v11 = vpop.f32.mrb[7].mxu1  ;;  %v5799_v12 = vpop.f32.mrb[11].mxu0  ;;  %v7585_v18 = vpack.c.bf16 %v1991_v15, %v1991_v15  ;;  %v1996_v20 = vpack.c.bf16 %v1950_v17, %v1950_v17 }
 0x4e3   : > { %v1997_v14 = vpack.c.bf16 %v1952_v6, %v1952_v6 }
 0x4e4   : > { %v2067_v21 = vsel %vm2065_vm5, %v7585_v18, 0 }
 0x4e5   : > { %2113 = vrot.lane.b32.xlu0 %v1997_v14, %s7038_s23  ;;  %v2003_v16 = vsel %vm1998_vm4, %v1997_v14, 0 }
 0x4e6   : > { %5801 = vmatpush3.bf16.xpose.msra.mxu1 %v2003_v16 }
 0x4e7   : > { %5806 = vmatprep.subr.bf16.mxu1 %v7035_v22 }
 0x4e9   : > { %2338 = vrot.lane.b32.xlu0 %v1997_v14, %s7039_s10 }
 0x4ed   : > { %5803 = vmatmul.mubr.msk.bf16.vlgmr.msra.gmra.mrb[8].mxu1 %vm1998_vm4, %v1996_v20 }
 0x4ee   : > { %5807 = vmatpush3.bf16.msra.mxu1 %v2067_v21  ;;  %5808 = vmatprep.mubr.msk.bf16.mxu1 %vm7037_vm3, %v7035_v22 }
 0x4ef   : > { %5812 = vmatprep.subr.bf16.mxu1 %v7035_v22 }
 0x557   : > { %v2114_v37 = vpop.permute.xlu0 %2113 }
 0x558   : > { %v2119_v45 = vsel %vm1998_vm4, %v2114_v37, 0 }
 0x55b   : > { %v2339_v42 = vpop.permute.xlu0 %2338 }
 0x55c   : > { %v2344_v47 = vsel %vm1998_vm4, %v2339_v42, 0 }
 0x5c0   : > { %v2039_v24 = vpop.f32.mrb[8].mxu1 }
 0x5c1   : > { %v2045_v25 = vmul.f32 0.17677669, %v2039_v24  ;;  %v5804_v26 = vpop.f32.mrb[9].mxu1 }
 0x5c2   : > { %v2042_v27 = vpop.f32.mrb[10].mxu1 }
 0x5c3   : > { %v5805_v28 = vpop.f32.mrb[11].mxu1  ;;  %v2047_v29 = vsel %vm2046_vm6, %v2045_v25, -1e+30 }
 0x5c4   : > { %v2049_v30 = vsel %vm2048_vm7, %v2047_v29, -inf }
 0x5c5   : > { %2050 = vmax.xlane.f32.xlu1 %v2049_v30 }
 0x652   : > { %v2051_v31 = vpop.xlane.xlu1 %2050 }
 0x653   : > { %v2052_v32 = vsub.f32 %v2047_v29, %v2051_v31 }
 0x655   : > { %v2053_v33 = vmul.f32 1.442695, %v2052_v32 }
 0x657   : > { %6472 = vpow2.f32 %v2053_v33 }
 0x661   : > { %v6473_v9 = vpop.eup %6472 }
 0x662   : > { %v2055_v34 = vsel %vm2048_vm7, %v6473_v9, 0.0 }
 0x663   : > { %2056 = vadd.xlane.f32.xlu1 %v2055_v34 }
 0x674   : > { %2110 = vrot.lane.b32.xlu1 %v1996_v20, %s7038_s23 }
 0x678   : > { %2226 = vrot.lane.b32.xlu1 %v1997_v14, %s7040_s15 }
 0x67c   : > { %2224 = vrot.lane.b32.xlu1 %v1996_v20, %s7040_s15 }
 0x680   : > { %2336 = vrot.lane.b32.xlu1 %v1996_v20, %s7039_s10 }
 0x6f0   : > { %v2057_v35 = vpop.xlane.xlu1 %2056 }
 0x6f1   : > { %6474 = vrcp.f32 %v2057_v35 }
 0x6f4   : > { %v2111_v36 = vpop.permute.xlu1 %2110 }
 0x6f8   : > { %v2227_v38 = vpop.permute.xlu1 %2226 }
 0x6f9   : > { %v2232_v39 = vsel %vm1998_vm4, %v2227_v38, 0 }
 0x6fa   : > { %5825 = vmatpush3.bf16.xpose.msra.mxu0 %v2232_v39 }
 0x6fb   : > { %v6475_v40 = vpop.eup %6474  ;;  %5836 = vmatprep.subr.bf16.mxu0 %v7035_v22 }
 0x6fc   : > { %v2059_v41 = vmul.f32 %v6475_v40, %v6473_v9  ;;  %v2225_v46 = vpop.permute.xlu1 %2224 }
 0x6fe   : > { %v2061_v43 = vpack.c.bf16 %v2059_v41, %v2059_v41 }
 0x700   : > { %5809 = vmatmul.mubr.msk.bf16.vlgmr.msra.gmra.mrb[12].mxu1 %vm2048_vm7, %v2061_v43  ;;  %v2337_v48 = vpop.permute.xlu1 %2336 }
 0x701   : > { %5813 = vmatpush3.bf16.xpose.msra.mxu1 %v2119_v45  ;;  %5827 = vmatmul.mubr.msk.bf16.vlgmr.msra.gmra.mrb[12].mxu0 %vm1998_vm4, %v2225_v46 }
 0x702   : > { %5837 = vmatpush3.bf16.xpose.msra.mxu0 %v2344_v47  ;;  %5814 = vmatprep.mubr.msk.bf16.mxu1 %vm7037_vm3, %v7035_v22 }
 0x703   : > { %5838 = vmatprep.mubr.msk.bf16.mxu0 %vm7037_vm3, %v7035_v22  ;;  %5818 = vmatprep.subr.bf16.mxu1 %v7035_v22 }
 0x704   : > { %5848 = vmatprep.subr.bf16.mxu0 %v7035_v22 }
 0x708   : > { %5815 = vmatmul.mubr.msk.bf16.vlgmr.msra.gmra.mrb[16].mxu1 %vm1998_vm4, %v2111_v36 }
 0x709   : > { %5839 = vmatmul.mubr.msk.bf16.vlgmr.msra.gmra.mrb[16].mxu0 %vm1998_vm4, %v2337_v48  ;;  %5820 = vmatprep.mubr.msk.bf16.mxu1 %vm7037_vm3, %v7035_v22 }
 0x70a   : > { %5864 = vmatprep.mubr.msk.bf16.mxu0 %vm7037_vm3, %v7035_v22 }
 0x7d3   : > { %v7624_v49 = vpop.f32.mrb[12].mxu1 }
 0x7d4   : > { %v5810_v50 = vpop.f32.mrb[13].mxu1  ;;  %v2268_v51 = vpop.f32.mrb[12].mxu0 }
 0x7d5   : > { %v2274_v52 = vmul.f32 0.17677669, %v2268_v51  ;;  %v2106_v53 = vpop.f32.mrb[14].mxu1  ;;  %v5828_v54 = vpop.f32.mrb[13].mxu0 }
 0x7d6   : > { %v5811_v55 = vpop.f32.mrb[15].mxu1  ;;  %v2271_v56 = vpop.f32.mrb[14].mxu0  ;;  %v6255_v53 = vld [vmem:[%s8056_s18 + $0x8] sm:$0xff]   ;;  %v6256_v54 = vld [vmem:[%s8056_s18 + $0x10] sm:$0xff]  }
 0x7d7   : > { %v5829_v57 = vpop.f32.mrb[15].mxu0  ;;  %v2275_v58 = vsel %vm2046_vm6, %v2274_v52, -1e+30  ;;  %v6254_v52 = vld [vmem:[%s8056_s18] sm:$0xff]   ;;  %v6257_v55 = vld [vmem:[%s8056_s18 + $0x18] sm:$0xff]  }
 0x7d8   : > { %v2276_v59 = vsel %vm2048_vm7, %v2275_v58, -inf  ;;  %5849 = vmatpush3.bf16.msra.mxu0 %v6254_v52  ;;  %v6258_v56 = vld [vmem:[%s8056_s18 + $0x20] sm:$0xff]   ;;  %v6259_v57 = vld [vmem:[%s8056_s18 + $0x28] sm:$0xff]  }
 0x7d9   : > { %2277 = vmax.xlane.f32.xlu1 %v2276_v59  ;;  %5850 = vmatprep.subr.bf16.mxu0 %v7035_v22  ;;  %v6291_v52 = vld [vmem:[%s8057_s0 + $0x8c] ss:$16 sps:$4 sm:$0xff]  }
 0x7db   : > { %v2155_v61 = vpop.f32.mrb[16].mxu1 }
 0x7dc   : > { %v2161_v63 = vmul.f32 0.17677669, %v2155_v61  ;;  %v5816_v1 = vpop.f32.mrb[17].mxu1  ;;  %v2380_v2 = vpop.f32.mrb[16].mxu0  ;;  %5851 = vmatpush3.bf16.msra.mxu0 %v6255_v53  ;;  %v6294_v53 = vld [vmem:[%s8057_s0 + $0xa4] ss:$16 sps:$4 sm:$0xff]  }
 0x7dd   : > { %v2386_v3 = vmul.f32 0.17677669, %v2380_v2  ;;  %v2158_v4 = vpop.f32.mrb[18].mxu1  ;;  %v5840_v5 = vpop.f32.mrb[17].mxu0  ;;  %5852 = vmatprep.subr.bf16.mxu0 %v7035_v22  ;;  %v6261_v2 = vld [vmem:[%s8056_s18 + $0x38] sm:$0xff]  }
 0x7de   : > { %v5817_v6 = vpop.f32.mrb[19].mxu1  ;;  %v2383_v7 = vpop.f32.mrb[18].mxu0  ;;  %v2162_v8 = vsel %vm2046_vm6, %v2161_v63, -1e+30 }
 0x7df   : > { %v5841_v11 = vpop.f32.mrb[19].mxu0  ;;  %v2163_v12 = vsel %vm2048_vm7, %v2162_v8, -inf  ;;  %v2387_v13 = vsel %vm2046_vm6, %v2386_v3, -1e+30 }
 0x7e0   : > { %2164 = vmax.xlane.f32.xlu0 %v2163_v12  ;;  %v2388_v14 = vsel %vm2048_vm7, %v2387_v13, -inf  ;;  %5853 = vmatpush3.bf16.msra.mxu0 %v6256_v54  ;;  %v6297_v54 = vld [vmem:[%s8057_s0 + $0xac] ss:$16 sps:$4 sm:$0xff]  }
 0x7e1   : > { %5854 = vmatprep.subr.bf16.mxu0 %v7035_v22 }
 0x7e4   : > { %2389 = vmax.xlane.f32.xlu0 %v2388_v14  ;;  %5855 = vmatpush3.bf16.msra.mxu0 %v6257_v55  ;;  %v6292_v55 = vld [vmem:[%s8057_s0 + $0xa0] ss:$16 sps:$4 sm:$0xff]  }
 0x7e5   : > { %5856 = vmatprep.subr.bf16.mxu0 %v7035_v22 }
 0x7e8   : > { %5857 = vmatpush3.bf16.msra.mxu0 %v6258_v56  ;;  %v6295_v56 = vld [vmem:[%s8057_s0 + $0xa8] ss:$16 sps:$4 sm:$0xff]  }
 0x7e9   : > { %5858 = vmatprep.subr.bf16.mxu0 %v7035_v22 }
 0x7ec   : > { %5859 = vmatpush3.bf16.msra.mxu0 %v6259_v57  ;;  %v6300_v57 = vld [vmem:[%s8057_s0 + $0xc4] ss:$16 sps:$4 sm:$0xff]  }
 0x7ed   : > { %5860 = vmatprep.subr.bf16.mxu0 %v7035_v22 }
 0x866   : > { %v2278_v15 = vpop.xlane.xlu1 %2277 }
 0x867   : > { %v2279_v16 = vsub.f32 %v2275_v58, %v2278_v15  ;;  %v6260_v58 = vld [vmem:[%s8056_s18 + $0x30] sm:$0xff]  }
 0x868   : > { %5861 = vmatpush3.bf16.msra.mxu0 %v6260_v58  ;;  %v6303_v58 = vld [vmem:[%s8057_s0 + $0xcc] ss:$16 sps:$4 sm:$0xff]  }
 0x869   : > { %v2280_v17 = vmul.f32 1.442695, %v2279_v16  ;;  %5862 = vmatprep.subr.bf16.mxu0 %v7035_v22 }
 0x86b   : > { %6476 = vpow2.f32 %v2280_v17 }
 0x86c   : > { %5863 = vmatpush3.bf16.msra.mxu0 %v6261_v2  ;;  %v6304_v2 = vld [vmem:[%s8057_s0 + $0xe0] ss:$16 sps:$4 sm:$0xff]  }
 0x86d   : > { %v2165_v20 = vpop.xlane.xlu0 %2164 }
 0x86e   : > { %v2166_v21 = vsub.f32 %v2162_v8, %v2165_v20 }
 0x870   : > { %v2167_v24 = vmul.f32 1.442695, %v2166_v21 }
 0x871   : > { %v2390_v25 = vpop.xlane.xlu0 %2389 }
 0x872   : > { %6478 = vpow2.f32 %v2167_v24  ;;  %v2391_v26 = vsub.f32 %v2387_v13, %v2390_v25  ;;  %v5358_v25 = vld [vmem:[#allocation7] ss:$0 sm:$0xff] }
 0x874   : > { %v2392_v27 = vmul.f32 1.442695, %v2391_v26 }
 0x875   : > { %v6477_v28 = vpop.eup %6476 }
 0x876   : > { %6480 = vpow2.f32 %v2392_v27  ;;  %v2282_v29 = vsel %vm2048_vm7, %v6477_v28, 0.0 }
 0x877   : > { %2283 = vadd.xlane.f32.xlu0 %v2282_v29 }
 0x87c   : > { %v6479_v30 = vpop.eup %6478 }
 0x87d   : > { %v2169_v31 = vsel %vm2048_vm7, %v6479_v30, 0.0 }
 0x87e   : > { %2170 = vadd.xlane.f32.xlu0 %v2169_v31  ;;  %v6264_v31 = vld [vmem:[%s8057_s0 + $0x4] ss:$16 sps:$4 sm:$0xff]  }
 0x880   : > { %v6481_v32 = vpop.eup %6480 }
 0x881   : > { %v2394_v33 = vsel %vm2048_vm7, %v6481_v32, 0.0 }
 0x882   : > { %2395 = vadd.xlane.f32.xlu1 %v2394_v33  ;;  %v6267_v33 = vld [vmem:[%s8057_s0 + $0xc] ss:$16 sps:$4 sm:$0xff]  }
 0x883   : > { %2862 = vmatprep.subr.bf16.mxu0 %v6267_v33  ;;  %v6323_v33 = vld [vmem:[%s8058_s11 + $0xd8] sm:$0xff]  }
 0x893   : > { %2288 = vrot.lane.b32.xlu1 %v7585_v18, %s7040_s15 }
 0x894   : > { %2176 = vrot.lane.b32.xlu0 %v7585_v18, %s7038_s23 }
 0x897   : > { %2400 = vrot.lane.b32.xlu1 %v7585_v18, %s7039_s10 }
 0x904   : > { %v2284_v9 = vpop.xlane.xlu0 %2283 }
 0x90b   : > { %v2171_v34 = vpop.xlane.xlu0 %2170 }
 0x90c   : > { %6482 = vrcp.f32 %v2171_v34  ;;  %v6273_v34 = vld [vmem:[%s8057_s0 + $0x2c] ss:$16 sps:$4 sm:$0xff]  }
 0x90d   : > { %6484 = vrcp.f32 %v2284_v9  ;;  %v6270_v9 = vld [vmem:[%s8057_s0 + $0x24] ss:$16 sps:$4 sm:$0xff]  }
 0x90f   : > { %v2177_v35 = vpop.permute.xlu0 %2176  ;;  %v2396_v37 = vpop.xlane.xlu1 %2395 }
 0x910   : > { %v2182_v36 = vsel %vm2065_vm5, %v2177_v35, 0  ;;  %6486 = vrcp.f32 %v2396_v37  ;;  %v6271_v35 = vld [vmem:[%s8057_s0 + $0x28] ss:$16 sps:$4 sm:$0xff]   ;;  %v6279_v37 = vld [vmem:[%s8057_s0 + $0x4c] ss:$16 sps:$4 sm:$0xff]  }
 0x911   : > { %5819 = vmatpush3.bf16.msra.mxu1 %v2182_v36  ;;  %v6276_v36 = vld [vmem:[%s8057_s0 + $0x44] ss:$16 sps:$4 sm:$0xff]  }
 0x912   : > { %5830 = vmatprep.subr.bf16.mxu1 %v7035_v22 }
 0x913   : > { %v2289_v40 = vpop.permute.xlu1 %2288 }
 0x914   : > { %v2294_v43 = vsel %vm2065_vm5, %v2289_v40, 0 }
 0x916   : > { %v6483_v38 = vpop.eup %6482 }
 0x917   : > { %v2173_v39 = vmul.f32 %v6483_v38, %v6479_v30  ;;  %v6485_v42 = vpop.eup %6484  ;;  %v2401_v45 = vpop.permute.xlu1 %2400  ;;  %v6262_v30 = vld [vmem:[%s8057_s0] ss:$16 sps:$4 sm:$0xff]  }
 0x918   : > { %v2286_v18 = vmul.f32 %v6485_v42, %v6477_v28  ;;  %v2406_v48 = vsel %vm2065_vm5, %v2401_v45, 0  ;;  %v6274_v38 = vld [vmem:[%s8057_s0 + $0x40] ss:$16 sps:$4 sm:$0xff]   ;;  %v6285_v45 = vld [vmem:[%s8057_s0 + $0x6c] ss:$16 sps:$4 sm:$0xff]  }
 0x919   : > { %v2174_v41 = vpack.c.bf16 %v2173_v39, %v2173_v39  ;;  %v6277_v39 = vld [vmem:[%s8057_s0 + $0x48] ss:$16 sps:$4 sm:$0xff]  }
 0x91a   : > { %v2287_v46 = vpack.c.bf16 %v2286_v18, %v2286_v18  ;;  %v6487_v47 = vpop.eup %6486  ;;  %v6282_v18 = vld [vmem:[%s8057_s0 + $0x64] ss:$16 sps:$4 sm:$0xff]  }
 0x91b   : > { %5821 = vmatmul.mubr.msk.bf16.vlgmr.msra.gmra.mrb[20].mxu1 %vm2048_vm7, %v2174_v41  ;;  %v2398_v50 = vmul.f32 %v6487_v47, %v6481_v32  ;;  %v6265_v32 = vld [vmem:[%s8057_s0 + $0x8] ss:$16 sps:$4 sm:$0xff]  }
 0x91c   : > { %5831 = vmatpush3.bf16.msra.mxu1 %v2294_v43  ;;  %5832 = vmatprep.mubr.msk.bf16.mxu1 %vm7037_vm3, %v7035_v22  ;;  %v6283_v47 = vld [vmem:[%s8057_s0 + $0x68] ss:$16 sps:$4 sm:$0xff]  }
 0x91d   : > { %5842 = vmatprep.subr.bf16.mxu1 %v7035_v22  ;;  %v2399_v51 = vpack.c.bf16 %v2398_v50, %v2398_v50  ;;  %v6286_v50 = vld [vmem:[%s8057_s0 + $0x80] ss:$16 sps:$4 sm:$0xff]  }
 0x923   : > { %5833 = vmatmul.mubr.msk.bf16.vlgmr.msra.gmra.mrb[24].mxu1 %vm2048_vm7, %v2287_v46  ;;  %v6280_v46 = vld [vmem:[%s8057_s0 + $0x60] ss:$16 sps:$4 sm:$0xff]  }
 0x924   : > { %5843 = vmatpush3.bf16.msra.mxu1 %v2406_v48  ;;  %5844 = vmatprep.mubr.msk.bf16.mxu1 %vm7037_vm3, %v7035_v22  ;;  %v6288_v48 = vld [vmem:[%s8057_s0 + $0x84] ss:$16 sps:$4 sm:$0xff]  }
 0x925   : > { %2821 = vmatprep.subr.bf16.mxu1 %v6264_v31  ;;  %v6321_v31 = vld [vmem:[%s8058_s11 + $0x90] sm:$0xff]  }
 0x92b   : > { %5845 = vmatmul.mubr.msk.bf16.vlgmr.msra.gmra.mrb[28].mxu1 %vm2048_vm7, %v2399_v51  ;;  %v6289_v51 = vld [vmem:[%s8057_s0 + $0x88] ss:$16 sps:$4 sm:$0xff]  }
 0x92c   : > { %2853 = vmatprep.mubr.bf16.mxu1 %v7036_v44  ;;  %2822 = vmatpush1.bf16.msra.mxu1 %v6262_v30  ;;  %v6320_v30 = vld [vmem:[%s8058_s11 + $0x10] sm:$0xff]  }
 0x92d   : > { %2823 = vmatprep.subr.bf16.mxu1 %v6270_v9  ;;  %v6324_v9 = vld [vmem:[%s8058_s11 + $0x18] sm:$0xff]  }
 0x9ee   : > { %v2218_v59 = vpop.f32.mrb[20].mxu1 }
 0x9ef   : > { %2449 = vrot.lane.b32.xlu1 %v2218_v59, %s7039_s10  ;;  %v5822_v61 = vpop.f32.mrb[21].mxu1  ;;  %v6298_v59 = vld [vmem:[%s8057_s0 + $0xc0] ss:$16 sps:$4 sm:$0xff]  }
 0x9f0   : > { %v2221_v63 = vpop.f32.mrb[22].mxu1  ;;  %v6301_v61 = vld [vmem:[%s8057_s0 + $0xc8] ss:$16 sps:$4 sm:$0xff]  }
 0x9f1   : > { %v5823_v1 = vpop.f32.mrb[23].mxu1  ;;  %v6306_v63 = vld [vmem:[%s8057_s0 + $0xe4] ss:$16 sps:$4 sm:$0xff]  }
 0x9f2   : > { %v6309_v1 = vld [vmem:[%s8057_s0 + $0xec] ss:$16 sps:$4 sm:$0xff]  }
 0x9f6   : > { %v2330_v3 = vpop.f32.mrb[24].mxu1 }
 0x9f7   : > { %2453 = vrot.lane.b32.xlu0 %v2330_v3, %s7040_s15  ;;  %v5834_v4 = vpop.f32.mrb[25].mxu1  ;;  %v6307_v3 = vld [vmem:[%s8057_s0 + $0xe8] ss:$16 sps:$4 sm:$0xff]  }
 0x9f8   : > { %v2333_v5 = vpop.f32.mrb[26].mxu1 }
 0x9f9   : > { %v5835_v6 = vpop.f32.mrb[27].mxu1 }
 0x9fe   : > { %v2442_v7 = vpop.f32.mrb[28].mxu1 }
 0x9ff   : > { %2457 = vrot.lane.b32.xlu1 %v2442_v7, %s7038_s23  ;;  %v5846_v8 = vpop.f32.mrb[29].mxu1 }
 0xa00   : > { %v2445_v11 = vpop.f32.mrb[30].mxu1  ;;  %v5359_v8 = vld [vmem:[#allocation9] ss:$0 sm:$0xff] }
 0xa01   : > { %v5847_v12 = vpop.f32.mrb[31].mxu1 }
 0xa02   : > { %v5360_v12 = vld [vmem:[#allocation10] ss:$0 sm:$0xff] }
 0xa61   : > { %v2450_v13 = vpop.permute.xlu1 %2449 }
 0xa62   : > { %v2460_v15 = vsel %vm1998_vm4, %v7624_v49, %v2450_v13 }
 0xa69   : > { %v2454_v14 = vpop.permute.xlu0 %2453 }
 0xa6a   : > { %v2462_v16 = vsel %vm2461_vm8, %v2460_v15, %v2454_v14 }
 0xa71   : > { %v2458_v17 = vpop.permute.xlu1 %2457 }
 0xa72   : > { %v2464_v20 = vsel %vm2463_vm9, %v2462_v16, %v2458_v17  ;;  %v6310_v16 = vld [vmem:[%s8058_s11 + $0x40] sm:$0xff]  }
 0xa73   : > { %v2481_v21 = vpack.c.bf16 %v2464_v20, %v2464_v20  ;;  %v6311_v17 = vld [vmem:[%s8058_s11 + $0xc0] sm:$0xff]  }
 0xa74   : > { %v6312_v20 = vld [vmem:[%s8058_s11] sm:$0xff]  }
 0xa75   : > { %5865 = vmatmul.mubr.bf16.vlgmr.msra.gmra.mrb[20].mxu0 %v2481_v21  ;;  %v6313_v21 = vld [vmem:[%s8058_s11 + $0x80] sm:$0xff]  }
 0xa76   : > { %2894 = vmatprep.mubr.bf16.mxu0 %v7036_v44  ;;  %2863 = vmatpush1.bf16.msra.mxu0 %v6265_v32  ;;  %v6322_v32 = vld [vmem:[%s8058_s11 + $0x58] sm:$0xff]  }
 0xa77   : > { %2864 = vmatprep.subr.bf16.mxu0 %v6273_v34  ;;  %v6325_v34 = vld [vmem:[%s8058_s11 + $0x98] sm:$0xff]  }
 0xa7a   : > { %2865 = vmatpush1.bf16.msra.mxu0 %v6271_v35  ;;  %v6327_v35 = vld [vmem:[%s8058_s11 + $0xe0] sm:$0xff]  }
 0xa7b   : > { %2866 = vmatprep.subr.bf16.mxu0 %v6279_v37  ;;  %v6329_v37 = vld [vmem:[%s8058_s11 + $0xa0] sm:$0xff]  }
 0xa7e   : > { %2867 = vmatpush1.bf16.msra.mxu0 %v6277_v39  ;;  %v6331_v39 = vld [vmem:[%s8058_s11 + $0xe8] sm:$0xff]  }
 0xa7f   : > { %2868 = vmatprep.subr.bf16.mxu0 %v6285_v45  ;;  %v6337_v45 = vld [vmem:[%s8058_s11 + $0xb0] sm:$0xff]  }
 0xa82   : > { %2869 = vmatpush1.bf16.msra.mxu0 %v6283_v47  ;;  %v6339_v47 = vld [vmem:[%s8058_s11 + $0xf8] sm:$0xff]  }
 0xa83   : > { %2870 = vmatprep.subr.bf16.mxu0 %v6291_v52  ;;  %v2655_v52 = vsub.s32 3, %v7520_v10 }
 0xa86   : > { %2871 = vmatpush1.bf16.msra.mxu0 %v6289_v51  ;;  %v2639_v51 = vld [vmem:[#allocation12] sm:$0xf] }
 0xa87   : > { %2872 = vmatprep.subr.bf16.mxu0 %v6297_v54  ;;  %v2652_v54 = vrot.slane %v2639_v51, %v7574_v62 }
 0xa8a   : > { %2873 = vmatpush1.bf16.msra.mxu0 %v6295_v56  ;;  %v2656_v56 = vrot.slane %v2639_v51, %v2655_v52 }
 0xa8b   : > { %2874 = vmatprep.subr.bf16.mxu0 %v6303_v58 }
 0xa8e   : > { %2875 = vmatpush1.bf16.msra.mxu0 %v6301_v61 }
 0xa8f   : > { %2876 = vmatprep.subr.bf16.mxu0 %v6309_v1 }
 0xa92   : > { %2877 = vmatpush1.bf16.msra.mxu0 %v6307_v3 }
 0xa93   : > { %5671 = vmatprep.subr.bf16.mxu0 %v6311_v17 }
 0xb48   : > { %v2564_v24 = vpop.f32.mrb[20].mxu0 }
 0xb49   : > { %v2570_v26 = vadd.f32 %v2564_v24, %v7525_v19  ;;  %v5866_v49 = vpop.f32.mrb[21].mxu0  ;;  %v6268_v19 = vld [vmem:[%s8057_s0 + $0x20] ss:$16 sps:$4 sm:$0xff]   ;;  %v6314_v24 = vld [vmem:[%s8058_s11 + $0x48] sm:$0xff]   ;;  %s5266_s0 = sshll.u32 %s8066_s2, 3 }
 0xb4a   : > { %v2567_v27 = vpop.f32.mrb[22].mxu0  ;;  %2824 = vmatpush1.bf16.msra.mxu1 %v6268_v19  ;;  %v6317_v49 = vld [vmem:[%s8058_s11 + $0x88] sm:$0xff]   ;;  %v6326_v19 = vld [vmem:[%s8058_s11 + $0x60] sm:$0xff]   ;;  %s1172_s1 = scalar_lea.vmem %s7209_s8, %s5266_s0 }
 0xb4b   : > { %v7681_v28 = vadd.f32 %v5358_v25, %v2570_v26  ;;  %v5867_v29 = vpop.f32.mrb[23].mxu0  ;;  %2825 = vmatprep.subr.bf16.mxu1 %v6276_v36  ;;  %v6315_v25 = vld [vmem:[%s8058_s11 + $0xc8] sm:$0xff]   ;;  %v6318_v27 = vld [vmem:[%s8058_s11 + $0x50] sm:$0xff]   ;;  %v6328_v36 = vld [vmem:[%s8058_s11 + $0x20] sm:$0xff]  }
 0xb4c   : > { %v6316_v26 = vld [vmem:[%s8058_s11 + $0x8] sm:$0xff]   ;;  %v6319_v29 = vld [vmem:[%s8058_s11 + $0xd0] sm:$0xff]  }
 0xb4d   : > { %2581 = vadd.xlane.f32.xlu0 %v7681_v28 }
 0xb4e   : > { %2826 = vmatpush1.bf16.msra.mxu1 %v6274_v38  ;;  %v6330_v38 = vld [vmem:[%s8058_s11 + $0x68] sm:$0xff]  }
 0xb4f   : > { %2827 = vmatprep.subr.bf16.mxu1 %v6282_v18  ;;  %v6336_v18 = vld [vmem:[%s8058_s11 + $0x30] sm:$0xff]  }
 0xb52   : > { %2828 = vmatpush1.bf16.msra.mxu1 %v6280_v46  ;;  %v6338_v46 = vld [vmem:[%s8058_s11 + $0x78] sm:$0xff]  }
 0xb53   : > { %2829 = vmatprep.subr.bf16.mxu1 %v6288_v48  ;;  %v6340_v48 = vld [vmem:[%s8058_s11 + $0x38] sm:$0xff]  }
 0xb56   : > { %2830 = vmatpush1.bf16.msra.mxu1 %v6286_v50  ;;  %v6341_v50 = vld [vmem:[%s8058_s11 + $0xb8] sm:$0xff]  }
 0xb57   : > { %2831 = vmatprep.subr.bf16.mxu1 %v6294_v53  ;;  %v2644_v53 = vrot.slane %v2639_v51, %v7578_v0 }
 0xb5a   : > { %2832 = vmatpush1.bf16.msra.mxu1 %v6292_v55  ;;  %v2648_v55 = vrot.slane %v2639_v51, %v7571_v60 }
 0xb5b   : > { %2833 = vmatprep.subr.bf16.mxu1 %v6300_v57 }
 0xb5e   : > { %2834 = vmatpush1.bf16.msra.mxu1 %v6298_v59 }
 0xb5f   : > { %2835 = vmatprep.subr.bf16.mxu1 %v6306_v63 }
 0xb62   : > { %2836 = vmatpush1.bf16.msra.mxu1 %v6304_v2 }
 0xb63   : > { %5649 = vmatprep.subr.bf16.mxu1 %v6310_v16 }
 0xbda   : > { %v2582_v40 = vpop.xlane.xlu0 %2581 }
 0xbdb   : > { %v2583_v41 = vmul.f32 0.0078125, %v2582_v40  ;;  %v6332_v40 = vld [vmem:[%s8058_s11 + $0x28] sm:$0xff]  }
 0xbdd   : > { %v2584_v42 = vsub.f32 %v7681_v28, %v2583_v41  ;;  %v6333_v41 = vld [vmem:[%s8058_s11 + $0xa8] sm:$0xff]  }
 0xbdf   : > { %v2585_v43 = vmul.f32 %v2584_v42, %v2584_v42 }
 0xbe1   : > { %2586 = vadd.xlane.f32.xlu1 %v2585_v43  ;;  %v6335_v43 = vld [vmem:[%s8058_s11 + $0xf0] sm:$0xff]  }
 0xc6e   : > { %v2587_v4 = vpop.xlane.xlu1 %2586 }
 0xc6f   : > { %v2588_v5 = vmul.f32 0.0078125, %v2587_v4 }
 0xc71   : > { %v2589_v6 = vadd.f32 1e-06, %v2588_v5 }
 0xc73   : > { %6488 = vrsqrt.f32 %v2589_v6 }
 0xc7d   : > { %v6489_v7 = vpop.eup %6488 }
 0xc7e   : > { %v2591_v11 = vmul.f32 %v6489_v7, %v2584_v42  ;;  %v6334_v42 = vld [vmem:[%s8058_s11 + $0x70] sm:$0xff]  }
 0xc80   : > { %v2598_v13 = vmul.f32 %v5359_v8, %v2591_v11 }
 0xc82   : > { %v2605_v14 = vadd.f32 %v5360_v12, %v2598_v13 }
 0xc84   : > { %v2638_v15 = vpack.c.bf16 %v2605_v14, %v2605_v14 }
 0xc86   : > { %2854 = vmatmul.mubr.bf16.vlgmr.msra.gmra.mrb[32].mxu1 %v2638_v15  ;;  %2895 = vmatmul.mubr.bf16.vlgmr.msra.gmra.mrb[24].mxu0 %v2638_v15 }
 0xc87   : > { %5650 = vmatpush3.bf16.msra.mxu1 %v6312_v20  ;;  %5672 = vmatpush3.bf16.msra.mxu0 %v6313_v21 }
 0xc88   : > { %5651 = vmatprep.subr.bf16.mxu1 %v6314_v24  ;;  %5673 = vmatprep.subr.bf16.mxu0 %v6315_v25 }
 0xc8b   : > { %5652 = vmatpush3.bf16.msra.mxu1 %v6316_v26  ;;  %5674 = vmatpush3.bf16.msra.mxu0 %v6317_v49 }
 0xc8c   : > { %5653 = vmatprep.subr.bf16.mxu1 %v6318_v27  ;;  %5675 = vmatprep.subr.bf16.mxu0 %v6319_v29 }
 0xc8f   : > { %5654 = vmatpush3.bf16.msra.mxu1 %v6320_v30  ;;  %5676 = vmatpush3.bf16.msra.mxu0 %v6321_v31 }
 0xc90   : > { %5655 = vmatprep.subr.bf16.mxu1 %v6322_v32  ;;  %5677 = vmatprep.subr.bf16.mxu0 %v6323_v33 }
 0xc93   : > { %5656 = vmatpush3.bf16.msra.mxu1 %v6324_v9  ;;  %5678 = vmatpush3.bf16.msra.mxu0 %v6325_v34 }
 0xc94   : > { %5657 = vmatprep.subr.bf16.mxu1 %v6326_v19  ;;  %5679 = vmatprep.subr.bf16.mxu0 %v6327_v35 }
 0xc97   : > { %5658 = vmatpush3.bf16.msra.mxu1 %v6328_v36  ;;  %5680 = vmatpush3.bf16.msra.mxu0 %v6329_v37 }
 0xc98   : > { %5659 = vmatprep.subr.bf16.mxu1 %v6330_v38  ;;  %5681 = vmatprep.subr.bf16.mxu0 %v6331_v39 }
 0xc9b   : > { %5660 = vmatpush3.bf16.msra.mxu1 %v6332_v40  ;;  %5682 = vmatpush3.bf16.msra.mxu0 %v6333_v41 }
 0xc9c   : > { %5661 = vmatprep.subr.bf16.mxu1 %v6334_v42  ;;  %5683 = vmatprep.subr.bf16.mxu0 %v6335_v43 }
 0xc9f   : > { %5662 = vmatpush3.bf16.msra.mxu1 %v6336_v18  ;;  %5684 = vmatpush3.bf16.msra.mxu0 %v6337_v45 }
 0xca0   : > { %5663 = vmatprep.subr.bf16.mxu1 %v6338_v46  ;;  %5685 = vmatprep.subr.bf16.mxu0 %v6339_v47 }
 0xca3   : > { %5664 = vmatpush3.bf16.msra.mxu1 %v6340_v48  ;;  %5686 = vmatpush3.bf16.msra.mxu0 %v6341_v50 }
 0xca4   : > { %5868 = vmatprep.subr.bf16.mxu0 %v7035_v22 }
 0xd59   : > { %v2855_v57 = vpop.f32.mrb[32].mxu1  ;;  %v2896_v58 = vpop.f32.mrb[24].mxu0 }
 0xd5a   : > { %v2856_v59 = vadd.f32 %v2855_v57, %v2644_v53  ;;  %v2897_v61 = vadd.f32 %v2896_v58, %v2652_v54  ;;  %v2857_v63 = vpop.f32.mrb[33].mxu1  ;;  %v2898_v1 = vpop.f32.mrb[25].mxu0 }
 0xd5b   : > { %v2858_v2 = vadd.f32 %v2857_v63, %v2648_v55  ;;  %v2899_v3 = vadd.f32 %v2898_v1, %v2656_v56  ;;  %v2859_v4 = vpop.f32.mrb[34].mxu1  ;;  %v2900_v5 = vpop.f32.mrb[26].mxu0 }
 0xd5c   : > { %v2903_v6 = vmul.f32 %v2856_v59, %v2856_v59  ;;  %v2905_v7 = vmul.f32 %v2897_v61, %v2897_v61  ;;  %v2860_v8 = vpop.f32.mrb[35].mxu1  ;;  %v2901_v11 = vpop.f32.mrb[27].mxu0  ;;  %v5425_v4 = vld [vmem:[#allocation13] ss:$0 sm:$0xff] }
 0xd5d   : > { %v2904_v12 = vmul.f32 %v2858_v2, %v2858_v2  ;;  %v2906_v13 = vmul.f32 %v2899_v3, %v2899_v3  ;;  %v6344_v8 = vld [vmem:[%s8059_s26 + $0x4] ss:$12 sps:$4 sm:$0xff]   ;;  %v6345_v11 = vld [vmem:[%s8059_s26 + $0x8] ss:$12 sps:$4 sm:$0xff]  }
 0xd5e   : > { %v2907_v14 = vmul.f32 %v2903_v6, %v2856_v59  ;;  %v2909_v15 = vmul.f32 %v2905_v7, %v2897_v61  ;;  %v6342_v7 = vld [vmem:[%s8059_s26] ss:$12 sps:$4 sm:$0xff]   ;;  %3493 = vmatprep.subr.bf16.mxu1 %v6344_v8 }
 0xd5f   : > { %v2908_v16 = vmul.f32 %v2904_v12, %v2858_v2  ;;  %v2910_v17 = vmul.f32 %v2906_v13, %v2899_v3  ;;  %v6348_v12 = vld [vmem:[%s8059_s26 + $0x1c] ss:$12 sps:$4 sm:$0xff]   ;;  %v6349_v13 = vld [vmem:[%s8059_s26 + $0x20] ss:$12 sps:$4 sm:$0xff]  }
 0xd60   : > { %v2911_v20 = vmul.f32 0.044715, %v2907_v14  ;;  %v2913_v21 = vmul.f32 0.044715, %v2909_v15  ;;  %v6346_v14 = vld [vmem:[%s8059_s26 + $0x18] ss:$12 sps:$4 sm:$0xff]  }
 0xd61   : > { %v2912_v24 = vmul.f32 0.044715, %v2908_v16  ;;  %v2914_v25 = vmul.f32 0.044715, %v2910_v17  ;;  %v6350_v15 = vld [vmem:[%s8059_s26 + $0x30] ss:$12 sps:$4 sm:$0xff]  }
 0xd62   : > { %v2915_v26 = vadd.f32 %v2911_v20, %v2856_v59  ;;  %v2917_v49 = vadd.f32 %v2913_v21, %v2897_v61 }
 0xd63   : > { %v2916_v27 = vadd.f32 %v2912_v24, %v2858_v2  ;;  %v2918_v29 = vadd.f32 %v2914_v25, %v2899_v3  ;;  %v6353_v24 = vld [vmem:[%s8059_s26 + $0x38] ss:$12 sps:$4 sm:$0xff]  }
 0xd64   : > { %v2919_v30 = vmul.f32 0.7978846, %v2915_v26  ;;  %v2921_v31 = vmul.f32 0.7978846, %v2917_v49  ;;  %v6356_v25 = vld [vmem:[%s8059_s26 + $0x4c] ss:$12 sps:$4 sm:$0xff]  }
 0xd65   : > { %v2920_v32 = vmul.f32 0.7978846, %v2916_v27  ;;  %v2922_v33 = vmul.f32 0.7978846, %v2918_v29  ;;  %v6354_v26 = vld [vmem:[%s8059_s26 + $0x48] ss:$12 sps:$4 sm:$0xff]  }
 0xd66   : > { %6490 = vtanh.f32 %v2919_v30  ;;  %v6357_v49 = vld [vmem:[%s8059_s26 + $0x50] ss:$12 sps:$4 sm:$0xff]   ;;  %v6358_v27 = vld [vmem:[%s8059_s26 + $0x60] ss:$12 sps:$4 sm:$0xff]   ;;  %v6361_v30 = vld [vmem:[%s8059_s26 + $0x68] ss:$12 sps:$4 sm:$0xff]  }
 0xd67   : > { %6492 = vtanh.f32 %v2921_v31  ;;  %v6360_v29 = vld [vmem:[%s8059_s26 + $0x64] ss:$12 sps:$4 sm:$0xff]   ;;  %v6364_v31 = vld [vmem:[%s8059_s26 + $0x7c] ss:$12 sps:$4 sm:$0xff]  }
 0xd68   : > { %6494 = vtanh.f32 %v2920_v32  ;;  %v6362_v32 = vld [vmem:[%s8059_s26 + $0x78] ss:$12 sps:$4 sm:$0xff]  }
 0xd69   : > { %6496 = vtanh.f32 %v2922_v33  ;;  %v6365_v33 = vld [vmem:[%s8059_s26 + $0x80] ss:$12 sps:$4 sm:$0xff]  }
 0xd70   : > { %v6491_v9 = vpop.eup %6490 }
 0xd71   : > { %v6493_v34 = vpop.eup %6492  ;;  %v2927_v19 = vadd.f32 1.0, %v6491_v9  ;;  %v6368_v9 = vld [vmem:[%s8059_s26 + $0x94] ss:$12 sps:$4 sm:$0xff]  }
 0xd72   : > { %v6495_v35 = vpop.eup %6494  ;;  %v2929_v36 = vadd.f32 1.0, %v6493_v34  ;;  %v6366_v34 = vld [vmem:[%s8059_s26 + $0x90] ss:$12 sps:$4 sm:$0xff]  }
 0xd73   : > { %v6497_v37 = vpop.eup %6496  ;;  %v2928_v38 = vadd.f32 1.0, %v6495_v35  ;;  %v2931_v39 = vmul.f32 0.5, %v2927_v19  ;;  %v6369_v19 = vld [vmem:[%s8059_s26 + $0x98] ss:$12 sps:$4 sm:$0xff]  }
 0xd74   : > { %v2930_v40 = vadd.f32 1.0, %v6497_v37  ;;  %v2933_v41 = vmul.f32 0.5, %v2929_v36  ;;  %v6372_v35 = vld [vmem:[%s8059_s26 + $0xac] ss:$12 sps:$4 sm:$0xff]   ;;  %v6370_v36 = vld [vmem:[%s8059_s26 + $0xa8] ss:$12 sps:$4 sm:$0xff]  }
 0xd75   : > { %v2932_v42 = vmul.f32 0.5, %v2928_v38  ;;  %v2935_v18 = vmul.f32 %v2931_v39, %v2856_v59  ;;  %v6373_v37 = vld [vmem:[%s8059_s26 + $0xb0] ss:$12 sps:$4 sm:$0xff]  }
 0xd76   : > { %v2934_v43 = vmul.f32 0.5, %v2930_v40  ;;  %v2937_v46 = vmul.f32 %v2933_v41, %v2897_v61 }
 0xd77   : > { %v2936_v45 = vmul.f32 %v2932_v42, %v2858_v2  ;;  %v3003_v51 = vpack.c.bf16 %v2935_v18, %v2935_v18  ;;  %v5426_v42 = vld [vmem:[#allocation15] ss:$0 sm:$0xff]  ;;  %v5427_v18 = vld [vmem:[#allocation16] ss:$0 sm:$0xff] }
 0xd78   : > { %v2938_v47 = vmul.f32 %v2934_v43, %v2899_v3  ;;  %v3005_v53 = vpack.c.bf16 %v2937_v46, %v2937_v46 }
 0xd79   : > { %v3004_v48 = vpack.c.bf16 %v2936_v45, %v2936_v45 }
 0xd7a   : > { %v3006_v50 = vpack.c.bf16 %v2938_v47, %v2938_v47 }
 0xd7b   : > { %3231 = vmatprep.mubr.bf16.mxu1 %v3004_v48  ;;  %v3348_v48 = vld [vmem:[#allocation18] sm:$0x7] }
 0xd7c   : > { %3271 = vmatprep.mubr.bf16.mxu0 %v3006_v50  ;;  %3232 = vmatmul.mubr.bf16.vlgmr.msra.gmra.mrb[36].mxu1 %v3003_v51  ;;  %v3357_v50 = vrot.slane %v3348_v48, %v7571_v60 }
 0xd7d   : > { %3272 = vmatmul.mubr.bf16.vlgmr.msra.gmra.mrb[28].mxu0 %v3005_v53  ;;  %3525 = vmatprep.mubr.bf16.mxu1 %v7036_v44 }
 0xd7e   : > { %5884 = vmatprep.mubr.msk.bf16.mxu0 %vm7037_vm3, %v7035_v22  ;;  %5869 = vmatpush3.bf16.msra.mxu0 %v6345_v11 }
 0xd7f   : > { %3494 = vmatpush1.bf16.msra.mxu1 %v6342_v7  ;;  %5870 = vmatprep.subr.bf16.mxu0 %v7035_v22 }
 0xd80   : > { %3495 = vmatprep.subr.bf16.mxu1 %v6348_v12 }
 0xd82   : > { %5871 = vmatpush3.bf16.msra.mxu0 %v6349_v13 }
 0xd83   : > { %3496 = vmatpush1.bf16.msra.mxu1 %v6346_v14  ;;  %5872 = vmatprep.subr.bf16.mxu0 %v7035_v22 }
 0xd86   : > { %5873 = vmatpush3.bf16.msra.mxu0 %v6353_v24 }
 0xd87   : > { %5874 = vmatprep.subr.bf16.mxu0 %v7035_v22 }
 0xd8a   : > { %5875 = vmatpush3.bf16.msra.mxu0 %v6357_v49 }
 0xd8b   : > { %5876 = vmatprep.subr.bf16.mxu0 %v7035_v22 }
 0xd8e   : > { %5877 = vmatpush3.bf16.msra.mxu0 %v6361_v30 }
 0xd8f   : > { %5878 = vmatprep.subr.bf16.mxu0 %v7035_v22 }
 0xd92   : > { %5879 = vmatpush3.bf16.msra.mxu0 %v6365_v33 }
 0xd93   : > { %5880 = vmatprep.subr.bf16.mxu0 %v7035_v22 }
 0xd96   : > { %5881 = vmatpush3.bf16.msra.mxu0 %v6369_v19 }
 0xd97   : > { %5882 = vmatprep.subr.bf16.mxu0 %v7035_v22 }
 0xd9a   : > { %5883 = vmatpush3.bf16.msra.mxu0 %v6373_v37 }
 0xd9b   : > { %5912 = vmatprep.subr.bf16.mxu0 %v7035_v22 }
 0xe4f   : > { %v5665_v54 = vpop.f32.mrb[36].mxu1 }
 0xe50   : > { %v5687_v55 = vpop.f32.mrb[28].mxu0  ;;  %v5666_v56 = vpop.f32.mrb[37].mxu1 }
 0xe51   : > { %v5667_v57 = vadd.f32 %v5666_v56, %v5665_v54  ;;  %v5688_v58 = vpop.f32.mrb[29].mxu0  ;;  %v5668_v59 = vpop.f32.mrb[38].mxu1  ;;  %v3361_v56 = vrot.slane %v3348_v48, %v7574_v62 }
 0xe52   : > { %v5689_v61 = vadd.f32 %v5688_v58, %v5687_v55  ;;  %v5690_v63 = vpop.f32.mrb[30].mxu0  ;;  %v5669_v1 = vpop.f32.mrb[39].mxu1 }
 0xe53   : > { %v5691_v2 = vpop.f32.mrb[31].mxu0  ;;  %v3353_v1 = vrot.slane %v3348_v48, %v7578_v0 }
 0xe54   : > { %v3274_v3 = vadd.f32 %v5689_v61, %v5667_v57 }
 0xe56   : > { %v3279_v5 = vadd.f32 %v3274_v3, %v7681_v28  ;;  %v6352_v28 = vld [vmem:[%s8059_s26 + $0x34] ss:$12 sps:$4 sm:$0xff]  }
 0xe57   : > { %3497 = vmatprep.subr.bf16.mxu1 %v6352_v28 }
 0xe58   : > { %v7760_v6 = vadd.f32 %v5425_v4, %v3279_v5  ;;  %3498 = vmatpush1.bf16.msra.mxu1 %v6350_v15 }
 0xe59   : > { %3499 = vmatprep.subr.bf16.mxu1 %v6356_v25 }
 0xe5a   : > { %3290 = vadd.xlane.f32.xlu0 %v7760_v6 }
 0xe5c   : > { %3500 = vmatpush1.bf16.msra.mxu1 %v6354_v26 }
 0xe5d   : > { %3501 = vmatprep.subr.bf16.mxu1 %v6360_v29 }
 0xe60   : > { %3502 = vmatpush1.bf16.msra.mxu1 %v6358_v27 }
 0xe61   : > { %3503 = vmatprep.subr.bf16.mxu1 %v6364_v31 }
 0xe64   : > { %3504 = vmatpush1.bf16.msra.mxu1 %v6362_v32 }
 0xe65   : > { %3505 = vmatprep.subr.bf16.mxu1 %v6368_v9 }
 0xe68   : > { %3506 = vmatpush1.bf16.msra.mxu1 %v6366_v34 }
 0xe69   : > { %3507 = vmatprep.subr.bf16.mxu1 %v6372_v35 }
 0xe6c   : > { %3508 = vmatpush1.bf16.msra.mxu1 %v6370_v36 }
 0xe6d   : > { %5888 = vmatprep.subr.bf16.mxu1 %v7035_v22 }
 0xee7   : > { %v3291_v16 = vpop.xlane.xlu0 %3290 }
 0xee8   : > { %v3292_v17 = vmul.f32 0.0078125, %v3291_v16 }
 0xeea   : > { %v3293_v20 = vsub.f32 %v7760_v6, %v3292_v17 }
 0xeec   : > { %v3294_v21 = vmul.f32 %v3293_v20, %v3293_v20 }
 0xeee   : > { %3295 = vadd.xlane.f32.xlu0 %v3294_v21 }
 0xf7b   : > { %v3296_v38 = vpop.xlane.xlu0 %3295 }
 0xf7c   : > { %v3297_v39 = vmul.f32 0.0078125, %v3296_v38 }
 0xf7e   : > { %v3298_v40 = vadd.f32 1e-06, %v3297_v39 }
 0xf80   : > { %6498 = vrsqrt.f32 %v3298_v40 }
 0xf8a   : > { %v6499_v41 = vpop.eup %6498 }
 0xf8b   : > { %v3300_v43 = vmul.f32 %v6499_v41, %v3293_v20 }
 0xf8d   : > { %v3307_v45 = vmul.f32 %v5426_v42, %v3300_v43 }
 0xf8f   : > { %v3314_v46 = vadd.f32 %v5427_v18, %v3307_v45 }
 0xf91   : > { %v3347_v47 = vpack.c.bf16 %v3314_v46, %v3314_v46 }
 0xf93   : > { %3526 = vmatmul.mubr.bf16.vlgmr.msra.gmra.mrb[40].mxu1 %v3347_v47  ;;  %5885 = vmatmul.mubr.bf16.vlgmr.msra.gmra.mrb[32].mxu0 %v3347_v47 }
 0xf94   : > { %5890 = vmatprep.mubr.msk.bf16.mxu1 %vm7037_vm3, %v7035_v22  ;;  %5914 = vmatprep.mubr.msk.bf16.mxu0 %vm7037_vm3, %v7035_v22 }
0x1066   : > { %v3527_v51 = vpop.f32.mrb[40].mxu1  ;;  %v3568_v53 = vpop.f32.mrb[32].mxu0 }
0x1067   : > { %v3529_v54 = vpop.f32.mrb[41].mxu1  ;;  %v5886_v55 = vpop.f32.mrb[33].mxu0  ;;  %v3569_v3 = vadd.f32 %v3568_v53, %v3361_v56  ;;  %v3528_v5 = vadd.f32 %v3527_v51, %v3353_v1 }
0x1068   : > { %v3530_v57 = vadd.f32 %v3529_v54, %v3357_v50  ;;  %v3531_v58 = vpop.f32.mrb[42].mxu1  ;;  %v3571_v59 = vpop.f32.mrb[34].mxu0 }
0x1069   : > { %v3532_v61 = vpop.f32.mrb[43].mxu1  ;;  %v5887_v63 = vpop.f32.mrb[35].mxu0  ;;  %v7806_v7 = vpack.c.bf16 %v3569_v3, %v3569_v3  ;;  %v3574_v8 = vpack.c.bf16 %v3528_v5, %v3528_v5 }
0x106a   : > { %v3575_v2 = vpack.c.bf16 %v3530_v57, %v3530_v57 }
0x106b   : > { %v3641_v11 = vsel %vm2065_vm5, %v7806_v7, 0 }
0x106c   : > { %v3580_v4 = vsel %vm1998_vm4, %v3575_v2, 0 }
0x106d   : > { %5889 = vmatpush3.bf16.xpose.msra.mxu1 %v3580_v4 }
0x106e   : > { %5894 = vmatprep.subr.bf16.mxu1 %v7035_v22 }
0x1074   : > { %5891 = vmatmul.mubr.msk.bf16.vlgmr.msra.gmra.mrb[44].mxu1 %vm1998_vm4, %v3574_v8 }
0x1075   : > { %5895 = vmatpush3.bf16.msra.mxu1 %v3641_v11  ;;  %5896 = vmatprep.mubr.msk.bf16.mxu1 %vm7037_vm3, %v7035_v22 }
0x1076   : > { %5900 = vmatprep.subr.bf16.mxu1 %v7035_v22 }
0x1147   : > { %v3616_v12 = vpop.f32.mrb[44].mxu1 }
0x1148   : > { %v3622_v13 = vmul.f32 0.17677669, %v3616_v12  ;;  %v5892_v14 = vpop.f32.mrb[45].mxu1 }
0x1149   : > { %v3619_v28 = vpop.f32.mrb[46].mxu1 }
0x114a   : > { %v5893_v15 = vpop.f32.mrb[47].mxu1  ;;  %v3623_v16 = vsel %vm2046_vm6, %v3622_v13, -1e+30 }
0x114b   : > { %v3624_v17 = vsel %vm2048_vm7, %v3623_v16, -inf }
0x114c   : > { %3625 = vmax.xlane.f32.xlu0 %v3624_v17 }
0x1162   : > { %3687 = vrot.lane.b32.xlu0 %v3575_v2, %s7038_s23 }
0x1166   : > { %3912 = vrot.lane.b32.xlu0 %v3575_v2, %s7039_s10 }
0x11d9   : > { %v3626_v20 = vpop.xlane.xlu0 %3625 }
0x11da   : > { %v3627_v21 = vsub.f32 %v3623_v16, %v3626_v20 }
0x11dc   : > { %v3628_v24 = vmul.f32 1.442695, %v3627_v21 }
0x11dd   : > { %v3688_v29 = vpop.permute.xlu0 %3687 }
0x11de   : > { %6500 = vpow2.f32 %v3628_v24  ;;  %v3693_v19 = vsel %vm1998_vm4, %v3688_v29, 0 }
0x11e1   : > { %v3913_v9 = vpop.permute.xlu0 %3912 }
0x11e2   : > { %v3918_v36 = vsel %vm1998_vm4, %v3913_v9, 0 }
0x11e8   : > { %v6501_v25 = vpop.eup %6500 }
0x11e9   : > { %v3630_v26 = vsel %vm2048_vm7, %v6501_v25, 0.0 }
0x11ea   : > { %3631 = vadd.xlane.f32.xlu1 %v3630_v26 }
0x11fb   : > { %3684 = vrot.lane.b32.xlu1 %v3574_v8, %s7038_s23 }
0x11ff   : > { %3800 = vrot.lane.b32.xlu1 %v3575_v2, %s7040_s15 }
0x1203   : > { %3798 = vrot.lane.b32.xlu1 %v3574_v8, %s7040_s15 }
0x1207   : > { %3910 = vrot.lane.b32.xlu1 %v3574_v8, %s7039_s10 }
0x1277   : > { %v3632_v49 = vpop.xlane.xlu1 %3631 }
0x1278   : > { %6502 = vrcp.f32 %v3632_v49 }
0x127b   : > { %v3685_v27 = vpop.permute.xlu1 %3684 }
0x127f   : > { %v3801_v30 = vpop.permute.xlu1 %3800 }
0x1280   : > { %v3806_v31 = vsel %vm1998_vm4, %v3801_v30, 0 }
0x1281   : > { %5913 = vmatpush3.bf16.xpose.msra.mxu0 %v3806_v31 }
0x1282   : > { %v6503_v32 = vpop.eup %6502  ;;  %5924 = vmatprep.subr.bf16.mxu0 %v7035_v22 }
0x1283   : > { %v3634_v33 = vmul.f32 %v6503_v32, %v6501_v25  ;;  %v3799_v35 = vpop.permute.xlu1 %3798 }
0x1285   : > { %v3636_v34 = vpack.c.bf16 %v3634_v33, %v3634_v33 }
0x1287   : > { %5897 = vmatmul.mubr.msk.bf16.vlgmr.msra.gmra.mrb[48].mxu1 %vm2048_vm7, %v3636_v34  ;;  %v3911_v37 = vpop.permute.xlu1 %3910 }
0x1288   : > { %5901 = vmatpush3.bf16.xpose.msra.mxu1 %v3693_v19  ;;  %5915 = vmatmul.mubr.msk.bf16.vlgmr.msra.gmra.mrb[36].mxu0 %vm1998_vm4, %v3799_v35 }
0x1289   : > { %5925 = vmatpush3.bf16.xpose.msra.mxu0 %v3918_v36  ;;  %5902 = vmatprep.mubr.msk.bf16.mxu1 %vm7037_vm3, %v7035_v22 }
0x128a   : > { %5926 = vmatprep.mubr.msk.bf16.mxu0 %vm7037_vm3, %v7035_v22  ;;  %5906 = vmatprep.subr.bf16.mxu1 %v7035_v22 }
0x128b   : > { %5936 = vmatprep.subr.bf16.mxu0 %v7035_v22 }
0x128f   : > { %5903 = vmatmul.mubr.msk.bf16.vlgmr.msra.gmra.mrb[52].mxu1 %vm1998_vm4, %v3685_v27 }
0x1290   : > { %5927 = vmatmul.mubr.msk.bf16.vlgmr.msra.gmra.mrb[40].mxu0 %vm1998_vm4, %v3911_v37  ;;  %5908 = vmatprep.mubr.msk.bf16.mxu1 %vm7037_vm3, %v7035_v22 }
0x1291   : > { %5952 = vmatprep.mubr.msk.bf16.mxu0 %vm7037_vm3, %v7035_v22 }
0x135a   : > { %v7842_v38 = vpop.f32.mrb[48].mxu1 }
0x135b   : > { %v5898_v39 = vpop.f32.mrb[49].mxu1  ;;  %v3842_v40 = vpop.f32.mrb[36].mxu0 }
0x135c   : > { %v3848_v41 = vmul.f32 0.17677669, %v3842_v40  ;;  %v3680_v42 = vpop.f32.mrb[50].mxu1  ;;  %v5916_v43 = vpop.f32.mrb[37].mxu0 }
0x135d   : > { %v5899_v18 = vpop.f32.mrb[51].mxu1  ;;  %v3845_v45 = vpop.f32.mrb[38].mxu0  ;;  %v6375_v42 = vld [vmem:[%s8060_s22 + $0x8] sm:$0xff]   ;;  %v6376_v43 = vld [vmem:[%s8060_s22 + $0x10] sm:$0xff]  }
0x135e   : > { %v5917_v46 = vpop.f32.mrb[39].mxu0  ;;  %v3849_v47 = vsel %vm2046_vm6, %v3848_v41, -1e+30  ;;  %v6374_v41 = vld [vmem:[%s8060_s22] sm:$0xff]   ;;  %v6377_v18 = vld [vmem:[%s8060_s22 + $0x18] sm:$0xff]  }
0x135f   : > { %v3850_v48 = vsel %vm2048_vm7, %v3849_v47, -inf  ;;  %5937 = vmatpush3.bf16.msra.mxu0 %v6374_v41  ;;  %v6378_v45 = vld [vmem:[%s8060_s22 + $0x20] sm:$0xff]   ;;  %v6379_v46 = vld [vmem:[%s8060_s22 + $0x28] sm:$0xff]  }
0x1360   : > { %3851 = vmax.xlane.f32.xlu1 %v3850_v48  ;;  %5938 = vmatprep.subr.bf16.mxu0 %v7035_v22 }
0x1362   : > { %v3729_v50 = vpop.f32.mrb[52].mxu1 }
0x1363   : > { %v3735_v51 = vmul.f32 0.17677669, %v3729_v50  ;;  %v5904_v53 = vpop.f32.mrb[53].mxu1  ;;  %v3954_v54 = vpop.f32.mrb[40].mxu0  ;;  %5939 = vmatpush3.bf16.msra.mxu0 %v6375_v42 }
0x1364   : > { %v3960_v55 = vmul.f32 0.17677669, %v3954_v54  ;;  %v3732_v56 = vpop.f32.mrb[54].mxu1  ;;  %v5928_v57 = vpop.f32.mrb[41].mxu0  ;;  %5940 = vmatprep.subr.bf16.mxu0 %v7035_v22  ;;  %v6381_v54 = vld [vmem:[%s8060_s22 + $0x38] sm:$0xff]  }
0x1365   : > { %v5905_v58 = vpop.f32.mrb[55].mxu1  ;;  %v3957_v59 = vpop.f32.mrb[42].mxu0  ;;  %v3736_v61 = vsel %vm2046_vm6, %v3735_v51, -1e+30 }
0x1366   : > { %v5929_v63 = vpop.f32.mrb[43].mxu0  ;;  %v3737_v1 = vsel %vm2048_vm7, %v3736_v61, -inf  ;;  %v3961_v2 = vsel %vm2046_vm6, %v3960_v55, -1e+30 }
0x1367   : > { %3738 = vmax.xlane.f32.xlu0 %v3737_v1  ;;  %v3962_v3 = vsel %vm2048_vm7, %v3961_v2, -inf  ;;  %5941 = vmatpush3.bf16.msra.mxu0 %v6376_v43 }
0x1368   : > { %5942 = vmatprep.subr.bf16.mxu0 %v7035_v22 }
0x136b   : > { %3963 = vmax.xlane.f32.xlu0 %v3962_v3  ;;  %5943 = vmatpush3.bf16.msra.mxu0 %v6377_v18 }
0x136c   : > { %5944 = vmatprep.subr.bf16.mxu0 %v7035_v22 }
0x136f   : > { %5945 = vmatpush3.bf16.msra.mxu0 %v6378_v45 }
0x1370   : > { %5946 = vmatprep.subr.bf16.mxu0 %v7035_v22 }
0x1373   : > { %5947 = vmatpush3.bf16.msra.mxu0 %v6379_v46 }
0x1374   : > { %5948 = vmatprep.subr.bf16.mxu0 %v7035_v22 }
0x13ed   : > { %v3852_v4 = vpop.xlane.xlu1 %3851 }
0x13ee   : > { %v3853_v5 = vsub.f32 %v3849_v47, %v3852_v4  ;;  %v6380_v47 = vld [vmem:[%s8060_s22 + $0x30] sm:$0xff]  }
0x13ef   : > { %5949 = vmatpush3.bf16.msra.mxu0 %v6380_v47 }
0x13f0   : > { %v3854_v8 = vmul.f32 1.442695, %v3853_v5  ;;  %5950 = vmatprep.subr.bf16.mxu0 %v7035_v22 }
0x13f2   : > { %6504 = vpow2.f32 %v3854_v8 }
0x13f3   : > { %5951 = vmatpush3.bf16.msra.mxu0 %v6381_v54 }
0x13f4   : > { %v3739_v11 = vpop.xlane.xlu0 %3738 }
0x13f5   : > { %v3740_v12 = vsub.f32 %v3736_v61, %v3739_v11 }
0x13f7   : > { %v3741_v13 = vmul.f32 1.442695, %v3740_v12 }
0x13f8   : > { %v3964_v14 = vpop.xlane.xlu0 %3963 }
0x13f9   : > { %6506 = vpow2.f32 %v3741_v13  ;;  %v3965_v28 = vsub.f32 %v3961_v2, %v3964_v14  ;;  %v5468_v14 = vld [vmem:[#allocation19] ss:$0 sm:$0xff] }
0x13fb   : > { %v3966_v15 = vmul.f32 1.442695, %v3965_v28 }
0x13fc   : > { %v6505_v16 = vpop.eup %6504 }
0x13fd   : > { %6508 = vpow2.f32 %v3966_v15  ;;  %v3856_v17 = vsel %vm2048_vm7, %v6505_v16, 0.0 }
0x13fe   : > { %3857 = vadd.xlane.f32.xlu0 %v3856_v17 }
0x1403   : > { %v6507_v23 = vpop.eup %6506 }
0x1404   : > { %v3743_v20 = vsel %vm2048_vm7, %v6507_v23, 0.0 }
0x1405   : > { %3744 = vadd.xlane.f32.xlu0 %v3743_v20 }
0x1407   : > { %v6509_v21 = vpop.eup %6508 }
0x1408   : > { %v3968_v24 = vsel %vm2048_vm7, %v6509_v21, 0.0 }
0x1409   : > { %3969 = vadd.xlane.f32.xlu1 %v3968_v24 }
0x141a   : > { %3862 = vrot.lane.b32.xlu1 %v7806_v7, %s7040_s15 }
0x141b   : > { %3750 = vrot.lane.b32.xlu0 %v7806_v7, %s7038_s23 }
0x141e   : > { %3974 = vrot.lane.b32.xlu1 %v7806_v7, %s7039_s10 }
0x148b   : > { %v3858_v25 = vpop.xlane.xlu0 %3857 }
0x1492   : > { %v3745_v26 = vpop.xlane.xlu0 %3744 }
0x1493   : > { %6510 = vrcp.f32 %v3745_v26 }
0x1494   : > { %6512 = vrcp.f32 %v3858_v25 }
0x1496   : > { %v3751_v49 = vpop.permute.xlu0 %3750  ;;  %v3970_v29 = vpop.xlane.xlu1 %3969 }
0x1497   : > { %v3756_v27 = vsel %vm2065_vm5, %v3751_v49, 0  ;;  %6514 = vrcp.f32 %v3970_v29 }
0x1498   : > { %5907 = vmatpush3.bf16.msra.mxu1 %v3756_v27 }
0x1499   : > { %5918 = vmatprep.subr.bf16.mxu1 %v7035_v22 }
0x149a   : > { %v3863_v32 = vpop.permute.xlu1 %3862 }
0x149b   : > { %v3868_v34 = vsel %vm2065_vm5, %v3863_v32, 0 }
0x149d   : > { %v6511_v30 = vpop.eup %6510 }
0x149e   : > { %v3747_v31 = vmul.f32 %v6511_v30, %v6507_v23  ;;  %v6513_v9 = vpop.eup %6512  ;;  %v3975_v19 = vpop.permute.xlu1 %3974 }
0x149f   : > { %v3860_v7 = vmul.f32 %v6513_v9, %v6505_v16  ;;  %v3980_v37 = vsel %vm2065_vm5, %v3975_v19, 0 }
0x14a0   : > { %v3748_v33 = vpack.c.bf16 %v3747_v31, %v3747_v31 }
0x14a1   : > { %v3861_v35 = vpack.c.bf16 %v3860_v7, %v3860_v7  ;;  %v6515_v36 = vpop.eup %6514 }
0x14a2   : > { %5909 = vmatmul.mubr.msk.bf16.vlgmr.msra.gmra.mrb[56].mxu1 %vm2048_vm7, %v3748_v33  ;;  %v3972_v39 = vmul.f32 %v6515_v36, %v6509_v21 }
0x14a3   : > { %5919 = vmatpush3.bf16.msra.mxu1 %v3868_v34  ;;  %5920 = vmatprep.mubr.msk.bf16.mxu1 %vm7037_vm3, %v7035_v22 }
0x14a4   : > { %5930 = vmatprep.subr.bf16.mxu1 %v7035_v22  ;;  %v3973_v40 = vpack.c.bf16 %v3972_v39, %v3972_v39 }
0x14aa   : > { %5921 = vmatmul.mubr.msk.bf16.vlgmr.msra.gmra.mrb[60].mxu1 %vm2048_vm7, %v3861_v35 }
0x14ab   : > { %5931 = vmatpush3.bf16.msra.mxu1 %v3980_v37  ;;  %5932 = vmatprep.mubr.msk.bf16.mxu1 %vm7037_vm3, %v7035_v22 }
0x14b2   : > { %5933 = vmatmul.mubr.msk.bf16.vlgmr.msra.gmra.mrb[64].mxu1 %vm2048_vm7, %v3973_v40 }
0x14b3   : > { %4425 = vmatprep.mubr.bf16.mxu1 %v7036_v44 }
0x1575   : > { %v3792_v48 = vpop.f32.mrb[56].mxu1 }
0x1576   : > { %4023 = vrot.lane.b32.xlu1 %v3792_v48, %s7039_s10  ;;  %v5910_v50 = vpop.f32.mrb[57].mxu1  ;;  %s8061_s10 = sld [smem:[#allocation43_spill]] }
0x1577   : > { %v3795_v51 = vpop.f32.mrb[58].mxu1 }
0x1578   : > { %v5911_v53 = vpop.f32.mrb[59].mxu1 }
0x157c   : > { %v6382_v23 = vld [vmem:[%s8061_s10] ss:$16 sps:$4 sm:$0xff]   ;;  %v6384_v20 = vld [vmem:[%s8061_s10 + $0x4] ss:$16 sps:$4 sm:$0xff]   ;;  %v6385_v21 = vld [vmem:[%s8061_s10 + $0x8] ss:$16 sps:$4 sm:$0xff]  }
0x157d   : > { %v3904_v55 = vpop.f32.mrb[60].mxu1  ;;  %v6390_v24 = vld [vmem:[%s8061_s10 + $0x24] ss:$16 sps:$4 sm:$0xff]   ;;  %4393 = vmatprep.subr.bf16.mxu1 %v6384_v20  ;;  %v6393_v25 = vld [vmem:[%s8061_s10 + $0x2c] ss:$16 sps:$4 sm:$0xff]  }
0x157e   : > { %4027 = vrot.lane.b32.xlu0 %v3904_v55, %s7040_s15  ;;  %v5922_v56 = vpop.f32.mrb[61].mxu1  ;;  %4394 = vmatpush1.bf16.msra.mxu1 %v6382_v23  ;;  %v6391_v26 = vld [vmem:[%s8061_s10 + $0x28] ss:$16 sps:$4 sm:$0xff]   ;;  %v6396_v49 = vld [vmem:[%s8061_s10 + $0x44] ss:$16 sps:$4 sm:$0xff]   ;;  %s8063_s15 = sld [smem:[#allocation44_spill]] }
0x157f   : > { %v3907_v57 = vpop.f32.mrb[62].mxu1  ;;  %4395 = vmatprep.subr.bf16.mxu1 %v6390_v24  ;;  %v6399_v27 = vld [vmem:[%s8061_s10 + $0x4c] ss:$16 sps:$4 sm:$0xff]   ;;  %v6394_v29 = vld [vmem:[%s8061_s10 + $0x40] ss:$16 sps:$4 sm:$0xff]  }
0x1580   : > { %v5923_v58 = vpop.f32.mrb[63].mxu1  ;;  %v6397_v30 = vld [vmem:[%s8061_s10 + $0x48] ss:$16 sps:$4 sm:$0xff]   ;;  %v6402_v34 = vld [vmem:[%s8061_s10 + $0x64] ss:$16 sps:$4 sm:$0xff]  }
0x1581   : > { %v6405_v7 = vld [vmem:[%s8061_s10 + $0x6c] ss:$16 sps:$4 sm:$0xff]   ;;  %v6400_v19 = vld [vmem:[%s8061_s10 + $0x60] ss:$16 sps:$4 sm:$0xff]   ;;  %v6403_v35 = vld [vmem:[%s8061_s10 + $0x68] ss:$16 sps:$4 sm:$0xff]  }
0x1582   : > { %v6408_v36 = vld [vmem:[%s8061_s10 + $0x84] ss:$16 sps:$4 sm:$0xff]   ;;  %v6411_v37 = vld [vmem:[%s8061_s10 + $0x8c] ss:$16 sps:$4 sm:$0xff]   ;;  %v6406_v39 = vld [vmem:[%s8061_s10 + $0x80] ss:$16 sps:$4 sm:$0xff]  }
0x1583   : > { %v6409_v40 = vld [vmem:[%s8061_s10 + $0x88] ss:$16 sps:$4 sm:$0xff]   ;;  %v6414_v41 = vld [vmem:[%s8061_s10 + $0xa4] ss:$16 sps:$4 sm:$0xff]   ;;  %v6417_v42 = vld [vmem:[%s8061_s10 + $0xac] ss:$16 sps:$4 sm:$0xff]  }
0x1584   : > { %v6412_v43 = vld [vmem:[%s8061_s10 + $0xa0] ss:$16 sps:$4 sm:$0xff]   ;;  %v6415_v18 = vld [vmem:[%s8061_s10 + $0xa8] ss:$16 sps:$4 sm:$0xff]   ;;  %v6420_v45 = vld [vmem:[%s8061_s10 + $0xc4] ss:$16 sps:$4 sm:$0xff]  }
0x1585   : > { %v4016_v59 = vpop.f32.mrb[64].mxu1  ;;  %v6423_v46 = vld [vmem:[%s8061_s10 + $0xcc] ss:$16 sps:$4 sm:$0xff]   ;;  %v6418_v47 = vld [vmem:[%s8061_s10 + $0xc0] ss:$16 sps:$4 sm:$0xff]  }
0x1586   : > { %4031 = vrot.lane.b32.xlu1 %v4016_v59, %s7038_s23  ;;  %v5934_v61 = vpop.f32.mrb[65].mxu1  ;;  %v6421_v48 = vld [vmem:[%s8061_s10 + $0xc8] ss:$16 sps:$4 sm:$0xff]   ;;  %v6426_v50 = vld [vmem:[%s8061_s10 + $0xe4] ss:$16 sps:$4 sm:$0xff]   ;;  %s8062_s23 = sld [smem:[#allocation45_spill]] }
0x1587   : > { %v4019_v63 = vpop.f32.mrb[66].mxu1  ;;  %v6429_v51 = vld [vmem:[%s8061_s10 + $0xec] ss:$16 sps:$4 sm:$0xff]   ;;  %v6424_v53 = vld [vmem:[%s8061_s10 + $0xe0] ss:$16 sps:$4 sm:$0xff]  }
0x1588   : > { %v5935_v1 = vpop.f32.mrb[67].mxu1  ;;  %v6427_v54 = vld [vmem:[%s8061_s10 + $0xe8] ss:$16 sps:$4 sm:$0xff]   ;;  %v5469_v59 = vld [vmem:[#allocation21] ss:$0 sm:$0xff] }
0x1589   : > { %v5470_v63 = vld [vmem:[#allocation22] ss:$0 sm:$0xff] }
0x158c   : > { %v6441_v23 = vld [vmem:[%s8062_s23 + $0x90] sm:$0xff]   ;;  %v6442_v20 = vld [vmem:[%s8062_s23 + $0x58] sm:$0xff]  }
0x158d   : > { %v6445_v24 = vld [vmem:[%s8062_s23 + $0x98] sm:$0xff]  }
0x15e8   : > { %v4024_v2 = vpop.permute.xlu1 %4023 }
0x15e9   : > { %v4034_v4 = vsel %vm1998_vm4, %v7842_v38, %v4024_v2 }
0x15f0   : > { %v4028_v3 = vpop.permute.xlu0 %4027 }
0x15f1   : > { %v4035_v5 = vsel %vm2461_vm8, %v4034_v4, %v4028_v3  ;;  %v6430_v4 = vld [vmem:[%s8062_s23 + $0x40] sm:$0xff]  }
0x15f8   : > { %v4032_v8 = vpop.permute.xlu1 %4031 }
0x15f9   : > { %v4036_v11 = vsel %vm2463_vm9, %v4035_v5, %v4032_v8  ;;  %v6431_v5 = vld [vmem:[%s8062_s23 + $0xc0] sm:$0xff]  }
0x15fa   : > { %v4053_v12 = vpack.c.bf16 %v4036_v11, %v4036_v11  ;;  %v6432_v8 = vld [vmem:[%s8062_s23] sm:$0xff]  }
0x15fb   : > { %v6433_v11 = vld [vmem:[%s8062_s23 + $0x80] sm:$0xff]  }
0x15fc   : > { %5953 = vmatmul.mubr.bf16.vlgmr.msra.gmra.mrb[44].mxu0 %v4053_v12  ;;  %v6434_v12 = vld [vmem:[%s8062_s23 + $0x48] sm:$0xff]  }
0x15fd   : > { %4466 = vmatprep.mubr.bf16.mxu0 %v7036_v44  ;;  %v6387_v44 = vld [vmem:[%s8061_s10 + $0xc] ss:$16 sps:$4 sm:$0xff]  }
0x15fe   : > { %4434 = vmatprep.subr.bf16.mxu0 %v6387_v44  ;;  %v6444_v44 = vld [vmem:[%s8062_s23 + $0x18] sm:$0xff]  }
0x15ff   : > { %4435 = vmatpush1.bf16.msra.mxu0 %v6385_v21  ;;  %v6443_v21 = vld [vmem:[%s8062_s23 + $0xd8] sm:$0xff]  }
0x1600   : > { %4436 = vmatprep.subr.bf16.mxu0 %v6393_v25  ;;  %v6446_v25 = vld [vmem:[%s8062_s23 + $0x60] sm:$0xff]  }
0x1603   : > { %4437 = vmatpush1.bf16.msra.mxu0 %v6391_v26  ;;  %v6448_v26 = vld [vmem:[%s8062_s23 + $0x20] sm:$0xff]  }
0x1604   : > { %4438 = vmatprep.subr.bf16.mxu0 %v6399_v27  ;;  %v6450_v27 = vld [vmem:[%s8062_s23 + $0x68] sm:$0xff]  }
0x1607   : > { %4439 = vmatpush1.bf16.msra.mxu0 %v6397_v30  ;;  %v6452_v30 = vld [vmem:[%s8062_s23 + $0x28] sm:$0xff]  }
0x1608   : > { %4440 = vmatprep.subr.bf16.mxu0 %v6405_v7  ;;  %v6458_v7 = vld [vmem:[%s8062_s23 + $0x78] sm:$0xff]  }
0x160b   : > { %4441 = vmatpush1.bf16.msra.mxu0 %v6403_v35  ;;  %v6460_v35 = vld [vmem:[%s8062_s23 + $0x38] sm:$0xff]  }
0x160c   : > { %4442 = vmatprep.subr.bf16.mxu0 %v6411_v37  ;;  %v4211_v37 = vld [vmem:[%s8063_s15] sm:$0xf]  ;;  %s8064_s15 = sld [smem:[#allocation47_spill]] }
0x160f   : > { %4443 = vmatpush1.bf16.msra.mxu0 %v6409_v40  ;;  %v4224_v40 = vrot.slane %v4211_v37, %v7574_v62 }
0x1610   : > { %4444 = vmatprep.subr.bf16.mxu0 %v6417_v42  ;;  %v4228_v42 = vrot.slane %v4211_v37, %v2655_v52 }
0x1613   : > { %4445 = vmatpush1.bf16.msra.mxu0 %v6415_v18 }
0x1614   : > { %4446 = vmatprep.subr.bf16.mxu0 %v6423_v46 }
0x1617   : > { %4447 = vmatpush1.bf16.msra.mxu0 %v6421_v48 }
0x1618   : > { %4448 = vmatprep.subr.bf16.mxu0 %v6429_v51 }
0x161b   : > { %4449 = vmatpush1.bf16.msra.mxu0 %v6427_v54 }
0x161c   : > { %5749 = vmatprep.subr.bf16.mxu0 %v6431_v5 }
0x16cf   : > { %v4136_v13 = vpop.f32.mrb[44].mxu0 }
0x16d0   : > { %v4142_v28 = vadd.f32 %v4136_v13, %v7760_v6  ;;  %v5954_v38 = vpop.f32.mrb[45].mxu0  ;;  %v6388_v6 = vld [vmem:[%s8061_s10 + $0x20] ss:$16 sps:$4 sm:$0xff]   ;;  %v6435_v13 = vld [vmem:[%s8062_s23 + $0xc8] sm:$0xff]  }
0x16d1   : > { %v4139_v15 = vpop.f32.mrb[46].mxu0  ;;  %4396 = vmatpush1.bf16.msra.mxu1 %v6388_v6  ;;  %v6438_v38 = vld [vmem:[%s8062_s23 + $0x50] sm:$0xff]   ;;  %v6447_v6 = vld [vmem:[%s8062_s23 + $0xe0] sm:$0xff]  }
0x16d2   : > { %v7899_v16 = vadd.f32 %v5468_v14, %v4142_v28  ;;  %v5955_v17 = vpop.f32.mrb[47].mxu0  ;;  %4397 = vmatprep.subr.bf16.mxu1 %v6396_v49  ;;  %v6436_v14 = vld [vmem:[%s8062_s23 + $0x8] sm:$0xff]   ;;  %v6439_v15 = vld [vmem:[%s8062_s23 + $0xd0] sm:$0xff]   ;;  %v6449_v49 = vld [vmem:[%s8062_s23 + $0xa0] sm:$0xff]  }
0x16d3   : > { %v6437_v28 = vld [vmem:[%s8062_s23 + $0x88] sm:$0xff]   ;;  %v6440_v17 = vld [vmem:[%s8062_s23 + $0x10] sm:$0xff]  }
0x16d4   : > { %4153 = vadd.xlane.f32.xlu0 %v7899_v16 }
0x16d5   : > { %4398 = vmatpush1.bf16.msra.mxu1 %v6394_v29  ;;  %v6451_v29 = vld [vmem:[%s8062_s23 + $0xe8] sm:$0xff]  }
0x16d6   : > { %4399 = vmatprep.subr.bf16.mxu1 %v6402_v34  ;;  %v6457_v34 = vld [vmem:[%s8062_s23 + $0xb0] sm:$0xff]  }
0x16d9   : > { %4400 = vmatpush1.bf16.msra.mxu1 %v6400_v19  ;;  %v6459_v19 = vld [vmem:[%s8062_s23 + $0xf8] sm:$0xff]  }
0x16da   : > { %4401 = vmatprep.subr.bf16.mxu1 %v6408_v36  ;;  %v6461_v36 = vld [vmem:[%s8062_s23 + $0xb8] sm:$0xff]  }
0x16dd   : > { %4402 = vmatpush1.bf16.msra.mxu1 %v6406_v39  ;;  %v4216_v39 = vrot.slane %v4211_v37, %v7578_v0 }
0x16de   : > { %4403 = vmatprep.subr.bf16.mxu1 %v6414_v41  ;;  %v4220_v41 = vrot.slane %v4211_v37, %v7571_v60 }
0x16e1   : > { %4404 = vmatpush1.bf16.msra.mxu1 %v6412_v43 }
0x16e2   : > { %4405 = vmatprep.subr.bf16.mxu1 %v6420_v45 }
0x16e5   : > { %4406 = vmatpush1.bf16.msra.mxu1 %v6418_v47 }
0x16e6   : > { %4407 = vmatprep.subr.bf16.mxu1 %v6426_v50 }
0x16e9   : > { %4408 = vmatpush1.bf16.msra.mxu1 %v6424_v53 }
0x16ea   : > { %5727 = vmatprep.subr.bf16.mxu1 %v6430_v4 }
0x1761   : > { %v4154_v31 = vpop.xlane.xlu0 %4153 }
0x1762   : > { %v4155_v32 = vmul.f32 0.0078125, %v4154_v31  ;;  %v6453_v31 = vld [vmem:[%s8062_s23 + $0xa8] sm:$0xff]  }
0x1764   : > { %v4156_v33 = vsub.f32 %v7899_v16, %v4155_v32  ;;  %v6454_v32 = vld [vmem:[%s8062_s23 + $0x70] sm:$0xff]  }
0x1766   : > { %v4157_v9 = vmul.f32 %v4156_v33, %v4156_v33 }
0x1768   : > { %4158 = vadd.xlane.f32.xlu1 %v4157_v9  ;;  %v6456_v9 = vld [vmem:[%s8062_s23 + $0x30] sm:$0xff]  }
0x17f5   : > { %v4159_v55 = vpop.xlane.xlu1 %4158 }
0x17f6   : > { %v4160_v56 = vmul.f32 0.0078125, %v4159_v55 }
0x17f8   : > { %v4161_v57 = vadd.f32 1e-06, %v4160_v56 }
0x17fa   : > { %6516 = vrsqrt.f32 %v4161_v57 }
0x1804   : > { %v6517_v58 = vpop.eup %6516 }
0x1805   : > { %v4163_v61 = vmul.f32 %v6517_v58, %v4156_v33  ;;  %v6455_v33 = vld [vmem:[%s8062_s23 + $0xf0] sm:$0xff]  }
0x1807   : > { %v4170_v1 = vmul.f32 %v5469_v59, %v4163_v61 }
0x1809   : > { %v4177_v2 = vadd.f32 %v5470_v63, %v4170_v1 }
0x180b   : > { %v4210_v3 = vpack.c.bf16 %v4177_v2, %v4177_v2 }
0x180d   : > { %4426 = vmatmul.mubr.bf16.vlgmr.msra.gmra.mrb[68].mxu1 %v4210_v3  ;;  %4467 = vmatmul.mubr.bf16.vlgmr.msra.gmra.mrb[48].mxu0 %v4210_v3 }
0x180e   : > { %5728 = vmatpush3.bf16.msra.mxu1 %v6432_v8  ;;  %5750 = vmatpush3.bf16.msra.mxu0 %v6433_v11 }
0x180f   : > { %5729 = vmatprep.subr.bf16.mxu1 %v6434_v12  ;;  %5751 = vmatprep.subr.bf16.mxu0 %v6435_v13 }
0x1812   : > { %5730 = vmatpush3.bf16.msra.mxu1 %v6436_v14  ;;  %5752 = vmatpush3.bf16.msra.mxu0 %v6437_v28 }
0x1813   : > { %5731 = vmatprep.subr.bf16.mxu1 %v6438_v38  ;;  %5753 = vmatprep.subr.bf16.mxu0 %v6439_v15 }
0x1816   : > { %5732 = vmatpush3.bf16.msra.mxu1 %v6440_v17  ;;  %5754 = vmatpush3.bf16.msra.mxu0 %v6441_v23 }
0x1817   : > { %5733 = vmatprep.subr.bf16.mxu1 %v6442_v20  ;;  %5755 = vmatprep.subr.bf16.mxu0 %v6443_v21 }
0x181a   : > { %5734 = vmatpush3.bf16.msra.mxu1 %v6444_v44  ;;  %5756 = vmatpush3.bf16.msra.mxu0 %v6445_v24 }
0x181b   : > { %5735 = vmatprep.subr.bf16.mxu1 %v6446_v25  ;;  %5757 = vmatprep.subr.bf16.mxu0 %v6447_v6 }
0x181e   : > { %5736 = vmatpush3.bf16.msra.mxu1 %v6448_v26  ;;  %5758 = vmatpush3.bf16.msra.mxu0 %v6449_v49 }
0x181f   : > { %5737 = vmatprep.subr.bf16.mxu1 %v6450_v27  ;;  %5759 = vmatprep.subr.bf16.mxu0 %v6451_v29 }
0x1822   : > { %5738 = vmatpush3.bf16.msra.mxu1 %v6452_v30  ;;  %5760 = vmatpush3.bf16.msra.mxu0 %v6453_v31 }
0x1823   : > { %5739 = vmatprep.subr.bf16.mxu1 %v6454_v32  ;;  %5761 = vmatprep.subr.bf16.mxu0 %v6455_v33 }
0x1826   : > { %5740 = vmatpush3.bf16.msra.mxu1 %v6456_v9  ;;  %5762 = vmatpush3.bf16.msra.mxu0 %v6457_v34 }
0x1827   : > { %5741 = vmatprep.subr.bf16.mxu1 %v6458_v7  ;;  %5763 = vmatprep.subr.bf16.mxu0 %v6459_v19 }
0x182a   : > { %5742 = vmatpush3.bf16.msra.mxu1 %v6460_v35  ;;  %5764 = vmatpush3.bf16.msra.mxu0 %v6461_v36 }
0x182b   : > { %5956 = vmatprep.subr.bf16.mxu1 %v7035_v22 }
0x18e0   : > { %v4427_v43 = vpop.f32.mrb[68].mxu1  ;;  %v4468_v18 = vpop.f32.mrb[48].mxu0 }
0x18e1   : > { %v4428_v45 = vadd.f32 %v4427_v43, %v4216_v39  ;;  %v4469_v46 = vadd.f32 %v4468_v18, %v4224_v40  ;;  %v4429_v47 = vpop.f32.mrb[69].mxu1  ;;  %v4470_v48 = vpop.f32.mrb[49].mxu0  ;;  %v5535_v18 = vld [vmem:[#allocation24] ss:$0 sm:$0xff] }
0x18e2   : > { %v4430_v50 = vadd.f32 %v4429_v47, %v4220_v41  ;;  %v4471_v51 = vadd.f32 %v4470_v48, %v4228_v42  ;;  %v4431_v53 = vpop.f32.mrb[70].mxu1  ;;  %v4472_v54 = vpop.f32.mrb[50].mxu0  ;;  %v6462_v47 = vld [vmem:[%s7199_s5] sm:$0xff]   ;;  %v6463_v48 = vld [vmem:[%s7199_s5 + $0x8] sm:$0xff]  }
0x18e3   : > { %v4475_v55 = vmul.f32 %v4428_v45, %v4428_v45  ;;  %v4477_v56 = vmul.f32 %v4469_v46, %v4469_v46  ;;  %v4432_v0 = vpop.f32.mrb[71].mxu1  ;;  %v4473_v57 = vpop.f32.mrb[51].mxu0 }
0x18e4   : > { %v4476_v62 = vmul.f32 %v4430_v50, %v4430_v50  ;;  %v4478_v58 = vmul.f32 %v4471_v51, %v4471_v51  ;;  %v6467_v0 = vld [vmem:[%s7199_s5 + $0x28] sm:$0xff]   ;;  %v6468_v57 = vld [vmem:[%s7199_s5 + $0x30] sm:$0xff]  }
0x18e5   : > { %v4479_v60 = vmul.f32 %v4475_v55, %v4428_v45  ;;  %v4481_v59 = vmul.f32 %v4477_v56, %v4469_v46  ;;  %v6465_v55 = vld [vmem:[%s7199_s5 + $0x18] sm:$0xff]   ;;  %v6466_v56 = vld [vmem:[%s7199_s5 + $0x20] sm:$0xff]  }
0x18e6   : > { %v4480_v10 = vmul.f32 %v4476_v62, %v4430_v50  ;;  %v4482_v52 = vmul.f32 %v4478_v58, %v4471_v51  ;;  %v6469_v62 = vld [vmem:[%s7199_s5 + $0x38] sm:$0xff]  }
0x18e7   : > { %v4483_v61 = vmul.f32 0.044715, %v4479_v60  ;;  %v4485_v63 = vmul.f32 0.044715, %v4481_v59 }
0x18e8   : > { %v4484_v1 = vmul.f32 0.044715, %v4480_v10  ;;  %v4486_v2 = vmul.f32 0.044715, %v4482_v52  ;;  %v5536_v52 = vld [vmem:[%s8064_s15] ss:$0 sm:$0xff] }
0x18e9   : > { %v4487_v3 = vadd.f32 %v4483_v61, %v4428_v45  ;;  %v4489_v4 = vadd.f32 %v4485_v63, %v4469_v46  ;;  %v5537_v63 = vld [vmem:[%s7194_s13] ss:$0 sm:$0xff] }
0x18ea   : > { %v4488_v5 = vadd.f32 %v4484_v1, %v4430_v50  ;;  %v4490_v8 = vadd.f32 %v4486_v2, %v4471_v51 }
0x18eb   : > { %v4491_v11 = vmul.f32 0.7978846, %v4487_v3  ;;  %v4493_v12 = vmul.f32 0.7978846, %v4489_v4  ;;  %v5538_v4 = vld [vmem:[%s7204_s9] ss:$0 sm:$0xff] }
0x18ec   : > { %v4492_v13 = vmul.f32 0.7978846, %v4488_v5  ;;  %v4494_v14 = vmul.f32 0.7978846, %v4490_v8 }
0x18ed   : > { %6518 = vtanh.f32 %v4491_v11 }
0x18ee   : > { %6520 = vtanh.f32 %v4493_v12 }
0x18ef   : > { %6522 = vtanh.f32 %v4492_v13 }
0x18f0   : > { %6524 = vtanh.f32 %v4494_v14 }
0x18f7   : > { %v6519_v28 = vpop.eup %6518 }
0x18f8   : > { %v6521_v38 = vpop.eup %6520  ;;  %v4499_v15 = vadd.f32 1.0, %v6519_v28 }
0x18f9   : > { %v6523_v17 = vpop.eup %6522  ;;  %v4501_v23 = vadd.f32 1.0, %v6521_v38 }
0x18fa   : > { %v6525_v20 = vpop.eup %6524  ;;  %v4500_v21 = vadd.f32 1.0, %v6523_v17  ;;  %v4503_v44 = vmul.f32 0.5, %v4499_v15 }
0x18fb   : > { %v4502_v24 = vadd.f32 1.0, %v6525_v20  ;;  %v4505_v25 = vmul.f32 0.5, %v4501_v23 }
0x18fc   : > { %v4504_v6 = vmul.f32 0.5, %v4500_v21  ;;  %v4507_v49 = vmul.f32 %v4503_v44, %v4428_v45 }
0x18fd   : > { %v4506_v26 = vmul.f32 0.5, %v4502_v24  ;;  %v4509_v29 = vmul.f32 %v4505_v25, %v4469_v46 }
0x18fe   : > { %v4508_v27 = vmul.f32 %v4504_v6, %v4430_v50  ;;  %v4575_v33 = vpack.c.bf16 %v4507_v49, %v4507_v49 }
0x18ff   : > { %v4510_v30 = vmul.f32 %v4506_v26, %v4471_v51  ;;  %v4577_v9 = vpack.c.bf16 %v4509_v29, %v4509_v29 }
0x1900   : > { %v4576_v31 = vpack.c.bf16 %v4508_v27, %v4508_v27 }
0x1901   : > { %v4578_v32 = vpack.c.bf16 %v4510_v30, %v4510_v30 }
0x1902   : > { %4803 = vmatprep.mubr.bf16.mxu1 %v4576_v31 }
0x1903   : > { %4843 = vmatprep.mubr.bf16.mxu0 %v4578_v32  ;;  %4804 = vmatmul.mubr.bf16.vlgmr.msra.gmra.mrb[72].mxu1 %v4575_v33 }
0x1904   : > { %4844 = vmatmul.mubr.bf16.vlgmr.msra.gmra.mrb[52].mxu0 %v4577_v9  ;;  %5972 = vmatprep.mubr.msk.bf16.mxu1 %vm7037_vm3, %v7035_v22 }
0x1905   : > { %5957 = vmatpush3.bf16.msra.mxu1 %v6462_v47 }
0x1906   : > { %5958 = vmatprep.subr.bf16.mxu1 %v7035_v22 }
0x1909   : > { %5959 = vmatpush3.bf16.msra.mxu1 %v6463_v48 }
0x190a   : > { %5960 = vmatprep.subr.bf16.mxu1 %v7035_v22 }
0x19d6   : > { %v5743_v34 = vpop.f32.mrb[72].mxu1 }
0x19d7   : > { %v5765_v7 = vpop.f32.mrb[52].mxu0  ;;  %v5744_v19 = vpop.f32.mrb[73].mxu1 }
0x19d8   : > { %v5745_v35 = vadd.f32 %v5744_v19, %v5743_v34  ;;  %v5766_v36 = vpop.f32.mrb[53].mxu0  ;;  %v5746_v37 = vpop.f32.mrb[74].mxu1 }
0x19d9   : > { %v5767_v39 = vadd.f32 %v5766_v36, %v5765_v7  ;;  %v5768_v40 = vpop.f32.mrb[54].mxu0  ;;  %v5747_v41 = vpop.f32.mrb[75].mxu1 }
0x19da   : > { %v5769_v42 = vpop.f32.mrb[55].mxu0 }
0x19db   : > { %v4846_v43 = vadd.f32 %v5767_v39, %v5745_v35 }
0x19dd   : > { %v4851_v45 = vadd.f32 %v4846_v43, %v7899_v16  ;;  %v6464_v16 = vld [vmem:[%s7199_s5 + $0x10] sm:$0xff]  }
0x19de   : > { %5961 = vmatpush3.bf16.msra.mxu1 %v6464_v16 }
0x19df   : > { %v4859_v46 = vadd.f32 %v5535_v18, %v4851_v45  ;;  %5962 = vmatprep.subr.bf16.mxu1 %v7035_v22 }
0x19e1   : > { %4862 = vadd.xlane.f32.xlu0 %v4859_v46 }
0x19e2   : > { %5963 = vmatpush3.bf16.msra.mxu1 %v6465_v55 }
0x19e3   : > { %5964 = vmatprep.subr.bf16.mxu1 %v7035_v22 }
0x19e6   : > { %5965 = vmatpush3.bf16.msra.mxu1 %v6466_v56 }
0x19e7   : > { %5966 = vmatprep.subr.bf16.mxu1 %v7035_v22 }
0x19ea   : > { %5967 = vmatpush3.bf16.msra.mxu1 %v6467_v0 }
0x19eb   : > { %5968 = vmatprep.subr.bf16.mxu1 %v7035_v22 }
0x19ee   : > { %5969 = vmatpush3.bf16.msra.mxu1 %v6468_v57 }
0x19ef   : > { %5970 = vmatprep.subr.bf16.mxu1 %v7035_v22 }
0x19f2   : > { %5971 = vmatpush3.bf16.msra.mxu1 %v6469_v62 }
0x1a6e   : > { %v4863_v50 = vpop.xlane.xlu0 %4862 }
0x1a6f   : > { %v4864_v51 = vmul.f32 0.0078125, %v4863_v50 }
0x1a71   : > { %v4865_v53 = vsub.f32 %v4859_v46, %v4864_v51 }
0x1a73   : > { %v4866_v54 = vmul.f32 %v4865_v53, %v4865_v53 }
0x1a75   : > { %4867 = vadd.xlane.f32.xlu0 %v4866_v54 }
0x1b02   : > { %v4868_v58 = vpop.xlane.xlu0 %4867 }
0x1b03   : > { %v4869_v60 = vmul.f32 0.0078125, %v4868_v58 }
0x1b05   : > { %v4870_v59 = vadd.f32 1e-06, %v4869_v60 }
0x1b07   : > { %6526 = vrsqrt.f32 %v4870_v59 }
0x1b11   : > { %v6527_v10 = vpop.eup %6526 }
0x1b12   : > { %v4872_v61 = vmul.f32 %v6527_v10, %v4865_v53 }
0x1b14   : > { %v4879_v1 = vmul.f32 %v5536_v52, %v4872_v61 }
0x1b16   : > { %v4886_v2 = vadd.f32 %v5537_v63, %v4879_v1 }
0x1b18   : > { %v4903_v3 = vpack.c.bf16 %v4886_v2, %v4886_v2 }
0x1b1a   : > { %5973 = vmatmul.mubr.bf16.vlgmr.msra.gmra.mrb[76].mxu1 %v4903_v3 }
0x1bed   : > { %v4993_v5 = vpop.f32.mrb[76].mxu1 }
0x1bee   : > { %v4994_v8 = vadd.f32 %v5538_v4, %v4993_v5  ;;  %v5974_v22 = vpop.f32.mrb[77].mxu1 }
0x1bef   : > { %v4996_v11 = vpop.f32.mrb[78].mxu1 }
0x1bf0   : > { %4999 = vst [vmem:[%s1172_s1] sm:$0xff] %v4994_v8  ;;  %v5975_v12 = vpop.f32.mrb[79].mxu1 }
0x1bf1 PF: > { %s83_s28 = sadd.s32 1, %s6986_s28  }
0x1bf2   : > { %p80_p13 = scmp.ge.s32.totalorder %s83_s28, 4  }
0x1bf4   :  { %82 = sbr.rel (!%p80_p13) target bundleno = 60 (0x3c), region = 271 }
0x1bfb   :  { %5019 = vsyncpa [#allocation3], 1 }
0x1bfc   :  { %5021 = vsyncpa [#allocation3 + $0x1], 1 }
0x1bfd   :  { %5022 = vsyncpa [#allocation5], 1 }
0x1bfe   :  { %5023 = vsyncpa [#allocation8], 1 }
0x1bff   :  { %5024 = vsyncpa [#allocation11], 1 }
0x1c00   :  { %5025 = vsyncpa [#allocation14], 1 }
0x1c01   :  { %5026 = vsyncpa [#allocation17], 1 }
0x1c02   :  { %5027 = vsyncpa [#allocation20], 1 }
0x1c03   :  { %5028 = vsyncpa [#allocation23], 1 }

</bundles_post_ra>
